<compile_context>
chip_gen: v5e
topology: v5e:2x2
jax: 0.10.0
libtpu: 0.0.40
codegen_flags: <defaults>
</compile_context>

<pallas_src>
import jax
import jax.numpy as jnp
from jax.experimental import pallas as pl
from jax.experimental.pallas import tpu as pltpu

PAD = 0        # CrossEntropyLoss(ignore_index=PAD)
LANE = 128
SUBLANE = 8


def _round_up(x, m):
    return (x + m - 1) // m * m


def _pad_to(x, shape):
    out = jnp.zeros(shape, x.dtype)
    return out.at[tuple(slice(0, s) for s in x.shape)].set(x)


def _merge_gru(wih_t, whh_t, bih, bhh, in_pad, h_pad):
    """Build merged, lane-aligned GRU weights (PyTorch gate order r, z, n).

    Returns:
      wih  : (in_pad, 3*h_pad) bf16   input-to-hidden, one lane-aligned slab/gate
             (hoisted out of the recurrence as one big matmul).
      bih3 : (1, 3*h_pad) f32         r/z slabs: b_ih + b_hh folded;
                                      n slab: b_in only (b_hn stays hidden-side).
      whh  : (h_pad, 3*h_pad) f32     hidden-to-hidden [W_hr | W_hz | W_hn].
      bhh3 : (1, 3*h_pad) f32         [0 | 0 | b_hn].
    """
    e = wih_t.shape[0]
    h = whh_t.shape[0]
    wih = jnp.zeros((in_pad, 3 * h_pad), jnp.float32)
    whh = jnp.zeros((h_pad, 3 * h_pad), jnp.float32)
    bih3 = jnp.zeros((1, 3 * h_pad), jnp.float32)
    bhh3 = jnp.zeros((1, 3 * h_pad), jnp.float32)
    for g in range(3):
        wih = wih.at[:e, g * h_pad:g * h_pad + h].set(wih_t[:, g * h:(g + 1) * h])
        whh = whh.at[:h, g * h_pad:g * h_pad + h].set(whh_t[:, g * h:(g + 1) * h])
    # r, z: fold b_ih + b_hh into the (hoisted) input projection bias.
    bih3 = bih3.at[:, 0:h].set(bih[:, 0:h] + bhh[:, 0:h])
    bih3 = bih3.at[:, h_pad:h_pad + h].set(bih[:, h:2 * h] + bhh[:, h:2 * h])
    # n: b_in goes with the input projection; b_hn must stay inside r*(...).
    bih3 = bih3.at[:, 2 * h_pad:2 * h_pad + h].set(bih[:, 2 * h:3 * h])
    bhh3 = bhh3.at[:, 2 * h_pad:2 * h_pad + h].set(bhh[:, 2 * h:3 * h])
    return wih.astype(jnp.bfloat16), bih3, whh, bhh3


# ----------------------------------------------------------------------------
# Fused kernel: encoder GRU -> fusion -> decoder GRU -> logits -> masked CE
# ----------------------------------------------------------------------------
def qgen_fused_kernel(
    lens_ref,       # (BP, 1)  int32        dialogue lengths (padded rows = 0)
    dia_ref,        # (T_dial*BP, EP) bf16  dialogue embeddings, time-major flat
    y_ref,          # (T_dec*BP,  EP) bf16  decoder-input embeddings, flat
    labels_ref,     # (T_dec*BP, 1) i32     time-major teacher targets (PAD-padded)
    vfeat_ref,      # (BP, IDP) f32         pooled visual feature (L == 1)
    enc_wih_ref,    # (EP, 3*HP) bf16       encoder input-to-hidden (merged gates)
    enc_bih_ref,    # (1, 3*HP) f32
    enc_whh_ref,    # (HP, 3*HP) f32        encoder [W_hr | W_hz | W_hn]
    enc_bhh_ref,    # (1, 3*HP) f32         [0 | 0 | b_hn]
    conv_w_ref,     # (IDP, VFP) f32        image_compress (Conv1d k=1) weight^T
    conv_b_ref,     # (1, VFP) f32
    fus_wh_ref,     # (HP, DP) f32          ConcatFusion weight (hidden part)
    fus_wv_ref,     # (VFP, DP) f32         ConcatFusion weight (visual part)
    fus_b_ref,      # (1, DP) f32
    dec_wih_ref,    # (EP, 3*DP) bf16       decoder input-to-hidden (merged gates)
    dec_bih_ref,    # (1, 3*DP) f32
    dec_whh_ref,    # (DP, 3*DP) f32        decoder [W_hr | W_hz | W_hn]
    dec_bhh_ref,    # (1, 3*DP) f32
    out_w_ref,      # (DP, VP) bf16         vocab projection weight^T
    out_b_ref,      # (1, VP) f32           vocab bias (padded cols = -1e9)
    loss_ref,       # out: (1, 1) f32
    ix_enc_ref,     # scratch: (T_dial*BP, 3*HP) f32  hoisted encoder x@Wih+b
    ix_dec_ref,     # scratch: (T_dec*BP,  3*DP) f32  hoisted decoder x@Wih+b
    h_all_ref,      # scratch: (T_dec*BP, DP) f32     decoder hidden states
):
    bp = lens_ref.shape[0]
    t_dial = dia_ref.shape[0] // bp
    t_dec = y_ref.shape[0] // bp
    hp = enc_whh_ref.shape[0]
    dp = dec_whh_ref.shape[0]

    # ---- hoisted input projections: one big bf16 MXU matmul per recurrence ---
    ix_enc_ref[...] = (jnp.dot(dia_ref[...], enc_wih_ref[...],
                               preferred_element_type=jnp.float32)
                       + enc_bih_ref[...])
    ix_dec_ref[...] = (jnp.dot(y_ref[...], dec_wih_ref[...],
                               preferred_element_type=jnp.float32)
                       + dec_bih_ref[...])

    def gru_step(ix, h, whh_ref, bhh_ref, hdim):
        # Single recurrent MXU push/drain per step: gh = h @ [W_hr|W_hz|W_hn].
        # PyTorch semantics: r = σ(i_r + h_r), z = σ(i_z + h_z),
        #                    n = tanh(i_n + r*(W_hn h + b_hn)),
        #                    h' = (1-z)*n + z*h.
        gh = (jnp.dot(h, whh_ref[...], preferred_element_type=jnp.float32)
              + bhh_ref[...])
        r = jax.nn.sigmoid(ix[:, :hdim] + gh[:, :hdim])
        z = jax.nn.sigmoid(ix[:, hdim:2 * hdim] + gh[:, hdim:2 * hdim])
        n = jnp.tanh(ix[:, 2 * hdim:] + r * gh[:, 2 * hdim:])
        return (1.0 - z) * n + z * h

    # ---- dialogue encoder GRU (length-masked; h of padded rows stays 0) -----
    lens = lens_ref[...]                                    # (BP, 1) int32

    def enc_body(t, h):
        row = pl.multiple_of(t * bp, SUBLANE)
        ix = ix_enc_ref[pl.ds(row, bp), :]
        h_new = gru_step(ix, h, enc_whh_ref, enc_bhh_ref, hp)
        return jnp.where(lens > t, h_new, h)                # update while t < len

    # NOTE: full unroll is fine at T=8; switch to unroll=2/4 for long sequences.
    h_enc = jax.lax.fori_loop(0, t_dial, enc_body,
                              jnp.zeros((bp, hp), jnp.float32), unroll=True)

    # ---- visual branch: L == 1 so pooling is identity; Conv1d(k=1) == matmul;
    #      ConcatFusion == linear + tanh; visual_dropout is identity (eval). ---
    v = (jnp.dot(vfeat_ref[...], conv_w_ref[...],
                 preferred_element_type=jnp.float32) + conv_b_ref[...])
    h_dec = jnp.tanh(
        jnp.dot(h_enc, fus_wh_ref[...], preferred_element_type=jnp.float32)
        + jnp.dot(v, fus_wv_ref[...], preferred_element_type=jnp.float32)
        + fus_b_ref[...])

    # ---- decoder GRU (teacher-forced); store hidden states in VMEM scratch --
    def dec_body(t, h):
        row = pl.multiple_of(t * bp, SUBLANE)
        ix = ix_dec_ref[pl.ds(row, bp), :]
        h_new = gru_step(ix, h, dec_whh_ref, dec_bhh_ref, dp)
        h_all_ref[pl.ds(row, bp), :] = h_new
        return h_new

    jax.lax.fori_loop(0, t_dec, dec_body, h_dec, unroll=True)

    # ---- batched vocab projection: one lane-dense bf16 (T*B, H) @ (H, V) -----
    logits = (jnp.dot(h_all_ref[...].astype(jnp.bfloat16), out_w_ref[...],
                      preferred_element_type=jnp.float32) + out_b_ref[...])

    # ---- cross entropy, ignore_index=PAD, mean over valid targets (f32) -----
    labels = labels_ref[...]                                # (N, 1) int32
    m = jnp.max(logits, axis=-1, keepdims=True)
    lse = m + jnp.log(jnp.sum(jnp.exp(logits - m), axis=-1, keepdims=True))
    vocab_idx = jax.lax.broadcasted_iota(jnp.int32, logits.shape, 1)
    picked = jnp.sum(jnp.where(vocab_idx == labels, logits, 0.0),
                     axis=-1, keepdims=True)
    valid = (labels != PAD).astype(jnp.float32)
    total = jnp.sum((lse - picked) * valid)
    count = jnp.maximum(jnp.sum(valid), 1.0)                # guard all-PAD batch
    loss_ref[...] = jnp.reshape(total / count, (1, 1))


def run_qgen_fused(lens, dia_flat, y_flat, labels, vfeat,
                   enc_wih, enc_bih, enc_whh, enc_bhh,
                   conv_w, conv_b, fus_wh, fus_wv, fus_b,
                   dec_wih, dec_bih, dec_whh, dec_bhh, out_w, out_b):
    t_dial_rows = dia_flat.shape[0]
    t_dec_rows = y_flat.shape[0]
    hp3 = enc_whh.shape[1]
    dp3 = dec_whh.shape[1]
    dp = dec_whh.shape[0]
    inputs = (lens, dia_flat, y_flat, labels, vfeat,
              enc_wih, enc_bih, enc_whh, enc_bhh,
              conv_w, conv_b, fus_wh, fus_wv, fus_b,
              dec_wih, dec_bih, dec_whh, dec_bhh, out_w, out_b)

    def full_spec(x):
        zeros = (0,) * x.ndim
        return pl.BlockSpec(x.shape, lambda i, _z=zeros: _z)

    return pl.pallas_call(
        qgen_fused_kernel,
        out_shape=jax.ShapeDtypeStruct((1, 1), jnp.float32),
        grid_spec=pltpu.PrefetchScalarGridSpec(
            num_scalar_prefetch=0,
            grid=(1,),
            in_specs=[full_spec(x) for x in inputs],
            out_specs=pl.BlockSpec((1, 1), lambda i: (0, 0)),
            scratch_shapes=[
                pltpu.VMEM((t_dial_rows, hp3), jnp.float32),   # ix_enc
                pltpu.VMEM((t_dec_rows, dp3), jnp.float32),    # ix_dec
                pltpu.VMEM((t_dec_rows, dp), jnp.float32),     # h_all
            ],
        ),
        compiler_params=pltpu.CompilerParams(
            dimension_semantics=("arbitrary",)),
    )(*inputs)


# ----------------------------------------------------------------------------
# Parameters (deterministic, synthetic) + full forward pass
# ----------------------------------------------------------------------------
def init_params(key, vocab, emb_dim, sess_hidden, image_dim, v_feat_dim,
                dec_hidden):
    ks = jax.random.split(key, 16)

    def uni(k, shape, scale):
        return jax.random.uniform(k, shape, jnp.float32, -scale, scale)

    se = 1.0 / jnp.sqrt(sess_hidden)
    de = 1.0 / jnp.sqrt(dec_hidden)
    params = {
        # MyEmbedding
        "emb": jax.random.normal(ks[0], (vocab, emb_dim), jnp.float32) * 0.1,
        # GRUEncoder (1 layer, unidirectional) — stored transposed [in, 3H]
        "enc_wih_t": uni(ks[1], (emb_dim, 3 * sess_hidden), se),
        "enc_whh_t": uni(ks[2], (sess_hidden, 3 * sess_hidden), se),
        "enc_bih": uni(ks[3], (1, 3 * sess_hidden), se),
        "enc_bhh": uni(ks[4], (1, 3 * sess_hidden), se),
        # image_compress: Conv1d(image_dim, v_feature, 1), kaiming-normal, bias 0
        "conv_w_t": (jax.random.normal(ks[5], (image_dim, v_feat_dim),
                                       jnp.float32)
                     * jnp.sqrt(2.0 / image_dim)),
        "conv_b": jnp.zeros((1, v_feat_dim), jnp.float32),
        # ConcatFusion: Linear(sess_hidden + v_feature -> decoder_hidden), tanh
        "fus_wh": uni(ks[6], (sess_hidden, dec_hidden),
                      1.0 / jnp.sqrt(sess_hidden + v_feat_dim)),
        "fus_wv": uni(ks[7], (v_feat_dim, dec_hidden),
                      1.0 / jnp.sqrt(sess_hidden + v_feat_dim)),
        "fus_b": uni(ks[8], (1, dec_hidden),
                     1.0 / jnp.sqrt(sess_hidden + v_feat_dim)),
        # GRUDecoderBase (1 layer) + vocab projection
        "dec_wih_t": uni(ks[9], (emb_dim, 3 * dec_hidden), de),
        "dec_whh_t": uni(ks[10], (dec_hidden, 3 * dec_hidden), de),
        "dec_bih": uni(ks[11], (1, 3 * dec_hidden), de),
        "dec_bhh": uni(ks[12], (1, 3 * dec_hidden), de),
        "out_w_t": uni(ks[13], (dec_hidden, vocab), de),
        "out_b": uni(ks[14], (1, vocab), de),
    }
    return params


@jax.jit
def qgen_forward(params, dialogues, dial_lens, v_feature, y):
    """Returns (0, gen_loss) like QGenNetwork.forward (image_arch='vgg16',
    visual_att=False, single-layer GRUs, eval-mode dropout)."""
    B, T_dial = dialogues.shape
    T_dec = y.shape[1] - 1

    vocab, E = params["emb"].shape
    Hs = params["enc_whh_t"].shape[0]
    Dimg, Vf = params["conv_w_t"].shape
    Hd = params["dec_whh_t"].shape[0]
    V = params["out_w_t"].shape[1]

    BP = _round_up(B, SUBLANE)
    EP = _round_up(E, LANE)
    HP = _round_up(Hs, LANE)
    IDP = _round_up(Dimg, LANE)
    VFP = _round_up(Vf, LANE)
    DP = _round_up(Hd, LANE)
    VP = _round_up(V, LANE)

    # ---- embeddings (gather stays in XLA), time-major, bf16, flattened ------
    # TODO(synk): the gather could move in-kernel via scalar-prefetched ids to
    # skip the HBM round trip of embedded activations; negligible at this size.
    emb_p = _pad_to(params["emb"], (vocab, EP)).astype(jnp.bfloat16)
    dia_emb = jnp.transpose(jnp.take(emb_p, dialogues, axis=0), (1, 0, 2))
    dia_flat = _pad_to(dia_emb, (T_dial, BP, EP)).reshape(T_dial * BP, EP)
    y_emb = jnp.transpose(jnp.take(emb_p, y[:, :-1], axis=0), (1, 0, 2))
    y_flat = _pad_to(y_emb, (T_dec, BP, EP)).reshape(T_dec * BP, EP)

    lens = _pad_to(dial_lens.reshape(B, 1).astype(jnp.int32), (BP, 1))

    labels_tb = jnp.transpose(y[:, 1:], (1, 0)).astype(jnp.int32)   # (T_dec, B)
    labels = jnp.full((T_dec, BP), PAD, jnp.int32)
    labels = labels.at[:, :B].set(labels_tb).reshape(T_dec * BP, 1)

    # vgg16 arch: v_feature.unsqueeze(1) with uniform score over L=1 — the
    # einsum pooling is the identity, so only the raw feature is passed in.
    vfeat = _pad_to(v_feature, (BP, IDP))

    # ---- weights: merge gates, split input/hidden parts, pad lane-aligned ---
    enc_wih, enc_bih, enc_whh, enc_bhh = _merge_gru(
        params["enc_wih_t"], params["enc_whh_t"],
        params["enc_bih"], params["enc_bhh"], EP, HP)
    dec_wih, dec_bih, dec_whh, dec_bhh = _merge_gru(
        params["dec_wih_t"], params["dec_whh_t"],
        params["dec_bih"], params["dec_bhh"], EP, DP)

    conv_w = _pad_to(params["conv_w_t"], (IDP, VFP))
    conv_b = _pad_to(params["conv_b"], (1, VFP))
    fus_wh = _pad_to(params["fus_wh"], (HP, DP))
    fus_wv = _pad_to(params["fus_wv"], (VFP, DP))
    fus_b = _pad_to(params["fus_b"], (1, DP))
    out_w = _pad_to(params["out_w_t"], (DP, VP)).astype(jnp.bfloat16)
    out_b = jnp.full((1, VP), -1e9, jnp.float32).at[:, :V].set(params["out_b"])

    gen_loss = run_qgen_fused(
        lens, dia_flat, y_flat, labels, vfeat,
        enc_wih, enc_bih, enc_whh, enc_bhh,
        conv_w, conv_b, fus_wh, fus_wv, fus_b,
        dec_wih, dec_bih, dec_whh, dec_bhh, out_w, out_b)[0, 0]
    return 0, gen_loss


# TODO(synk): generate()/beam search and VisualAttention (args['visual_att'])
# are not exercised by forward() with the chosen config and are omitted.

if __name__ == "__main__":
    # Small config consistent with the module's __init__.
    VOCAB = 128
    EMB_DIM = 32            # args['embedding_dim']
    SESS_HIDDEN = 32        # args['session_hidden']
    IMAGE_DIM = 64          # args['image_dim']  (image_arch='vgg16')
    V_FEATURE = 32          # args['v_feature']
    DEC_HIDDEN = 32         # args['decoder_hidden']
    B, T_DIAL, T_Y = 4, 8, 8

    root = jax.random.PRNGKey(0)
    k_par, k_dia, k_v, k_y = jax.random.split(root, 4)

    params = init_params(k_par, VOCAB, EMB_DIM, SESS_HIDDEN, IMAGE_DIM,
                         V_FEATURE, DEC_HIDDEN)

    dialogues = jax.random.randint(k_dia, (B, T_DIAL), 1, VOCAB, jnp.int32)
    dial_lens = jnp.array([8, 5, 7, 3], jnp.int32)
    v_feature = jax.random.normal(k_v, (B, IMAGE_DIM), jnp.float32)
    y = jax.random.randint(k_y, (B, T_Y), 2, VOCAB, jnp.int32)
    y = y.at[:, 0].set(1)            # SOS
    y = y.at[2, 5:].set(PAD)         # some padded targets (ignored in loss)
    y = y.at[3, 6:].set(PAD)

    zero, gen_loss = qgen_forward(params, dialogues, dial_lens, v_feature, y)
    gen_loss = jax.block_until_ready(gen_loss)
    assert jnp.isfinite(gen_loss), "loss is not finite"
    print("KERNEL_OK")
</pallas_src>

<mosaic_0001>
module attributes {stable_mosaic.version = 11 : i64} {
  func.func @qgen_fused_kernel(%arg0: i32, %arg1: memref<8x1xi32, #tpu.memory_space<vmem>>, %arg2: memref<64x128xbf16, #tpu.memory_space<vmem>>, %arg3: memref<56x128xbf16, #tpu.memory_space<vmem>>, %arg4: memref<56x1xi32, #tpu.memory_space<vmem>>, %arg5: memref<8x128xf32, #tpu.memory_space<vmem>>, %arg6: memref<128x384xbf16, #tpu.memory_space<vmem>>, %arg7: memref<1x384xf32, #tpu.memory_space<vmem>>, %arg8: memref<128x384xf32, #tpu.memory_space<vmem>>, %arg9: memref<1x384xf32, #tpu.memory_space<vmem>>, %arg10: memref<128x128xf32, #tpu.memory_space<vmem>>, %arg11: memref<1x128xf32, #tpu.memory_space<vmem>>, %arg12: memref<128x128xf32, #tpu.memory_space<vmem>>, %arg13: memref<128x128xf32, #tpu.memory_space<vmem>>, %arg14: memref<1x128xf32, #tpu.memory_space<vmem>>, %arg15: memref<128x384xbf16, #tpu.memory_space<vmem>>, %arg16: memref<1x384xf32, #tpu.memory_space<vmem>>, %arg17: memref<128x384xf32, #tpu.memory_space<vmem>>, %arg18: memref<1x384xf32, #tpu.memory_space<vmem>>, %arg19: memref<128x128xbf16, #tpu.memory_space<vmem>>, %arg20: memref<1x128xf32, #tpu.memory_space<vmem>>, %arg21: memref<1x1xf32, #tpu.memory_space<vmem>>, %arg22: memref<64x384xf32, #tpu.memory_space<vmem>>, %arg23: memref<56x384xf32, #tpu.memory_space<vmem>>, %arg24: memref<56x128xf32, #tpu.memory_space<vmem>>) attributes {dimension_semantics = [#tpu.dimension_semantics<arbitrary>], iteration_bounds = array<i64: 1>, scalar_prefetch = 0 : i64, scratch_operands = 3 : i64, tpu.core_type = #tpu.core_type<tc>, window_params = [{pipeline_mode = #tpu.pipeline_mode<synchronous>, transform_indices = @transform_0, window_bounds = array<i64: 8, 1>}, {pipeline_mode = #tpu.pipeline_mode<synchronous>, transform_indices = @transform_1, window_bounds = array<i64: 64, 128>}, {pipeline_mode = #tpu.pipeline_mode<synchronous>, transform_indices = @transform_2, window_bounds = array<i64: 56, 128>}, {pipeline_mode = #tpu.pipeline_mode<synchronous>, transform_indices = @transform_3, window_bounds = array<i64: 56, 1>}, {pipeline_mode = #tpu.pipeline_mode<synchronous>, transform_indices = @transform_4, window_bounds = array<i64: 8, 128>}, {pipeline_mode = #tpu.pipeline_mode<synchronous>, transform_indices = @transform_5, window_bounds = array<i64: 128, 384>}, {pipeline_mode = #tpu.pipeline_mode<synchronous>, transform_indices = @transform_6, window_bounds = array<i64: 1, 384>}, {pipeline_mode = #tpu.pipeline_mode<synchronous>, transform_indices = @transform_7, window_bounds = array<i64: 128, 384>}, {pipeline_mode = #tpu.pipeline_mode<synchronous>, transform_indices = @transform_8, window_bounds = array<i64: 1, 384>}, {pipeline_mode = #tpu.pipeline_mode<synchronous>, transform_indices = @transform_9, window_bounds = array<i64: 128, 128>}, {pipeline_mode = #tpu.pipeline_mode<synchronous>, transform_indices = @transform_10, window_bounds = array<i64: 1, 128>}, {pipeline_mode = #tpu.pipeline_mode<synchronous>, transform_indices = @transform_11, window_bounds = array<i64: 128, 128>}, {pipeline_mode = #tpu.pipeline_mode<synchronous>, transform_indices = @transform_12, window_bounds = array<i64: 128, 128>}, {pipeline_mode = #tpu.pipeline_mode<synchronous>, transform_indices = @transform_13, window_bounds = array<i64: 1, 128>}, {pipeline_mode = #tpu.pipeline_mode<synchronous>, transform_indices = @transform_14, window_bounds = array<i64: 128, 384>}, {pipeline_mode = #tpu.pipeline_mode<synchronous>, transform_indices = @transform_15, window_bounds = array<i64: 1, 384>}, {pipeline_mode = #tpu.pipeline_mode<synchronous>, transform_indices = @transform_16, window_bounds = array<i64: 128, 384>}, {pipeline_mode = #tpu.pipeline_mode<synchronous>, transform_indices = @transform_17, window_bounds = array<i64: 1, 384>}, {pipeline_mode = #tpu.pipeline_mode<synchronous>, transform_indices = @transform_18, window_bounds = array<i64: 128, 128>}, {pipeline_mode = #tpu.pipeline_mode<synchronous>, transform_indices = @transform_19, window_bounds = array<i64: 1, 128>}, {pipeline_mode = #tpu.pipeline_mode<synchronous>, transform_indices = @transform_20, window_bounds = array<i64: 1, 1>}]} {
    %c0 = arith.constant 0 : index
    %c0_0 = arith.constant 0 : index
    %0 = vector.load %arg2[%c0, %c0_0] : memref<64x128xbf16, #tpu.memory_space<vmem>>, vector<64x128xbf16>
    %c0_1 = arith.constant 0 : index
    %c0_2 = arith.constant 0 : index
    %1 = vector.load %arg6[%c0_1, %c0_2] : memref<128x384xbf16, #tpu.memory_space<vmem>>, vector<128x384xbf16>
    %cst = arith.constant dense<0.000000e+00> : vector<64x384xf32>
    %2 = tpu.matmul %0, %1, %cst {dimension_numbers = #tpu.dot_dimension_numbers<[1], [0], [0], [1], [0, 0, 1, 1], [], []>} : vector<64x128xbf16>, vector<128x384xbf16>, vector<64x384xf32> -> vector<64x384xf32>
    %c0_3 = arith.constant 0 : index
    %c0_4 = arith.constant 0 : index
    %3 = vector.load %arg7[%c0_3, %c0_4] : memref<1x384xf32, #tpu.memory_space<vmem>>, vector<1x384xf32>
    %4 = vector.broadcast %3 : vector<1x384xf32> to vector<64x384xf32>
    %5 = arith.addf %2, %4 : vector<64x384xf32>
    %c0_5 = arith.constant 0 : index
    %c0_6 = arith.constant 0 : index
    %6 = vector.load %arg22[%c0_5, %c0_6] : memref<64x384xf32, #tpu.memory_space<vmem>>, vector<64x384xf32>
    tpu.vector_store %arg22[%c0_5, %c0_6], %5 {strides = array<i32>} : memref<64x384xf32, #tpu.memory_space<vmem>>, vector<64x384xf32>,
    %c0_7 = arith.constant 0 : index
    %c0_8 = arith.constant 0 : index
    %7 = vector.load %arg3[%c0_7, %c0_8] : memref<56x128xbf16, #tpu.memory_space<vmem>>, vector<56x128xbf16>
    %c0_9 = arith.constant 0 : index
    %c0_10 = arith.constant 0 : index
    %8 = vector.load %arg15[%c0_9, %c0_10] : memref<128x384xbf16, #tpu.memory_space<vmem>>, vector<128x384xbf16>
    %cst_11 = arith.constant dense<0.000000e+00> : vector<56x384xf32>
    %9 = tpu.matmul %7, %8, %cst_11 {dimension_numbers = #tpu.dot_dimension_numbers<[1], [0], [0], [1], [0, 0, 1, 1], [], []>} : vector<56x128xbf16>, vector<128x384xbf16>, vector<56x384xf32> -> vector<56x384xf32>
    %c0_12 = arith.constant 0 : index
    %c0_13 = arith.constant 0 : index
    %10 = vector.load %arg16[%c0_12, %c0_13] : memref<1x384xf32, #tpu.memory_space<vmem>>, vector<1x384xf32>
    %11 = vector.broadcast %10 : vector<1x384xf32> to vector<56x384xf32>
    %12 = arith.addf %9, %11 : vector<56x384xf32>
    %c0_14 = arith.constant 0 : index
    %c0_15 = arith.constant 0 : index
    %13 = vector.load %arg23[%c0_14, %c0_15] : memref<56x384xf32, #tpu.memory_space<vmem>>, vector<56x384xf32>
    tpu.vector_store %arg23[%c0_14, %c0_15], %12 {strides = array<i32>} : memref<56x384xf32, #tpu.memory_space<vmem>>, vector<56x384xf32>,
    %c0_16 = arith.constant 0 : index
    %c0_17 = arith.constant 0 : index
    %14 = vector.load %arg1[%c0_16, %c0_17] : memref<8x1xi32, #tpu.memory_space<vmem>>, vector<8x1xi32>
    %cst_18 = arith.constant 0.000000e+00 : f32
    %15 = vector.broadcast %cst_18 : f32 to vector<8x128xf32>
    %c0_i32 = arith.constant 0 : i32
    %c8_i32 = arith.constant 8 : i32
    %16 = arith.muli %c0_i32, %c8_i32 : i32
    %17 = tpu.assume_multiple %16, 8 : i32
    %18 = arith.index_cast %17 : i32 to index
    %c0_19 = arith.constant 0 : index
    %19 = vector.load %arg22[%18, %c0_19] : memref<64x384xf32, #tpu.memory_space<vmem>>, vector<8x384xf32>
    %c0_20 = arith.constant 0 : index
    %c0_21 = arith.constant 0 : index
    %20 = vector.load %arg8[%c0_20, %c0_21] : memref<128x384xf32, #tpu.memory_space<vmem>>, vector<128x384xf32>
    %cst_22 = arith.constant dense<0.000000e+00> : vector<8x384xf32>
    %21 = tpu.matmul %15, %20, %cst_22 {dimension_numbers = #tpu.dot_dimension_numbers<[1], [0], [0], [1], [0, 0, 1, 1], [], []>} : vector<8x128xf32>, vector<128x384xf32>, vector<8x384xf32> -> vector<8x384xf32>
    %c0_23 = arith.constant 0 : index
    %c0_24 = arith.constant 0 : index
    %22 = vector.load %arg9[%c0_23, %c0_24] : memref<1x384xf32, #tpu.memory_space<vmem>>, vector<1x384xf32>
    %23 = vector.broadcast %22 : vector<1x384xf32> to vector<8x384xf32>
    %24 = arith.addf %21, %23 : vector<8x384xf32>
    %25 = vector.extract_strided_slice %19 {offsets = [0, 0], sizes = [8, 128], strides = [1, 1]} : vector<8x384xf32> to vector<8x128xf32>
    %26 = vector.extract_strided_slice %24 {offsets = [0, 0], sizes = [8, 128], strides = [1, 1]} : vector<8x384xf32> to vector<8x128xf32>
    %27 = arith.addf %25, %26 : vector<8x128xf32>
    %28 = arith.negf %27 : vector<8x128xf32>
    %29 = math.exp %28 : vector<8x128xf32>
    %cst_25 = arith.constant 1.000000e+00 : f32
    %30 = vector.broadcast %cst_25 : f32 to vector<8x128xf32>
    %31 = arith.addf %30, %29 : vector<8x128xf32>
    %32 = arith.divf %30, %31 : vector<8x128xf32>
    %33 = vector.extract_strided_slice %19 {offsets = [0, 128], sizes = [8, 128], strides = [1, 1]} : vector<8x384xf32> to vector<8x128xf32>
    %34 = vector.extract_strided_slice %24 {offsets = [0, 128], sizes = [8, 128], strides = [1, 1]} : vector<8x384xf32> to vector<8x128xf32>
    %35 = arith.addf %33, %34 : vector<8x128xf32>
    %36 = arith.negf %35 : vector<8x128xf32>
    %37 = math.exp %36 : vector<8x128xf32>
    %cst_26 = arith.constant 1.000000e+00 : f32
    %38 = vector.broadcast %cst_26 : f32 to vector<8x128xf32>
    %39 = arith.addf %38, %37 : vector<8x128xf32>
    %40 = arith.divf %38, %39 : vector<8x128xf32>
    %41 = vector.extract_strided_slice %19 {offsets = [0, 256], sizes = [8, 128], strides = [1, 1]} : vector<8x384xf32> to vector<8x128xf32>
    %42 = vector.extract_strided_slice %24 {offsets = [0, 256], sizes = [8, 128], strides = [1, 1]} : vector<8x384xf32> to vector<8x128xf32>
    %43 = arith.mulf %32, %42 : vector<8x128xf32>
    %44 = arith.addf %41, %43 : vector<8x128xf32>
    %45 = math.tanh %44 : vector<8x128xf32>
    %cst_27 = arith.constant 1.000000e+00 : f32
    %46 = vector.broadcast %cst_27 : f32 to vector<8x128xf32>
    %47 = arith.subf %46, %40 : vector<8x128xf32>
    %48 = arith.mulf %47, %45 : vector<8x128xf32>
    %49 = arith.mulf %40, %15 : vector<8x128xf32>
    %50 = arith.addf %48, %49 : vector<8x128xf32>
    %51 = vector.broadcast %c0_i32 : i32 to vector<8x1xi32>
    %52 = arith.cmpi sgt, %14, %51 : vector<8x1xi32>
    %53 = vector.shape_cast %52 : vector<8x1xi1> to vector<8x1xi1>
    %54 = vector.broadcast %53 : vector<8x1xi1> to vector<8x128xi1>
    %55 = arith.select %54, %50, %15 : vector<8x128xi1>, vector<8x128xf32>
    %c1_i32 = arith.constant 1 : i32
    %c8_i32_28 = arith.constant 8 : i32
    %56 = arith.muli %c1_i32, %c8_i32_28 : i32
    %57 = tpu.assume_multiple %56, 8 : i32
    %58 = arith.index_cast %57 : i32 to index
    %c0_29 = arith.constant 0 : index
    %59 = vector.load %arg22[%58, %c0_29] : memref<64x384xf32, #tpu.memory_space<vmem>>, vector<8x384xf32>
    %c0_30 = arith.constant 0 : index
    %c0_31 = arith.constant 0 : index
    %60 = vector.load %arg8[%c0_30, %c0_31] : memref<128x384xf32, #tpu.memory_space<vmem>>, vector<128x384xf32>
    %cst_32 = arith.constant dense<0.000000e+00> : vector<8x384xf32>
    %61 = tpu.matmul %55, %60, %cst_32 {dimension_numbers = #tpu.dot_dimension_numbers<[1], [0], [0], [1], [0, 0, 1, 1], [], []>} : vector<8x128xf32>, vector<128x384xf32>, vector<8x384xf32> -> vector<8x384xf32>
    %c0_33 = arith.constant 0 : index
    %c0_34 = arith.constant 0 : index
    %62 = vector.load %arg9[%c0_33, %c0_34] : memref<1x384xf32, #tpu.memory_space<vmem>>, vector<1x384xf32>
    %63 = vector.broadcast %62 : vector<1x384xf32> to vector<8x384xf32>
    %64 = arith.addf %61, %63 : vector<8x384xf32>
    %65 = vector.extract_strided_slice %59 {offsets = [0, 0], sizes = [8, 128], strides = [1, 1]} : vector<8x384xf32> to vector<8x128xf32>
    %66 = vector.extract_strided_slice %64 {offsets = [0, 0], sizes = [8, 128], strides = [1, 1]} : vector<8x384xf32> to vector<8x128xf32>
    %67 = arith.addf %65, %66 : vector<8x128xf32>
    %68 = arith.negf %67 : vector<8x128xf32>
    %69 = math.exp %68 : vector<8x128xf32>
    %cst_35 = arith.constant 1.000000e+00 : f32
    %70 = vector.broadcast %cst_35 : f32 to vector<8x128xf32>
    %71 = arith.addf %70, %69 : vector<8x128xf32>
    %72 = arith.divf %70, %71 : vector<8x128xf32>
    %73 = vector.extract_strided_slice %59 {offsets = [0, 128], sizes = [8, 128], strides = [1, 1]} : vector<8x384xf32> to vector<8x128xf32>
    %74 = vector.extract_strided_slice %64 {offsets = [0, 128], sizes = [8, 128], strides = [1, 1]} : vector<8x384xf32> to vector<8x128xf32>
    %75 = arith.addf %73, %74 : vector<8x128xf32>
    %76 = arith.negf %75 : vector<8x128xf32>
    %77 = math.exp %76 : vector<8x128xf32>
    %cst_36 = arith.constant 1.000000e+00 : f32
    %78 = vector.broadcast %cst_36 : f32 to vector<8x128xf32>
    %79 = arith.addf %78, %77 : vector<8x128xf32>
    %80 = arith.divf %78, %79 : vector<8x128xf32>
    %81 = vector.extract_strided_slice %59 {offsets = [0, 256], sizes = [8, 128], strides = [1, 1]} : vector<8x384xf32> to vector<8x128xf32>
    %82 = vector.extract_strided_slice %64 {offsets = [0, 256], sizes = [8, 128], strides = [1, 1]} : vector<8x384xf32> to vector<8x128xf32>
    %83 = arith.mulf %72, %82 : vector<8x128xf32>
    %84 = arith.addf %81, %83 : vector<8x128xf32>
    %85 = math.tanh %84 : vector<8x128xf32>
    %cst_37 = arith.constant 1.000000e+00 : f32
    %86 = vector.broadcast %cst_37 : f32 to vector<8x128xf32>
    %87 = arith.subf %86, %80 : vector<8x128xf32>
    %88 = arith.mulf %87, %85 : vector<8x128xf32>
    %89 = arith.mulf %80, %55 : vector<8x128xf32>
    %90 = arith.addf %88, %89 : vector<8x128xf32>
    %91 = vector.broadcast %c1_i32 : i32 to vector<8x1xi32>
    %92 = arith.cmpi sgt, %14, %91 : vector<8x1xi32>
    %93 = vector.shape_cast %92 : vector<8x1xi1> to vector<8x1xi1>
    %94 = vector.broadcast %93 : vector<8x1xi1> to vector<8x128xi1>
    %95 = arith.select %94, %90, %55 : vector<8x128xi1>, vector<8x128xf32>
    %c2_i32 = arith.constant 2 : i32
    %c8_i32_38 = arith.constant 8 : i32
    %96 = arith.muli %c2_i32, %c8_i32_38 : i32
    %97 = tpu.assume_multiple %96, 8 : i32
    %98 = arith.index_cast %97 : i32 to index
    %c0_39 = arith.constant 0 : index
    %99 = vector.load %arg22[%98, %c0_39] : memref<64x384xf32, #tpu.memory_space<vmem>>, vector<8x384xf32>
    %c0_40 = arith.constant 0 : index
    %c0_41 = arith.constant 0 : index
    %100 = vector.load %arg8[%c0_40, %c0_41] : memref<128x384xf32, #tpu.memory_space<vmem>>, vector<128x384xf32>
    %cst_42 = arith.constant dense<0.000000e+00> : vector<8x384xf32>
    %101 = tpu.matmul %95, %100, %cst_42 {dimension_numbers = #tpu.dot_dimension_numbers<[1], [0], [0], [1], [0, 0, 1, 1], [], []>} : vector<8x128xf32>, vector<128x384xf32>, vector<8x384xf32> -> vector<8x384xf32>
    %c0_43 = arith.constant 0 : index
    %c0_44 = arith.constant 0 : index
    %102 = vector.load %arg9[%c0_43, %c0_44] : memref<1x384xf32, #tpu.memory_space<vmem>>, vector<1x384xf32>
    %103 = vector.broadcast %102 : vector<1x384xf32> to vector<8x384xf32>
    %104 = arith.addf %101, %103 : vector<8x384xf32>
    %105 = vector.extract_strided_slice %99 {offsets = [0, 0], sizes = [8, 128], strides = [1, 1]} : vector<8x384xf32> to vector<8x128xf32>
    %106 = vector.extract_strided_slice %104 {offsets = [0, 0], sizes = [8, 128], strides = [1, 1]} : vector<8x384xf32> to vector<8x128xf32>
    %107 = arith.addf %105, %106 : vector<8x128xf32>
    %108 = arith.negf %107 : vector<8x128xf32>
    %109 = math.exp %108 : vector<8x128xf32>
    %cst_45 = arith.constant 1.000000e+00 : f32
    %110 = vector.broadcast %cst_45 : f32 to vector<8x128xf32>
    %111 = arith.addf %110, %109 : vector<8x128xf32>
    %112 = arith.divf %110, %111 : vector<8x128xf32>
    %113 = vector.extract_strided_slice %99 {offsets = [0, 128], sizes = [8, 128], strides = [1, 1]} : vector<8x384xf32> to vector<8x128xf32>
    %114 = vector.extract_strided_slice %104 {offsets = [0, 128], sizes = [8, 128], strides = [1, 1]} : vector<8x384xf32> to vector<8x128xf32>
    %115 = arith.addf %113, %114 : vector<8x128xf32>
    %116 = arith.negf %115 : vector<8x128xf32>
    %117 = math.exp %116 : vector<8x128xf32>
    %cst_46 = arith.constant 1.000000e+00 : f32
    %118 = vector.broadcast %cst_46 : f32 to vector<8x128xf32>
    %119 = arith.addf %118, %117 : vector<8x128xf32>
    %120 = arith.divf %118, %119 : vector<8x128xf32>
    %121 = vector.extract_strided_slice %99 {offsets = [0, 256], sizes = [8, 128], strides = [1, 1]} : vector<8x384xf32> to vector<8x128xf32>
    %122 = vector.extract_strided_slice %104 {offsets = [0, 256], sizes = [8, 128], strides = [1, 1]} : vector<8x384xf32> to vector<8x128xf32>
    %123 = arith.mulf %112, %122 : vector<8x128xf32>
    %124 = arith.addf %121, %123 : vector<8x128xf32>
    %125 = math.tanh %124 : vector<8x128xf32>
    %cst_47 = arith.constant 1.000000e+00 : f32
    %126 = vector.broadcast %cst_47 : f32 to vector<8x128xf32>
    %127 = arith.subf %126, %120 : vector<8x128xf32>
    %128 = arith.mulf %127, %125 : vector<8x128xf32>
    %129 = arith.mulf %120, %95 : vector<8x128xf32>
    %130 = arith.addf %128, %129 : vector<8x128xf32>
    %131 = vector.broadcast %c2_i32 : i32 to vector<8x1xi32>
    %132 = arith.cmpi sgt, %14, %131 : vector<8x1xi32>
    %133 = vector.shape_cast %132 : vector<8x1xi1> to vector<8x1xi1>
    %134 = vector.broadcast %133 : vector<8x1xi1> to vector<8x128xi1>
    %135 = arith.select %134, %130, %95 : vector<8x128xi1>, vector<8x128xf32>
    %c3_i32 = arith.constant 3 : i32
    %c8_i32_48 = arith.constant 8 : i32
    %136 = arith.muli %c3_i32, %c8_i32_48 : i32
    %137 = tpu.assume_multiple %136, 8 : i32
    %138 = arith.index_cast %137 : i32 to index
    %c0_49 = arith.constant 0 : index
    %139 = vector.load %arg22[%138, %c0_49] : memref<64x384xf32, #tpu.memory_space<vmem>>, vector<8x384xf32>
    %c0_50 = arith.constant 0 : index
    %c0_51 = arith.constant 0 : index
    %140 = vector.load %arg8[%c0_50, %c0_51] : memref<128x384xf32, #tpu.memory_space<vmem>>, vector<128x384xf32>
    %cst_52 = arith.constant dense<0.000000e+00> : vector<8x384xf32>
    %141 = tpu.matmul %135, %140, %cst_52 {dimension_numbers = #tpu.dot_dimension_numbers<[1], [0], [0], [1], [0, 0, 1, 1], [], []>} : vector<8x128xf32>, vector<128x384xf32>, vector<8x384xf32> -> vector<8x384xf32>
    %c0_53 = arith.constant 0 : index
    %c0_54 = arith.constant 0 : index
    %142 = vector.load %arg9[%c0_53, %c0_54] : memref<1x384xf32, #tpu.memory_space<vmem>>, vector<1x384xf32>
    %143 = vector.broadcast %142 : vector<1x384xf32> to vector<8x384xf32>
    %144 = arith.addf %141, %143 : vector<8x384xf32>
    %145 = vector.extract_strided_slice %139 {offsets = [0, 0], sizes = [8, 128], strides = [1, 1]} : vector<8x384xf32> to vector<8x128xf32>
    %146 = vector.extract_strided_slice %144 {offsets = [0, 0], sizes = [8, 128], strides = [1, 1]} : vector<8x384xf32> to vector<8x128xf32>
    %147 = arith.addf %145, %146 : vector<8x128xf32>
    %148 = arith.negf %147 : vector<8x128xf32>
    %149 = math.exp %148 : vector<8x128xf32>
    %cst_55 = arith.constant 1.000000e+00 : f32
    %150 = vector.broadcast %cst_55 : f32 to vector<8x128xf32>
    %151 = arith.addf %150, %149 : vector<8x128xf32>
    %152 = arith.divf %150, %151 : vector<8x128xf32>
    %153 = vector.extract_strided_slice %139 {offsets = [0, 128], sizes = [8, 128], strides = [1, 1]} : vector<8x384xf32> to vector<8x128xf32>
    %154 = vector.extract_strided_slice %144 {offsets = [0, 128], sizes = [8, 128], strides = [1, 1]} : vector<8x384xf32> to vector<8x128xf32>
    %155 = arith.addf %153, %154 : vector<8x128xf32>
    %156 = arith.negf %155 : vector<8x128xf32>
    %157 = math.exp %156 : vector<8x128xf32>
    %cst_56 = arith.constant 1.000000e+00 : f32
    %158 = vector.broadcast %cst_56 : f32 to vector<8x128xf32>
    %159 = arith.addf %158, %157 : vector<8x128xf32>
    %160 = arith.divf %158, %159 : vector<8x128xf32>
    %161 = vector.extract_strided_slice %139 {offsets = [0, 256], sizes = [8, 128], strides = [1, 1]} : vector<8x384xf32> to vector<8x128xf32>
    %162 = vector.extract_strided_slice %144 {offsets = [0, 256], sizes = [8, 128], strides = [1, 1]} : vector<8x384xf32> to vector<8x128xf32>
    %163 = arith.mulf %152, %162 : vector<8x128xf32>
    %164 = arith.addf %161, %163 : vector<8x128xf32>
    %165 = math.tanh %164 : vector<8x128xf32>
    %cst_57 = arith.constant 1.000000e+00 : f32
    %166 = vector.broadcast %cst_57 : f32 to vector<8x128xf32>
    %167 = arith.subf %166, %160 : vector<8x128xf32>
    %168 = arith.mulf %167, %165 : vector<8x128xf32>
    %169 = arith.mulf %160, %135 : vector<8x128xf32>
    %170 = arith.addf %168, %169 : vector<8x128xf32>
    %171 = vector.broadcast %c3_i32 : i32 to vector<8x1xi32>
    %172 = arith.cmpi sgt, %14, %171 : vector<8x1xi32>
    %173 = vector.shape_cast %172 : vector<8x1xi1> to vector<8x1xi1>
    %174 = vector.broadcast %173 : vector<8x1xi1> to vector<8x128xi1>
    %175 = arith.select %174, %170, %135 : vector<8x128xi1>, vector<8x128xf32>
    %c4_i32 = arith.constant 4 : i32
    %c8_i32_58 = arith.constant 8 : i32
    %176 = arith.muli %c4_i32, %c8_i32_58 : i32
    %177 = tpu.assume_multiple %176, 8 : i32
    %178 = arith.index_cast %177 : i32 to index
    %c0_59 = arith.constant 0 : index
    %179 = vector.load %arg22[%178, %c0_59] : memref<64x384xf32, #tpu.memory_space<vmem>>, vector<8x384xf32>
    %c0_60 = arith.constant 0 : index
    %c0_61 = arith.constant 0 : index
    %180 = vector.load %arg8[%c0_60, %c0_61] : memref<128x384xf32, #tpu.memory_space<vmem>>, vector<128x384xf32>
    %cst_62 = arith.constant dense<0.000000e+00> : vector<8x384xf32>
    %181 = tpu.matmul %175, %180, %cst_62 {dimension_numbers = #tpu.dot_dimension_numbers<[1], [0], [0], [1], [0, 0, 1, 1], [], []>} : vector<8x128xf32>, vector<128x384xf32>, vector<8x384xf32> -> vector<8x384xf32>
    %c0_63 = arith.constant 0 : index
    %c0_64 = arith.constant 0 : index
    %182 = vector.load %arg9[%c0_63, %c0_64] : memref<1x384xf32, #tpu.memory_space<vmem>>, vector<1x384xf32>
    %183 = vector.broadcast %182 : vector<1x384xf32> to vector<8x384xf32>
    %184 = arith.addf %181, %183 : vector<8x384xf32>
    %185 = vector.extract_strided_slice %179 {offsets = [0, 0], sizes = [8, 128], strides = [1, 1]} : vector<8x384xf32> to vector<8x128xf32>
    %186 = vector.extract_strided_slice %184 {offsets = [0, 0], sizes = [8, 128], strides = [1, 1]} : vector<8x384xf32> to vector<8x128xf32>
    %187 = arith.addf %185, %186 : vector<8x128xf32>
    %188 = arith.negf %187 : vector<8x128xf32>
    %189 = math.exp %188 : vector<8x128xf32>
    %cst_65 = arith.constant 1.000000e+00 : f32
    %190 = vector.broadcast %cst_65 : f32 to vector<8x128xf32>
    %191 = arith.addf %190, %189 : vector<8x128xf32>
    %192 = arith.divf %190, %191 : vector<8x128xf32>
    %193 = vector.extract_strided_slice %179 {offsets = [0, 128], sizes = [8, 128], strides = [1, 1]} : vector<8x384xf32> to vector<8x128xf32>
    %194 = vector.extract_strided_slice %184 {offsets = [0, 128], sizes = [8, 128], strides = [1, 1]} : vector<8x384xf32> to vector<8x128xf32>
    %195 = arith.addf %193, %194 : vector<8x128xf32>
    %196 = arith.negf %195 : vector<8x128xf32>
    %197 = math.exp %196 : vector<8x128xf32>
    %cst_66 = arith.constant 1.000000e+00 : f32
    %198 = vector.broadcast %cst_66 : f32 to vector<8x128xf32>
    %199 = arith.addf %198, %197 : vector<8x128xf32>
    %200 = arith.divf %198, %199 : vector<8x128xf32>
    %201 = vector.extract_strided_slice %179 {offsets = [0, 256], sizes = [8, 128], strides = [1, 1]} : vector<8x384xf32> to vector<8x128xf32>
    %202 = vector.extract_strided_slice %184 {offsets = [0, 256], sizes = [8, 128], strides = [1, 1]} : vector<8x384xf32> to vector<8x128xf32>
    %203 = arith.mulf %192, %202 : vector<8x128xf32>
    %204 = arith.addf %201, %203 : vector<8x128xf32>
    %205 = math.tanh %204 : vector<8x128xf32>
    %cst_67 = arith.constant 1.000000e+00 : f32
    %206 = vector.broadcast %cst_67 : f32 to vector<8x128xf32>
    %207 = arith.subf %206, %200 : vector<8x128xf32>
    %208 = arith.mulf %207, %205 : vector<8x128xf32>
    %209 = arith.mulf %200, %175 : vector<8x128xf32>
    %210 = arith.addf %208, %209 : vector<8x128xf32>
    %211 = vector.broadcast %c4_i32 : i32 to vector<8x1xi32>
    %212 = arith.cmpi sgt, %14, %211 : vector<8x1xi32>
    %213 = vector.shape_cast %212 : vector<8x1xi1> to vector<8x1xi1>
    %214 = vector.broadcast %213 : vector<8x1xi1> to vector<8x128xi1>
    %215 = arith.select %214, %210, %175 : vector<8x128xi1>, vector<8x128xf32>
    %c5_i32 = arith.constant 5 : i32
    %c8_i32_68 = arith.constant 8 : i32
    %216 = arith.muli %c5_i32, %c8_i32_68 : i32
    %217 = tpu.assume_multiple %216, 8 : i32
    %218 = arith.index_cast %217 : i32 to index
    %c0_69 = arith.constant 0 : index
    %219 = vector.load %arg22[%218, %c0_69] : memref<64x384xf32, #tpu.memory_space<vmem>>, vector<8x384xf32>
    %c0_70 = arith.constant 0 : index
    %c0_71 = arith.constant 0 : index
    %220 = vector.load %arg8[%c0_70, %c0_71] : memref<128x384xf32, #tpu.memory_space<vmem>>, vector<128x384xf32>
    %cst_72 = arith.constant dense<0.000000e+00> : vector<8x384xf32>
    %221 = tpu.matmul %215, %220, %cst_72 {dimension_numbers = #tpu.dot_dimension_numbers<[1], [0], [0], [1], [0, 0, 1, 1], [], []>} : vector<8x128xf32>, vector<128x384xf32>, vector<8x384xf32> -> vector<8x384xf32>
    %c0_73 = arith.constant 0 : index
    %c0_74 = arith.constant 0 : index
    %222 = vector.load %arg9[%c0_73, %c0_74] : memref<1x384xf32, #tpu.memory_space<vmem>>, vector<1x384xf32>
    %223 = vector.broadcast %222 : vector<1x384xf32> to vector<8x384xf32>
    %224 = arith.addf %221, %223 : vector<8x384xf32>
    %225 = vector.extract_strided_slice %219 {offsets = [0, 0], sizes = [8, 128], strides = [1, 1]} : vector<8x384xf32> to vector<8x128xf32>
    %226 = vector.extract_strided_slice %224 {offsets = [0, 0], sizes = [8, 128], strides = [1, 1]} : vector<8x384xf32> to vector<8x128xf32>
    %227 = arith.addf %225, %226 : vector<8x128xf32>
    %228 = arith.negf %227 : vector<8x128xf32>
    %229 = math.exp %228 : vector<8x128xf32>
    %cst_75 = arith.constant 1.000000e+00 : f32
    %230 = vector.broadcast %cst_75 : f32 to vector<8x128xf32>
    %231 = arith.addf %230, %229 : vector<8x128xf32>
    %232 = arith.divf %230, %231 : vector<8x128xf32>
    %233 = vector.extract_strided_slice %219 {offsets = [0, 128], sizes = [8, 128], strides = [1, 1]} : vector<8x384xf32> to vector<8x128xf32>
    %234 = vector.extract_strided_slice %224 {offsets = [0, 128], sizes = [8, 128], strides = [1, 1]} : vector<8x384xf32> to vector<8x128xf32>
    %235 = arith.addf %233, %234 : vector<8x128xf32>
    %236 = arith.negf %235 : vector<8x128xf32>
    %237 = math.exp %236 : vector<8x128xf32>
    %cst_76 = arith.constant 1.000000e+00 : f32
    %238 = vector.broadcast %cst_76 : f32 to vector<8x128xf32>
    %239 = arith.addf %238, %237 : vector<8x128xf32>
    %240 = arith.divf %238, %239 : vector<8x128xf32>
    %241 = vector.extract_strided_slice %219 {offsets = [0, 256], sizes = [8, 128], strides = [1, 1]} : vector<8x384xf32> to vector<8x128xf32>
    %242 = vector.extract_strided_slice %224 {offsets = [0, 256], sizes = [8, 128], strides = [1, 1]} : vector<8x384xf32> to vector<8x128xf32>
    %243 = arith.mulf %232, %242 : vector<8x128xf32>
    %244 = arith.addf %241, %243 : vector<8x128xf32>
    %245 = math.tanh %244 : vector<8x128xf32>
    %cst_77 = arith.constant 1.000000e+00 : f32
    %246 = vector.broadcast %cst_77 : f32 to vector<8x128xf32>
    %247 = arith.subf %246, %240 : vector<8x128xf32>
    %248 = arith.mulf %247, %245 : vector<8x128xf32>
    %249 = arith.mulf %240, %215 : vector<8x128xf32>
    %250 = arith.addf %248, %249 : vector<8x128xf32>
    %251 = vector.broadcast %c5_i32 : i32 to vector<8x1xi32>
    %252 = arith.cmpi sgt, %14, %251 : vector<8x1xi32>
    %253 = vector.shape_cast %252 : vector<8x1xi1> to vector<8x1xi1>
    %254 = vector.broadcast %253 : vector<8x1xi1> to vector<8x128xi1>
    %255 = arith.select %254, %250, %215 : vector<8x128xi1>, vector<8x128xf32>
    %c6_i32 = arith.constant 6 : i32
    %c8_i32_78 = arith.constant 8 : i32
    %256 = arith.muli %c6_i32, %c8_i32_78 : i32
    %257 = tpu.assume_multiple %256, 8 : i32
    %258 = arith.index_cast %257 : i32 to index
    %c0_79 = arith.constant 0 : index
    %259 = vector.load %arg22[%258, %c0_79] : memref<64x384xf32, #tpu.memory_space<vmem>>, vector<8x384xf32>
    %c0_80 = arith.constant 0 : index
    %c0_81 = arith.constant 0 : index
    %260 = vector.load %arg8[%c0_80, %c0_81] : memref<128x384xf32, #tpu.memory_space<vmem>>, vector<128x384xf32>
    %cst_82 = arith.constant dense<0.000000e+00> : vector<8x384xf32>
    %261 = tpu.matmul %255, %260, %cst_82 {dimension_numbers = #tpu.dot_dimension_numbers<[1], [0], [0], [1], [0, 0, 1, 1], [], []>} : vector<8x128xf32>, vector<128x384xf32>, vector<8x384xf32> -> vector<8x384xf32>
    %c0_83 = arith.constant 0 : index
    %c0_84 = arith.constant 0 : index
    %262 = vector.load %arg9[%c0_83, %c0_84] : memref<1x384xf32, #tpu.memory_space<vmem>>, vector<1x384xf32>
    %263 = vector.broadcast %262 : vector<1x384xf32> to vector<8x384xf32>
    %264 = arith.addf %261, %263 : vector<8x384xf32>
    %265 = vector.extract_strided_slice %259 {offsets = [0, 0], sizes = [8, 128], strides = [1, 1]} : vector<8x384xf32> to vector<8x128xf32>
    %266 = vector.extract_strided_slice %264 {offsets = [0, 0], sizes = [8, 128], strides = [1, 1]} : vector<8x384xf32> to vector<8x128xf32>
    %267 = arith.addf %265, %266 : vector<8x128xf32>
    %268 = arith.negf %267 : vector<8x128xf32>
    %269 = math.exp %268 : vector<8x128xf32>
    %cst_85 = arith.constant 1.000000e+00 : f32
    %270 = vector.broadcast %cst_85 : f32 to vector<8x128xf32>
    %271 = arith.addf %270, %269 : vector<8x128xf32>
    %272 = arith.divf %270, %271 : vector<8x128xf32>
    %273 = vector.extract_strided_slice %259 {offsets = [0, 128], sizes = [8, 128], strides = [1, 1]} : vector<8x384xf32> to vector<8x128xf32>
    %274 = vector.extract_strided_slice %264 {offsets = [0, 128], sizes = [8, 128], strides = [1, 1]} : vector<8x384xf32> to vector<8x128xf32>
    %275 = arith.addf %273, %274 : vector<8x128xf32>
    %276 = arith.negf %275 : vector<8x128xf32>
    %277 = math.exp %276 : vector<8x128xf32>
    %cst_86 = arith.constant 1.000000e+00 : f32
    %278 = vector.broadcast %cst_86 : f32 to vector<8x128xf32>
    %279 = arith.addf %278, %277 : vector<8x128xf32>
    %280 = arith.divf %278, %279 : vector<8x128xf32>
    %281 = vector.extract_strided_slice %259 {offsets = [0, 256], sizes = [8, 128], strides = [1, 1]} : vector<8x384xf32> to vector<8x128xf32>
    %282 = vector.extract_strided_slice %264 {offsets = [0, 256], sizes = [8, 128], strides = [1, 1]} : vector<8x384xf32> to vector<8x128xf32>
    %283 = arith.mulf %272, %282 : vector<8x128xf32>
    %284 = arith.addf %281, %283 : vector<8x128xf32>
    %285 = math.tanh %284 : vector<8x128xf32>
    %cst_87 = arith.constant 1.000000e+00 : f32
    %286 = vector.broadcast %cst_87 : f32 to vector<8x128xf32>
    %287 = arith.subf %286, %280 : vector<8x128xf32>
    %288 = arith.mulf %287, %285 : vector<8x128xf32>
    %289 = arith.mulf %280, %255 : vector<8x128xf32>
    %290 = arith.addf %288, %289 : vector<8x128xf32>
    %291 = vector.broadcast %c6_i32 : i32 to vector<8x1xi32>
    %292 = arith.cmpi sgt, %14, %291 : vector<8x1xi32>
    %293 = vector.shape_cast %292 : vector<8x1xi1> to vector<8x1xi1>
    %294 = vector.broadcast %293 : vector<8x1xi1> to vector<8x128xi1>
    %295 = arith.select %294, %290, %255 : vector<8x128xi1>, vector<8x128xf32>
    %c7_i32 = arith.constant 7 : i32
    %c8_i32_88 = arith.constant 8 : i32
    %296 = arith.muli %c7_i32, %c8_i32_88 : i32
    %297 = tpu.assume_multiple %296, 8 : i32
    %298 = arith.index_cast %297 : i32 to index
    %c0_89 = arith.constant 0 : index
    %299 = vector.load %arg22[%298, %c0_89] : memref<64x384xf32, #tpu.memory_space<vmem>>, vector<8x384xf32>
    %c0_90 = arith.constant 0 : index
    %c0_91 = arith.constant 0 : index
    %300 = vector.load %arg8[%c0_90, %c0_91] : memref<128x384xf32, #tpu.memory_space<vmem>>, vector<128x384xf32>
    %cst_92 = arith.constant dense<0.000000e+00> : vector<8x384xf32>
    %301 = tpu.matmul %295, %300, %cst_92 {dimension_numbers = #tpu.dot_dimension_numbers<[1], [0], [0], [1], [0, 0, 1, 1], [], []>} : vector<8x128xf32>, vector<128x384xf32>, vector<8x384xf32> -> vector<8x384xf32>
    %c0_93 = arith.constant 0 : index
    %c0_94 = arith.constant 0 : index
    %302 = vector.load %arg9[%c0_93, %c0_94] : memref<1x384xf32, #tpu.memory_space<vmem>>, vector<1x384xf32>
    %303 = vector.broadcast %302 : vector<1x384xf32> to vector<8x384xf32>
    %304 = arith.addf %301, %303 : vector<8x384xf32>
    %305 = vector.extract_strided_slice %299 {offsets = [0, 0], sizes = [8, 128], strides = [1, 1]} : vector<8x384xf32> to vector<8x128xf32>
    %306 = vector.extract_strided_slice %304 {offsets = [0, 0], sizes = [8, 128], strides = [1, 1]} : vector<8x384xf32> to vector<8x128xf32>
    %307 = arith.addf %305, %306 : vector<8x128xf32>
    %308 = arith.negf %307 : vector<8x128xf32>
    %309 = math.exp %308 : vector<8x128xf32>
    %cst_95 = arith.constant 1.000000e+00 : f32
    %310 = vector.broadcast %cst_95 : f32 to vector<8x128xf32>
    %311 = arith.addf %310, %309 : vector<8x128xf32>
    %312 = arith.divf %310, %311 : vector<8x128xf32>
    %313 = vector.extract_strided_slice %299 {offsets = [0, 128], sizes = [8, 128], strides = [1, 1]} : vector<8x384xf32> to vector<8x128xf32>
    %314 = vector.extract_strided_slice %304 {offsets = [0, 128], sizes = [8, 128], strides = [1, 1]} : vector<8x384xf32> to vector<8x128xf32>
    %315 = arith.addf %313, %314 : vector<8x128xf32>
    %316 = arith.negf %315 : vector<8x128xf32>
    %317 = math.exp %316 : vector<8x128xf32>
    %cst_96 = arith.constant 1.000000e+00 : f32
    %318 = vector.broadcast %cst_96 : f32 to vector<8x128xf32>
    %319 = arith.addf %318, %317 : vector<8x128xf32>
    %320 = arith.divf %318, %319 : vector<8x128xf32>
    %321 = vector.extract_strided_slice %299 {offsets = [0, 256], sizes = [8, 128], strides = [1, 1]} : vector<8x384xf32> to vector<8x128xf32>
    %322 = vector.extract_strided_slice %304 {offsets = [0, 256], sizes = [8, 128], strides = [1, 1]} : vector<8x384xf32> to vector<8x128xf32>
    %323 = arith.mulf %312, %322 : vector<8x128xf32>
    %324 = arith.addf %321, %323 : vector<8x128xf32>
    %325 = math.tanh %324 : vector<8x128xf32>
    %cst_97 = arith.constant 1.000000e+00 : f32
    %326 = vector.broadcast %cst_97 : f32 to vector<8x128xf32>
    %327 = arith.subf %326, %320 : vector<8x128xf32>
    %328 = arith.mulf %327, %325 : vector<8x128xf32>
    %329 = arith.mulf %320, %295 : vector<8x128xf32>
    %330 = arith.addf %328, %329 : vector<8x128xf32>
    %331 = vector.broadcast %c7_i32 : i32 to vector<8x1xi32>
    %332 = arith.cmpi sgt, %14, %331 : vector<8x1xi32>
    %333 = vector.shape_cast %332 : vector<8x1xi1> to vector<8x1xi1>
    %334 = vector.broadcast %333 : vector<8x1xi1> to vector<8x128xi1>
    %335 = arith.select %334, %330, %295 : vector<8x128xi1>, vector<8x128xf32>
    %c8_i32_98 = arith.constant 8 : i32
    %c0_99 = arith.constant 0 : index
    %c0_100 = arith.constant 0 : index
    %336 = vector.load %arg5[%c0_99, %c0_100] : memref<8x128xf32, #tpu.memory_space<vmem>>, vector<8x128xf32>
    %c0_101 = arith.constant 0 : index
    %c0_102 = arith.constant 0 : index
    %337 = vector.load %arg10[%c0_101, %c0_102] : memref<128x128xf32, #tpu.memory_space<vmem>>, vector<128x128xf32>
    %cst_103 = arith.constant dense<0.000000e+00> : vector<8x128xf32>
    %338 = tpu.matmul %336, %337, %cst_103 {dimension_numbers = #tpu.dot_dimension_numbers<[1], [0], [0], [1], [0, 0, 1, 1], [], []>} : vector<8x128xf32>, vector<128x128xf32>, vector<8x128xf32> -> vector<8x128xf32>
    %c0_104 = arith.constant 0 : index
    %c0_105 = arith.constant 0 : index
    %339 = vector.load %arg11[%c0_104, %c0_105] : memref<1x128xf32, #tpu.memory_space<vmem>>, vector<1x128xf32>
    %340 = vector.broadcast %339 : vector<1x128xf32> to vector<8x128xf32>
    %341 = arith.addf %338, %340 : vector<8x128xf32>
    %c0_106 = arith.constant 0 : index
    %c0_107 = arith.constant 0 : index
    %342 = vector.load %arg12[%c0_106, %c0_107] : memref<128x128xf32, #tpu.memory_space<vmem>>, vector<128x128xf32>
    %cst_108 = arith.constant dense<0.000000e+00> : vector<8x128xf32>
    %343 = tpu.matmul %335, %342, %cst_108 {dimension_numbers = #tpu.dot_dimension_numbers<[1], [0], [0], [1], [0, 0, 1, 1], [], []>} : vector<8x128xf32>, vector<128x128xf32>, vector<8x128xf32> -> vector<8x128xf32>
    %c0_109 = arith.constant 0 : index
    %c0_110 = arith.constant 0 : index
    %344 = vector.load %arg13[%c0_109, %c0_110] : memref<128x128xf32, #tpu.memory_space<vmem>>, vector<128x128xf32>
    %cst_111 = arith.constant dense<0.000000e+00> : vector<8x128xf32>
    %345 = tpu.matmul %341, %344, %cst_111 {dimension_numbers = #tpu.dot_dimension_numbers<[1], [0], [0], [1], [0, 0, 1, 1], [], []>} : vector<8x128xf32>, vector<128x128xf32>, vector<8x128xf32> -> vector<8x128xf32>
    %346 = arith.addf %343, %345 : vector<8x128xf32>
    %c0_112 = arith.constant 0 : index
    %c0_113 = arith.constant 0 : index
    %347 = vector.load %arg14[%c0_112, %c0_113] : memref<1x128xf32, #tpu.memory_space<vmem>>, vector<1x128xf32>
    %348 = vector.broadcast %347 : vector<1x128xf32> to vector<8x128xf32>
    %349 = arith.addf %346, %348 : vector<8x128xf32>
    %350 = math.tanh %349 : vector<8x128xf32>
    %c0_i32_114 = arith.constant 0 : i32
    %c8_i32_115 = arith.constant 8 : i32
    %351 = arith.muli %c0_i32_114, %c8_i32_115 : i32
    %352 = tpu.assume_multiple %351, 8 : i32
    %353 = arith.index_cast %352 : i32 to index
    %c0_116 = arith.constant 0 : index
    %354 = vector.load %arg23[%353, %c0_116] : memref<56x384xf32, #tpu.memory_space<vmem>>, vector<8x384xf32>
    %c0_117 = arith.constant 0 : index
    %c0_118 = arith.constant 0 : index
    %355 = vector.load %arg17[%c0_117, %c0_118] : memref<128x384xf32, #tpu.memory_space<vmem>>, vector<128x384xf32>
    %cst_119 = arith.constant dense<0.000000e+00> : vector<8x384xf32>
    %356 = tpu.matmul %350, %355, %cst_119 {dimension_numbers = #tpu.dot_dimension_numbers<[1], [0], [0], [1], [0, 0, 1, 1], [], []>} : vector<8x128xf32>, vector<128x384xf32>, vector<8x384xf32> -> vector<8x384xf32>
    %c0_120 = arith.constant 0 : index
    %c0_121 = arith.constant 0 : index
    %357 = vector.load %arg18[%c0_120, %c0_121] : memref<1x384xf32, #tpu.memory_space<vmem>>, vector<1x384xf32>
    %358 = vector.broadcast %357 : vector<1x384xf32> to vector<8x384xf32>
    %359 = arith.addf %356, %358 : vector<8x384xf32>
    %360 = vector.extract_strided_slice %354 {offsets = [0, 0], sizes = [8, 128], strides = [1, 1]} : vector<8x384xf32> to vector<8x128xf32>
    %361 = vector.extract_strided_slice %359 {offsets = [0, 0], sizes = [8, 128], strides = [1, 1]} : vector<8x384xf32> to vector<8x128xf32>
    %362 = arith.addf %360, %361 : vector<8x128xf32>
    %363 = arith.negf %362 : vector<8x128xf32>
    %364 = math.exp %363 : vector<8x128xf32>
    %cst_122 = arith.constant 1.000000e+00 : f32
    %365 = vector.broadcast %cst_122 : f32 to vector<8x128xf32>
    %366 = arith.addf %365, %364 : vector<8x128xf32>
    %367 = arith.divf %365, %366 : vector<8x128xf32>
    %368 = vector.extract_strided_slice %354 {offsets = [0, 128], sizes = [8, 128], strides = [1, 1]} : vector<8x384xf32> to vector<8x128xf32>
    %369 = vector.extract_strided_slice %359 {offsets = [0, 128], sizes = [8, 128], strides = [1, 1]} : vector<8x384xf32> to vector<8x128xf32>
    %370 = arith.addf %368, %369 : vector<8x128xf32>
    %371 = arith.negf %370 : vector<8x128xf32>
    %372 = math.exp %371 : vector<8x128xf32>
    %cst_123 = arith.constant 1.000000e+00 : f32
    %373 = vector.broadcast %cst_123 : f32 to vector<8x128xf32>
    %374 = arith.addf %373, %372 : vector<8x128xf32>
    %375 = arith.divf %373, %374 : vector<8x128xf32>
    %376 = vector.extract_strided_slice %354 {offsets = [0, 256], sizes = [8, 128], strides = [1, 1]} : vector<8x384xf32> to vector<8x128xf32>
    %377 = vector.extract_strided_slice %359 {offsets = [0, 256], sizes = [8, 128], strides = [1, 1]} : vector<8x384xf32> to vector<8x128xf32>
    %378 = arith.mulf %367, %377 : vector<8x128xf32>
    %379 = arith.addf %376, %378 : vector<8x128xf32>
    %380 = math.tanh %379 : vector<8x128xf32>
    %cst_124 = arith.constant 1.000000e+00 : f32
    %381 = vector.broadcast %cst_124 : f32 to vector<8x128xf32>
    %382 = arith.subf %381, %375 : vector<8x128xf32>
    %383 = arith.mulf %382, %380 : vector<8x128xf32>
    %384 = arith.mulf %375, %350 : vector<8x128xf32>
    %385 = arith.addf %383, %384 : vector<8x128xf32>
    %386 = arith.index_cast %352 : i32 to index
    %c0_125 = arith.constant 0 : index
    %387 = vector.load %arg24[%386, %c0_125] : memref<56x128xf32, #tpu.memory_space<vmem>>, vector<8x128xf32>
    tpu.vector_store %arg24[%386, %c0_125], %385 {strides = array<i32>} : memref<56x128xf32, #tpu.memory_space<vmem>>, vector<8x128xf32>,
    %c1_i32_126 = arith.constant 1 : i32
    %c8_i32_127 = arith.constant 8 : i32
    %388 = arith.muli %c1_i32_126, %c8_i32_127 : i32
    %389 = tpu.assume_multiple %388, 8 : i32
    %390 = arith.index_cast %389 : i32 to index
    %c0_128 = arith.constant 0 : index
    %391 = vector.load %arg23[%390, %c0_128] : memref<56x384xf32, #tpu.memory_space<vmem>>, vector<8x384xf32>
    %c0_129 = arith.constant 0 : index
    %c0_130 = arith.constant 0 : index
    %392 = vector.load %arg17[%c0_129, %c0_130] : memref<128x384xf32, #tpu.memory_space<vmem>>, vector<128x384xf32>
    %cst_131 = arith.constant dense<0.000000e+00> : vector<8x384xf32>
    %393 = tpu.matmul %385, %392, %cst_131 {dimension_numbers = #tpu.dot_dimension_numbers<[1], [0], [0], [1], [0, 0, 1, 1], [], []>} : vector<8x128xf32>, vector<128x384xf32>, vector<8x384xf32> -> vector<8x384xf32>
    %c0_132 = arith.constant 0 : index
    %c0_133 = arith.constant 0 : index
    %394 = vector.load %arg18[%c0_132, %c0_133] : memref<1x384xf32, #tpu.memory_space<vmem>>, vector<1x384xf32>
    %395 = vector.broadcast %394 : vector<1x384xf32> to vector<8x384xf32>
    %396 = arith.addf %393, %395 : vector<8x384xf32>
    %397 = vector.extract_strided_slice %391 {offsets = [0, 0], sizes = [8, 128], strides = [1, 1]} : vector<8x384xf32> to vector<8x128xf32>
    %398 = vector.extract_strided_slice %396 {offsets = [0, 0], sizes = [8, 128], strides = [1, 1]} : vector<8x384xf32> to vector<8x128xf32>
    %399 = arith.addf %397, %398 : vector<8x128xf32>
    %400 = arith.negf %399 : vector<8x128xf32>
    %401 = math.exp %400 : vector<8x128xf32>
    %cst_134 = arith.constant 1.000000e+00 : f32
    %402 = vector.broadcast %cst_134 : f32 to vector<8x128xf32>
    %403 = arith.addf %402, %401 : vector<8x128xf32>
    %404 = arith.divf %402, %403 : vector<8x128xf32>
    %405 = vector.extract_strided_slice %391 {offsets = [0, 128], sizes = [8, 128], strides = [1, 1]} : vector<8x384xf32> to vector<8x128xf32>
    %406 = vector.extract_strided_slice %396 {offsets = [0, 128], sizes = [8, 128], strides = [1, 1]} : vector<8x384xf32> to vector<8x128xf32>
    %407 = arith.addf %405, %406 : vector<8x128xf32>
    %408 = arith.negf %407 : vector<8x128xf32>
    %409 = math.exp %408 : vector<8x128xf32>
    %cst_135 = arith.constant 1.000000e+00 : f32
    %410 = vector.broadcast %cst_135 : f32 to vector<8x128xf32>
    %411 = arith.addf %410, %409 : vector<8x128xf32>
    %412 = arith.divf %410, %411 : vector<8x128xf32>
    %413 = vector.extract_strided_slice %391 {offsets = [0, 256], sizes = [8, 128], strides = [1, 1]} : vector<8x384xf32> to vector<8x128xf32>
    %414 = vector.extract_strided_slice %396 {offsets = [0, 256], sizes = [8, 128], strides = [1, 1]} : vector<8x384xf32> to vector<8x128xf32>
    %415 = arith.mulf %404, %414 : vector<8x128xf32>
    %416 = arith.addf %413, %415 : vector<8x128xf32>
    %417 = math.tanh %416 : vector<8x128xf32>
    %cst_136 = arith.constant 1.000000e+00 : f32
    %418 = vector.broadcast %cst_136 : f32 to vector<8x128xf32>
    %419 = arith.subf %418, %412 : vector<8x128xf32>
    %420 = arith.mulf %419, %417 : vector<8x128xf32>
    %421 = arith.mulf %412, %385 : vector<8x128xf32>
    %422 = arith.addf %420, %421 : vector<8x128xf32>
    %423 = arith.index_cast %389 : i32 to index
    %c0_137 = arith.constant 0 : index
    %424 = vector.load %arg24[%423, %c0_137] : memref<56x128xf32, #tpu.memory_space<vmem>>, vector<8x128xf32>
    tpu.vector_store %arg24[%423, %c0_137], %422 {strides = array<i32>} : memref<56x128xf32, #tpu.memory_space<vmem>>, vector<8x128xf32>,
    %c2_i32_138 = arith.constant 2 : i32
    %c8_i32_139 = arith.constant 8 : i32
    %425 = arith.muli %c2_i32_138, %c8_i32_139 : i32
    %426 = tpu.assume_multiple %425, 8 : i32
    %427 = arith.index_cast %426 : i32 to index
    %c0_140 = arith.constant 0 : index
    %428 = vector.load %arg23[%427, %c0_140] : memref<56x384xf32, #tpu.memory_space<vmem>>, vector<8x384xf32>
    %c0_141 = arith.constant 0 : index
    %c0_142 = arith.constant 0 : index
    %429 = vector.load %arg17[%c0_141, %c0_142] : memref<128x384xf32, #tpu.memory_space<vmem>>, vector<128x384xf32>
    %cst_143 = arith.constant dense<0.000000e+00> : vector<8x384xf32>
    %430 = tpu.matmul %422, %429, %cst_143 {dimension_numbers = #tpu.dot_dimension_numbers<[1], [0], [0], [1], [0, 0, 1, 1], [], []>} : vector<8x128xf32>, vector<128x384xf32>, vector<8x384xf32> -> vector<8x384xf32>
    %c0_144 = arith.constant 0 : index
    %c0_145 = arith.constant 0 : index
    %431 = vector.load %arg18[%c0_144, %c0_145] : memref<1x384xf32, #tpu.memory_space<vmem>>, vector<1x384xf32>
    %432 = vector.broadcast %431 : vector<1x384xf32> to vector<8x384xf32>
    %433 = arith.addf %430, %432 : vector<8x384xf32>
    %434 = vector.extract_strided_slice %428 {offsets = [0, 0], sizes = [8, 128], strides = [1, 1]} : vector<8x384xf32> to vector<8x128xf32>
    %435 = vector.extract_strided_slice %433 {offsets = [0, 0], sizes = [8, 128], strides = [1, 1]} : vector<8x384xf32> to vector<8x128xf32>
    %436 = arith.addf %434, %435 : vector<8x128xf32>
    %437 = arith.negf %436 : vector<8x128xf32>
    %438 = math.exp %437 : vector<8x128xf32>
    %cst_146 = arith.constant 1.000000e+00 : f32
    %439 = vector.broadcast %cst_146 : f32 to vector<8x128xf32>
    %440 = arith.addf %439, %438 : vector<8x128xf32>
    %441 = arith.divf %439, %440 : vector<8x128xf32>
    %442 = vector.extract_strided_slice %428 {offsets = [0, 128], sizes = [8, 128], strides = [1, 1]} : vector<8x384xf32> to vector<8x128xf32>
    %443 = vector.extract_strided_slice %433 {offsets = [0, 128], sizes = [8, 128], strides = [1, 1]} : vector<8x384xf32> to vector<8x128xf32>
    %444 = arith.addf %442, %443 : vector<8x128xf32>
    %445 = arith.negf %444 : vector<8x128xf32>
    %446 = math.exp %445 : vector<8x128xf32>
    %cst_147 = arith.constant 1.000000e+00 : f32
    %447 = vector.broadcast %cst_147 : f32 to vector<8x128xf32>
    %448 = arith.addf %447, %446 : vector<8x128xf32>
    %449 = arith.divf %447, %448 : vector<8x128xf32>
    %450 = vector.extract_strided_slice %428 {offsets = [0, 256], sizes = [8, 128], strides = [1, 1]} : vector<8x384xf32> to vector<8x128xf32>
    %451 = vector.extract_strided_slice %433 {offsets = [0, 256], sizes = [8, 128], strides = [1, 1]} : vector<8x384xf32> to vector<8x128xf32>
    %452 = arith.mulf %441, %451 : vector<8x128xf32>
    %453 = arith.addf %450, %452 : vector<8x128xf32>
    %454 = math.tanh %453 : vector<8x128xf32>
    %cst_148 = arith.constant 1.000000e+00 : f32
    %455 = vector.broadcast %cst_148 : f32 to vector<8x128xf32>
    %456 = arith.subf %455, %449 : vector<8x128xf32>
    %457 = arith.mulf %456, %454 : vector<8x128xf32>
    %458 = arith.mulf %449, %422 : vector<8x128xf32>
    %459 = arith.addf %457, %458 : vector<8x128xf32>
    %460 = arith.index_cast %426 : i32 to index
    %c0_149 = arith.constant 0 : index
    %461 = vector.load %arg24[%460, %c0_149] : memref<56x128xf32, #tpu.memory_space<vmem>>, vector<8x128xf32>
    tpu.vector_store %arg24[%460, %c0_149], %459 {strides = array<i32>} : memref<56x128xf32, #tpu.memory_space<vmem>>, vector<8x128xf32>,
    %c3_i32_150 = arith.constant 3 : i32
    %c8_i32_151 = arith.constant 8 : i32
    %462 = arith.muli %c3_i32_150, %c8_i32_151 : i32
    %463 = tpu.assume_multiple %462, 8 : i32
    %464 = arith.index_cast %463 : i32 to index
    %c0_152 = arith.constant 0 : index
    %465 = vector.load %arg23[%464, %c0_152] : memref<56x384xf32, #tpu.memory_space<vmem>>, vector<8x384xf32>
    %c0_153 = arith.constant 0 : index
    %c0_154 = arith.constant 0 : index
    %466 = vector.load %arg17[%c0_153, %c0_154] : memref<128x384xf32, #tpu.memory_space<vmem>>, vector<128x384xf32>
    %cst_155 = arith.constant dense<0.000000e+00> : vector<8x384xf32>
    %467 = tpu.matmul %459, %466, %cst_155 {dimension_numbers = #tpu.dot_dimension_numbers<[1], [0], [0], [1], [0, 0, 1, 1], [], []>} : vector<8x128xf32>, vector<128x384xf32>, vector<8x384xf32> -> vector<8x384xf32>
    %c0_156 = arith.constant 0 : index
    %c0_157 = arith.constant 0 : index
    %468 = vector.load %arg18[%c0_156, %c0_157] : memref<1x384xf32, #tpu.memory_space<vmem>>, vector<1x384xf32>
    %469 = vector.broadcast %468 : vector<1x384xf32> to vector<8x384xf32>
    %470 = arith.addf %467, %469 : vector<8x384xf32>
    %471 = vector.extract_strided_slice %465 {offsets = [0, 0], sizes = [8, 128], strides = [1, 1]} : vector<8x384xf32> to vector<8x128xf32>
    %472 = vector.extract_strided_slice %470 {offsets = [0, 0], sizes = [8, 128], strides = [1, 1]} : vector<8x384xf32> to vector<8x128xf32>
    %473 = arith.addf %471, %472 : vector<8x128xf32>
    %474 = arith.negf %473 : vector<8x128xf32>
    %475 = math.exp %474 : vector<8x128xf32>
    %cst_158 = arith.constant 1.000000e+00 : f32
    %476 = vector.broadcast %cst_158 : f32 to vector<8x128xf32>
    %477 = arith.addf %476, %475 : vector<8x128xf32>
    %478 = arith.divf %476, %477 : vector<8x128xf32>
    %479 = vector.extract_strided_slice %465 {offsets = [0, 128], sizes = [8, 128], strides = [1, 1]} : vector<8x384xf32> to vector<8x128xf32>
    %480 = vector.extract_strided_slice %470 {offsets = [0, 128], sizes = [8, 128], strides = [1, 1]} : vector<8x384xf32> to vector<8x128xf32>
    %481 = arith.addf %479, %480 : vector<8x128xf32>
    %482 = arith.negf %481 : vector<8x128xf32>
    %483 = math.exp %482 : vector<8x128xf32>
    %cst_159 = arith.constant 1.000000e+00 : f32
    %484 = vector.broadcast %cst_159 : f32 to vector<8x128xf32>
    %485 = arith.addf %484, %483 : vector<8x128xf32>
    %486 = arith.divf %484, %485 : vector<8x128xf32>
    %487 = vector.extract_strided_slice %465 {offsets = [0, 256], sizes = [8, 128], strides = [1, 1]} : vector<8x384xf32> to vector<8x128xf32>
    %488 = vector.extract_strided_slice %470 {offsets = [0, 256], sizes = [8, 128], strides = [1, 1]} : vector<8x384xf32> to vector<8x128xf32>
    %489 = arith.mulf %478, %488 : vector<8x128xf32>
    %490 = arith.addf %487, %489 : vector<8x128xf32>
    %491 = math.tanh %490 : vector<8x128xf32>
    %cst_160 = arith.constant 1.000000e+00 : f32
    %492 = vector.broadcast %cst_160 : f32 to vector<8x128xf32>
    %493 = arith.subf %492, %486 : vector<8x128xf32>
    %494 = arith.mulf %493, %491 : vector<8x128xf32>
    %495 = arith.mulf %486, %459 : vector<8x128xf32>
    %496 = arith.addf %494, %495 : vector<8x128xf32>
    %497 = arith.index_cast %463 : i32 to index
    %c0_161 = arith.constant 0 : index
    %498 = vector.load %arg24[%497, %c0_161] : memref<56x128xf32, #tpu.memory_space<vmem>>, vector<8x128xf32>
    tpu.vector_store %arg24[%497, %c0_161], %496 {strides = array<i32>} : memref<56x128xf32, #tpu.memory_space<vmem>>, vector<8x128xf32>,
    %c4_i32_162 = arith.constant 4 : i32
    %c8_i32_163 = arith.constant 8 : i32
    %499 = arith.muli %c4_i32_162, %c8_i32_163 : i32
    %500 = tpu.assume_multiple %499, 8 : i32
    %501 = arith.index_cast %500 : i32 to index
    %c0_164 = arith.constant 0 : index
    %502 = vector.load %arg23[%501, %c0_164] : memref<56x384xf32, #tpu.memory_space<vmem>>, vector<8x384xf32>
    %c0_165 = arith.constant 0 : index
    %c0_166 = arith.constant 0 : index
    %503 = vector.load %arg17[%c0_165, %c0_166] : memref<128x384xf32, #tpu.memory_space<vmem>>, vector<128x384xf32>
    %cst_167 = arith.constant dense<0.000000e+00> : vector<8x384xf32>
    %504 = tpu.matmul %496, %503, %cst_167 {dimension_numbers = #tpu.dot_dimension_numbers<[1], [0], [0], [1], [0, 0, 1, 1], [], []>} : vector<8x128xf32>, vector<128x384xf32>, vector<8x384xf32> -> vector<8x384xf32>
    %c0_168 = arith.constant 0 : index
    %c0_169 = arith.constant 0 : index
    %505 = vector.load %arg18[%c0_168, %c0_169] : memref<1x384xf32, #tpu.memory_space<vmem>>, vector<1x384xf32>
    %506 = vector.broadcast %505 : vector<1x384xf32> to vector<8x384xf32>
    %507 = arith.addf %504, %506 : vector<8x384xf32>
    %508 = vector.extract_strided_slice %502 {offsets = [0, 0], sizes = [8, 128], strides = [1, 1]} : vector<8x384xf32> to vector<8x128xf32>
    %509 = vector.extract_strided_slice %507 {offsets = [0, 0], sizes = [8, 128], strides = [1, 1]} : vector<8x384xf32> to vector<8x128xf32>
    %510 = arith.addf %508, %509 : vector<8x128xf32>
    %511 = arith.negf %510 : vector<8x128xf32>
    %512 = math.exp %511 : vector<8x128xf32>
    %cst_170 = arith.constant 1.000000e+00 : f32
    %513 = vector.broadcast %cst_170 : f32 to vector<8x128xf32>
    %514 = arith.addf %513, %512 : vector<8x128xf32>
    %515 = arith.divf %513, %514 : vector<8x128xf32>
    %516 = vector.extract_strided_slice %502 {offsets = [0, 128], sizes = [8, 128], strides = [1, 1]} : vector<8x384xf32> to vector<8x128xf32>
    %517 = vector.extract_strided_slice %507 {offsets = [0, 128], sizes = [8, 128], strides = [1, 1]} : vector<8x384xf32> to vector<8x128xf32>
    %518 = arith.addf %516, %517 : vector<8x128xf32>
    %519 = arith.negf %518 : vector<8x128xf32>
    %520 = math.exp %519 : vector<8x128xf32>
    %cst_171 = arith.constant 1.000000e+00 : f32
    %521 = vector.broadcast %cst_171 : f32 to vector<8x128xf32>
    %522 = arith.addf %521, %520 : vector<8x128xf32>
    %523 = arith.divf %521, %522 : vector<8x128xf32>
    %524 = vector.extract_strided_slice %502 {offsets = [0, 256], sizes = [8, 128], strides = [1, 1]} : vector<8x384xf32> to vector<8x128xf32>
    %525 = vector.extract_strided_slice %507 {offsets = [0, 256], sizes = [8, 128], strides = [1, 1]} : vector<8x384xf32> to vector<8x128xf32>
    %526 = arith.mulf %515, %525 : vector<8x128xf32>
    %527 = arith.addf %524, %526 : vector<8x128xf32>
    %528 = math.tanh %527 : vector<8x128xf32>
    %cst_172 = arith.constant 1.000000e+00 : f32
    %529 = vector.broadcast %cst_172 : f32 to vector<8x128xf32>
    %530 = arith.subf %529, %523 : vector<8x128xf32>
    %531 = arith.mulf %530, %528 : vector<8x128xf32>
    %532 = arith.mulf %523, %496 : vector<8x128xf32>
    %533 = arith.addf %531, %532 : vector<8x128xf32>
    %534 = arith.index_cast %500 : i32 to index
    %c0_173 = arith.constant 0 : index
    %535 = vector.load %arg24[%534, %c0_173] : memref<56x128xf32, #tpu.memory_space<vmem>>, vector<8x128xf32>
    tpu.vector_store %arg24[%534, %c0_173], %533 {strides = array<i32>} : memref<56x128xf32, #tpu.memory_space<vmem>>, vector<8x128xf32>,
    %c5_i32_174 = arith.constant 5 : i32
    %c8_i32_175 = arith.constant 8 : i32
    %536 = arith.muli %c5_i32_174, %c8_i32_175 : i32
    %537 = tpu.assume_multiple %536, 8 : i32
    %538 = arith.index_cast %537 : i32 to index
    %c0_176 = arith.constant 0 : index
    %539 = vector.load %arg23[%538, %c0_176] : memref<56x384xf32, #tpu.memory_space<vmem>>, vector<8x384xf32>
    %c0_177 = arith.constant 0 : index
    %c0_178 = arith.constant 0 : index
    %540 = vector.load %arg17[%c0_177, %c0_178] : memref<128x384xf32, #tpu.memory_space<vmem>>, vector<128x384xf32>
    %cst_179 = arith.constant dense<0.000000e+00> : vector<8x384xf32>
    %541 = tpu.matmul %533, %540, %cst_179 {dimension_numbers = #tpu.dot_dimension_numbers<[1], [0], [0], [1], [0, 0, 1, 1], [], []>} : vector<8x128xf32>, vector<128x384xf32>, vector<8x384xf32> -> vector<8x384xf32>
    %c0_180 = arith.constant 0 : index
    %c0_181 = arith.constant 0 : index
    %542 = vector.load %arg18[%c0_180, %c0_181] : memref<1x384xf32, #tpu.memory_space<vmem>>, vector<1x384xf32>
    %543 = vector.broadcast %542 : vector<1x384xf32> to vector<8x384xf32>
    %544 = arith.addf %541, %543 : vector<8x384xf32>
    %545 = vector.extract_strided_slice %539 {offsets = [0, 0], sizes = [8, 128], strides = [1, 1]} : vector<8x384xf32> to vector<8x128xf32>
    %546 = vector.extract_strided_slice %544 {offsets = [0, 0], sizes = [8, 128], strides = [1, 1]} : vector<8x384xf32> to vector<8x128xf32>
    %547 = arith.addf %545, %546 : vector<8x128xf32>
    %548 = arith.negf %547 : vector<8x128xf32>
    %549 = math.exp %548 : vector<8x128xf32>
    %cst_182 = arith.constant 1.000000e+00 : f32
    %550 = vector.broadcast %cst_182 : f32 to vector<8x128xf32>
    %551 = arith.addf %550, %549 : vector<8x128xf32>
    %552 = arith.divf %550, %551 : vector<8x128xf32>
    %553 = vector.extract_strided_slice %539 {offsets = [0, 128], sizes = [8, 128], strides = [1, 1]} : vector<8x384xf32> to vector<8x128xf32>
    %554 = vector.extract_strided_slice %544 {offsets = [0, 128], sizes = [8, 128], strides = [1, 1]} : vector<8x384xf32> to vector<8x128xf32>
    %555 = arith.addf %553, %554 : vector<8x128xf32>
    %556 = arith.negf %555 : vector<8x128xf32>
    %557 = math.exp %556 : vector<8x128xf32>
    %cst_183 = arith.constant 1.000000e+00 : f32
    %558 = vector.broadcast %cst_183 : f32 to vector<8x128xf32>
    %559 = arith.addf %558, %557 : vector<8x128xf32>
    %560 = arith.divf %558, %559 : vector<8x128xf32>
    %561 = vector.extract_strided_slice %539 {offsets = [0, 256], sizes = [8, 128], strides = [1, 1]} : vector<8x384xf32> to vector<8x128xf32>
    %562 = vector.extract_strided_slice %544 {offsets = [0, 256], sizes = [8, 128], strides = [1, 1]} : vector<8x384xf32> to vector<8x128xf32>
    %563 = arith.mulf %552, %562 : vector<8x128xf32>
    %564 = arith.addf %561, %563 : vector<8x128xf32>
    %565 = math.tanh %564 : vector<8x128xf32>
    %cst_184 = arith.constant 1.000000e+00 : f32
    %566 = vector.broadcast %cst_184 : f32 to vector<8x128xf32>
    %567 = arith.subf %566, %560 : vector<8x128xf32>
    %568 = arith.mulf %567, %565 : vector<8x128xf32>
    %569 = arith.mulf %560, %533 : vector<8x128xf32>
    %570 = arith.addf %568, %569 : vector<8x128xf32>
    %571 = arith.index_cast %537 : i32 to index
    %c0_185 = arith.constant 0 : index
    %572 = vector.load %arg24[%571, %c0_185] : memref<56x128xf32, #tpu.memory_space<vmem>>, vector<8x128xf32>
    tpu.vector_store %arg24[%571, %c0_185], %570 {strides = array<i32>} : memref<56x128xf32, #tpu.memory_space<vmem>>, vector<8x128xf32>,
    %c6_i32_186 = arith.constant 6 : i32
    %c8_i32_187 = arith.constant 8 : i32
    %573 = arith.muli %c6_i32_186, %c8_i32_187 : i32
    %574 = tpu.assume_multiple %573, 8 : i32
    %575 = arith.index_cast %574 : i32 to index
    %c0_188 = arith.constant 0 : index
    %576 = vector.load %arg23[%575, %c0_188] : memref<56x384xf32, #tpu.memory_space<vmem>>, vector<8x384xf32>
    %c0_189 = arith.constant 0 : index
    %c0_190 = arith.constant 0 : index
    %577 = vector.load %arg17[%c0_189, %c0_190] : memref<128x384xf32, #tpu.memory_space<vmem>>, vector<128x384xf32>
    %cst_191 = arith.constant dense<0.000000e+00> : vector<8x384xf32>
    %578 = tpu.matmul %570, %577, %cst_191 {dimension_numbers = #tpu.dot_dimension_numbers<[1], [0], [0], [1], [0, 0, 1, 1], [], []>} : vector<8x128xf32>, vector<128x384xf32>, vector<8x384xf32> -> vector<8x384xf32>
    %c0_192 = arith.constant 0 : index
    %c0_193 = arith.constant 0 : index
    %579 = vector.load %arg18[%c0_192, %c0_193] : memref<1x384xf32, #tpu.memory_space<vmem>>, vector<1x384xf32>
    %580 = vector.broadcast %579 : vector<1x384xf32> to vector<8x384xf32>
    %581 = arith.addf %578, %580 : vector<8x384xf32>
    %582 = vector.extract_strided_slice %576 {offsets = [0, 0], sizes = [8, 128], strides = [1, 1]} : vector<8x384xf32> to vector<8x128xf32>
    %583 = vector.extract_strided_slice %581 {offsets = [0, 0], sizes = [8, 128], strides = [1, 1]} : vector<8x384xf32> to vector<8x128xf32>
    %584 = arith.addf %582, %583 : vector<8x128xf32>
    %585 = arith.negf %584 : vector<8x128xf32>
    %586 = math.exp %585 : vector<8x128xf32>
    %cst_194 = arith.constant 1.000000e+00 : f32
    %587 = vector.broadcast %cst_194 : f32 to vector<8x128xf32>
    %588 = arith.addf %587, %586 : vector<8x128xf32>
    %589 = arith.divf %587, %588 : vector<8x128xf32>
    %590 = vector.extract_strided_slice %576 {offsets = [0, 128], sizes = [8, 128], strides = [1, 1]} : vector<8x384xf32> to vector<8x128xf32>
    %591 = vector.extract_strided_slice %581 {offsets = [0, 128], sizes = [8, 128], strides = [1, 1]} : vector<8x384xf32> to vector<8x128xf32>
    %592 = arith.addf %590, %591 : vector<8x128xf32>
    %593 = arith.negf %592 : vector<8x128xf32>
    %594 = math.exp %593 : vector<8x128xf32>
    %cst_195 = arith.constant 1.000000e+00 : f32
    %595 = vector.broadcast %cst_195 : f32 to vector<8x128xf32>
    %596 = arith.addf %595, %594 : vector<8x128xf32>
    %597 = arith.divf %595, %596 : vector<8x128xf32>
    %598 = vector.extract_strided_slice %576 {offsets = [0, 256], sizes = [8, 128], strides = [1, 1]} : vector<8x384xf32> to vector<8x128xf32>
    %599 = vector.extract_strided_slice %581 {offsets = [0, 256], sizes = [8, 128], strides = [1, 1]} : vector<8x384xf32> to vector<8x128xf32>
    %600 = arith.mulf %589, %599 : vector<8x128xf32>
    %601 = arith.addf %598, %600 : vector<8x128xf32>
    %602 = math.tanh %601 : vector<8x128xf32>
    %cst_196 = arith.constant 1.000000e+00 : f32
    %603 = vector.broadcast %cst_196 : f32 to vector<8x128xf32>
    %604 = arith.subf %603, %597 : vector<8x128xf32>
    %605 = arith.mulf %604, %602 : vector<8x128xf32>
    %606 = arith.mulf %597, %570 : vector<8x128xf32>
    %607 = arith.addf %605, %606 : vector<8x128xf32>
    %608 = arith.index_cast %574 : i32 to index
    %c0_197 = arith.constant 0 : index
    %609 = vector.load %arg24[%608, %c0_197] : memref<56x128xf32, #tpu.memory_space<vmem>>, vector<8x128xf32>
    tpu.vector_store %arg24[%608, %c0_197], %607 {strides = array<i32>} : memref<56x128xf32, #tpu.memory_space<vmem>>, vector<8x128xf32>,
    %c7_i32_198 = arith.constant 7 : i32
    %c0_199 = arith.constant 0 : index
    %c0_200 = arith.constant 0 : index
    %610 = vector.load %arg24[%c0_199, %c0_200] : memref<56x128xf32, #tpu.memory_space<vmem>>, vector<56x128xf32>
    %611 = arith.truncf %610 : vector<56x128xf32> to vector<56x128xbf16>
    %c0_201 = arith.constant 0 : index
    %c0_202 = arith.constant 0 : index
    %612 = vector.load %arg19[%c0_201, %c0_202] : memref<128x128xbf16, #tpu.memory_space<vmem>>, vector<128x128xbf16>
    %cst_203 = arith.constant dense<0.000000e+00> : vector<56x128xf32>
    %613 = tpu.matmul %611, %612, %cst_203 {dimension_numbers = #tpu.dot_dimension_numbers<[1], [0], [0], [1], [0, 0, 1, 1], [], []>} : vector<56x128xbf16>, vector<128x128xbf16>, vector<56x128xf32> -> vector<56x128xf32>
    %c0_204 = arith.constant 0 : index
    %c0_205 = arith.constant 0 : index
    %614 = vector.load %arg20[%c0_204, %c0_205] : memref<1x128xf32, #tpu.memory_space<vmem>>, vector<1x128xf32>
    %615 = vector.broadcast %614 : vector<1x128xf32> to vector<56x128xf32>
    %616 = arith.addf %613, %615 : vector<56x128xf32>
    %c0_206 = arith.constant 0 : index
    %c0_207 = arith.constant 0 : index
    %617 = vector.load %arg4[%c0_206, %c0_207] : memref<56x1xi32, #tpu.memory_space<vmem>>, vector<56x1xi32>
    %cst_208 = arith.constant dense<0xFF800000> : vector<56xf32>
    %618 = vector.multi_reduction <maximumf>, %616, %cst_208 [1] : vector<56x128xf32> to vector<56xf32>
    %619 = vector.shape_cast %618 : vector<56xf32> to vector<56x1xf32>
    %620 = vector.broadcast %619 : vector<56x1xf32> to vector<56x128xf32>
    %621 = arith.subf %616, %620 : vector<56x128xf32>
    %622 = math.exp %621 : vector<56x128xf32>
    %cst_209 = arith.constant dense<0.000000e+00> : vector<56xf32>
    %623 = vector.multi_reduction <add>, %622, %cst_209 [1] : vector<56x128xf32> to vector<56xf32>
    %624 = vector.shape_cast %623 : vector<56xf32> to vector<56x1xf32>
    %625 = math.log %624 : vector<56x1xf32>
    %626 = arith.addf %619, %625 : vector<56x1xf32>
    %627 = tpu.iota {dimensions = array<i32: 1>} : vector<56x128xi32>
    %628 = vector.broadcast %617 : vector<56x1xi32> to vector<56x128xi32>
    %629 = arith.cmpi eq, %627, %628 : vector<56x128xi32>
    %cst_210 = arith.constant 0.000000e+00 : f32
    %630 = vector.broadcast %cst_210 : f32 to vector<56x128xf32>
    %631 = arith.select %629, %616, %630 : vector<56x128xi1>, vector<56x128xf32>
    %cst_211 = arith.constant dense<0.000000e+00> : vector<56xf32>
    %632 = vector.multi_reduction <add>, %631, %cst_211 [1] : vector<56x128xf32> to vector<56xf32>
    %633 = vector.shape_cast %632 : vector<56xf32> to vector<56x1xf32>
    %c0_i32_212 = arith.constant 0 : i32
    %634 = vector.broadcast %c0_i32_212 : i32 to vector<56x1xi32>
    %635 = arith.cmpi ne, %617, %634 : vector<56x1xi32>
    %636 = arith.extui %635 : vector<56x1xi1> to vector<56x1xi32>
    %637 = arith.sitofp %636 : vector<56x1xi32> to vector<56x1xf32>
    %638 = arith.subf %626, %633 : vector<56x1xf32>
    %639 = arith.mulf %638, %637 : vector<56x1xf32>
    %640 = vector.shape_cast %639 : vector<56x1xf32> to vector<1x56x1xf32>
    %cst_213 = arith.constant dense<0.000000e+00> : vector<1xf32>
    %641 = vector.multi_reduction <add>, %640, %cst_213 [1, 2] : vector<1x56x1xf32> to vector<1xf32>
    %642 = vector.shape_cast %641 : vector<1xf32> to vector<1x1x1xf32>
    %643 = vector.extract %642[0, 0, 0] : f32 from vector<1x1x1xf32>
    %644 = vector.shape_cast %637 : vector<56x1xf32> to vector<1x56x1xf32>
    %cst_214 = arith.constant dense<0.000000e+00> : vector<1xf32>
    %645 = vector.multi_reduction <add>, %644, %cst_214 [1, 2] : vector<1x56x1xf32> to vector<1xf32>
    %646 = vector.shape_cast %645 : vector<1xf32> to vector<1x1x1xf32>
    %647 = vector.extract %646[0, 0, 0] : f32 from vector<1x1x1xf32>
    %cst_215 = arith.constant 1.000000e+00 : f32
    %648 = arith.maximumf %647, %cst_215 : f32
    %649 = arith.divf %643, %648 : f32
    %650 = vector.broadcast %649 : f32 to vector<1x1xf32>
    %c0_216 = arith.constant 0 : index
    %c0_217 = arith.constant 0 : index
    %651 = vector.load %arg21[%c0_216, %c0_217] : memref<1x1xf32, #tpu.memory_space<vmem>>, vector<1x1xf32>
    tpu.vector_store %arg21[%c0_216, %c0_217], %650 {strides = array<i32>} : memref<1x1xf32, #tpu.memory_space<vmem>>, vector<1x1xf32>,
    return
  }
  func.func @transform_0(%arg0: i32) -> (i32, i32) {
    %c0_i32 = arith.constant 0 : i32
    %c0_i32_0 = arith.constant 0 : i32
    %c0_i32_1 = arith.constant 0 : i32
    return %c0_i32, %c0_i32_0 : i32, i32
  }
  func.func @transform_1(%arg0: i32) -> (i32, i32) {
    %c0_i32 = arith.constant 0 : i32
    %c0_i32_0 = arith.constant 0 : i32
    %c0_i32_1 = arith.constant 0 : i32
    return %c0_i32, %c0_i32_0 : i32, i32
  }
  func.func @transform_2(%arg0: i32) -> (i32, i32) {
    %c0_i32 = arith.constant 0 : i32
    %c0_i32_0 = arith.constant 0 : i32
    %c0_i32_1 = arith.constant 0 : i32
    return %c0_i32, %c0_i32_0 : i32, i32
  }
  func.func @transform_3(%arg0: i32) -> (i32, i32) {
    %c0_i32 = arith.constant 0 : i32
    %c0_i32_0 = arith.constant 0 : i32
    %c0_i32_1 = arith.constant 0 : i32
    return %c0_i32, %c0_i32_0 : i32, i32
  }
  func.func @transform_4(%arg0: i32) -> (i32, i32) {
    %c0_i32 = arith.constant 0 : i32
    %c0_i32_0 = arith.constant 0 : i32
    %c0_i32_1 = arith.constant 0 : i32
    return %c0_i32, %c0_i32_0 : i32, i32
  }
  func.func @transform_5(%arg0: i32) -> (i32, i32) {
    %c0_i32 = arith.constant 0 : i32
    %c0_i32_0 = arith.constant 0 : i32
    %c0_i32_1 = arith.constant 0 : i32
    return %c0_i32, %c0_i32_0 : i32, i32
  }
  func.func @transform_6(%arg0: i32) -> (i32, i32) {
    %c0_i32 = arith.constant 0 : i32
    %c0_i32_0 = arith.constant 0 : i32
    %c0_i32_1 = arith.constant 0 : i32
    return %c0_i32, %c0_i32_0 : i32, i32
  }
  func.func @transform_7(%arg0: i32) -> (i32, i32) {
    %c0_i32 = arith.constant 0 : i32
    %c0_i32_0 = arith.constant 0 : i32
    %c0_i32_1 = arith.constant 0 : i32
    return %c0_i32, %c0_i32_0 : i32, i32
  }
  func.func @transform_8(%arg0: i32) -> (i32, i32) {
    %c0_i32 = arith.constant 0 : i32
    %c0_i32_0 = arith.constant 0 : i32
    %c0_i32_1 = arith.constant 0 : i32
    return %c0_i32, %c0_i32_0 : i32, i32
  }
  func.func @transform_9(%arg0: i32) -> (i32, i32) {
    %c0_i32 = arith.constant 0 : i32
    %c0_i32_0 = arith.constant 0 : i32
    %c0_i32_1 = arith.constant 0 : i32
    return %c0_i32, %c0_i32_0 : i32, i32
  }
  func.func @transform_10(%arg0: i32) -> (i32, i32) {
    %c0_i32 = arith.constant 0 : i32
    %c0_i32_0 = arith.constant 0 : i32
    %c0_i32_1 = arith.constant 0 : i32
    return %c0_i32, %c0_i32_0 : i32, i32
  }
  func.func @transform_11(%arg0: i32) -> (i32, i32) {
    %c0_i32 = arith.constant 0 : i32
    %c0_i32_0 = arith.constant 0 : i32
    %c0_i32_1 = arith.constant 0 : i32
    return %c0_i32, %c0_i32_0 : i32, i32
  }
  func.func @transform_12(%arg0: i32) -> (i32, i32) {
    %c0_i32 = arith.constant 0 : i32
    %c0_i32_0 = arith.constant 0 : i32
    %c0_i32_1 = arith.constant 0 : i32
    return %c0_i32, %c0_i32_0 : i32, i32
  }
  func.func @transform_13(%arg0: i32) -> (i32, i32) {
    %c0_i32 = arith.constant 0 : i32
    %c0_i32_0 = arith.constant 0 : i32
    %c0_i32_1 = arith.constant 0 : i32
    return %c0_i32, %c0_i32_0 : i32, i32
  }
  func.func @transform_14(%arg0: i32) -> (i32, i32) {
    %c0_i32 = arith.constant 0 : i32
    %c0_i32_0 = arith.constant 0 : i32
    %c0_i32_1 = arith.constant 0 : i32
    return %c0_i32, %c0_i32_0 : i32, i32
  }
  func.func @transform_15(%arg0: i32) -> (i32, i32) {
    %c0_i32 = arith.constant 0 : i32
    %c0_i32_0 = arith.constant 0 : i32
    %c0_i32_1 = arith.constant 0 : i32
    return %c0_i32, %c0_i32_0 : i32, i32
  }
  func.func @transform_16(%arg0: i32) -> (i32, i32) {
    %c0_i32 = arith.constant 0 : i32
    %c0_i32_0 = arith.constant 0 : i32
    %c0_i32_1 = arith.constant 0 : i32
    return %c0_i32, %c0_i32_0 : i32, i32
  }
  func.func @transform_17(%arg0: i32) -> (i32, i32) {
    %c0_i32 = arith.constant 0 : i32
    %c0_i32_0 = arith.constant 0 : i32
    %c0_i32_1 = arith.constant 0 : i32
    return %c0_i32, %c0_i32_0 : i32, i32
  }
  func.func @transform_18(%arg0: i32) -> (i32, i32) {
    %c0_i32 = arith.constant 0 : i32
    %c0_i32_0 = arith.constant 0 : i32
    %c0_i32_1 = arith.constant 0 : i32
    return %c0_i32, %c0_i32_0 : i32, i32
  }
  func.func @transform_19(%arg0: i32) -> (i32, i32) {
    %c0_i32 = arith.constant 0 : i32
    %c0_i32_0 = arith.constant 0 : i32
    %c0_i32_1 = arith.constant 0 : i32
    return %c0_i32, %c0_i32_0 : i32, i32
  }
  func.func @transform_20(%arg0: i32) -> (i32, i32) {
    %c0_i32 = arith.constant 0 : i32
    %c0_i32_0 = arith.constant 0 : i32
    %c0_i32_1 = arith.constant 0 : i32
    return %c0_i32, %c0_i32_0 : i32, i32
  }
}

</mosaic_0001>

<bundles_post_ra>
// kernel: qgen_forward.1
= control target key start
LH: loop header
LB: loop body
LE: loop exit
PB: predicated region body
PF: predicated region fallthrough
CT: control target
= control target key end

     0   :  { %s6901_s0 = inlined_call_operand.vmem [shape: s32[8,1], index: 0, kind: input, shape index: {}]   ;;  %s6902_s1 = inlined_call_operand.vmem [shape: bf16[64,128], index: 1, kind: input, shape index: {}]   ;;  %s6903_s2 = inlined_call_operand.vmem [shape: bf16[56,128], index: 2, kind: input, shape index: {}]   ;;  %s6904_s3 = inlined_call_operand.vmem [shape: s32[56,1], index: 3, kind: input, shape index: {}]   ;;  %s6905_s4 = inlined_call_operand.vmem [shape: f32[8,128], index: 4, kind: input, shape index: {}]   ;;  %s6906_s5 = inlined_call_operand.vmem [shape: bf16[128,384], index: 5, kind: input, shape index: {}]   ;;  %s6907_s6 = inlined_call_operand.vmem [shape: f32[1,384], index: 6, kind: input, shape index: {}]   ;;  %s6908_s7 = inlined_call_operand.vmem [shape: f32[128,384], index: 7, kind: input, shape index: {}]   ;;  %s6909_s8 = inlined_call_operand.vmem [shape: f32[1,384], index: 8, kind: input, shape index: {}]   ;;  %s6910_s9 = inlined_call_operand.vmem [shape: f32[128,128], index: 9, kind: input, shape index: {}]   ;;  %s6911_s10 = inlined_call_operand.vmem [shape: f32[1,128], index: 10, kind: input, shape index: {}]   ;;  %s6912_s11 = inlined_call_operand.vmem [shape: f32[128,128], index: 11, kind: input, shape index: {}]   ;;  %s6913_s12 = inlined_call_operand.vmem [shape: f32[128,128], index: 12, kind: input, shape index: {}]   ;;  %s6914_s13 = inlined_call_operand.vmem [shape: f32[1,128], index: 13, kind: input, shape index: {}]   ;;  %s6915_s14 = inlined_call_operand.vmem [shape: bf16[128,384], index: 14, kind: input, shape index: {}]   ;;  %s6916_s15 = inlined_call_operand.vmem [shape: f32[1,384], index: 15, kind: input, shape index: {}]   ;;  %s6917_s16 = inlined_call_operand.vmem [shape: f32[128,384], index: 16, kind: input, shape index: {}]   ;;  %s6918_s17 = inlined_call_operand.vmem [shape: f32[1,384], index: 17, kind: input, shape index: {}]   ;;  %s6919_s18 = inlined_call_operand.vmem [shape: bf16[128,128], index: 18, kind: input, shape index: {}]   ;;  %s6920_s19 = inlined_call_operand.vmem [shape: f32[1,128], index: 19, kind: input, shape index: {}]   ;;  %s6921_s20 = inlined_call_operand.hbm [shape: f32[1,1], index: 20, kind: output, shape index: {}]  }
   0x1   :  { %6979 = sst [smem:[#allocation62_spill]] %s6901_s0 }
   0x2   :  { %6980 = sst [smem:[#allocation63_spill]] %s6902_s1 }
   0x3   :  { %6981 = sst [smem:[#allocation64_spill]] %s6903_s2 }
   0x4   :  { %6982 = sst [smem:[#allocation65_spill]] %s6904_s3 }
   0x5   :  { %6983 = sst [smem:[#allocation66_spill]] %s6905_s4 }
   0x6   :  { %v3471_v0 = vld [vmem:[%s6906_s5 + $0xa8] sm:$0xf]  ;;  %v3687_v1 = vld [vmem:[%s6906_s5 + $0xb0] sm:$0xf0]  ;;  %v3459_v2 = vld [vmem:[%s6906_s5 + $0x90] sm:$0xf] }
   0x7   :  { %v3472_v3 = vor.u32 %v3687_v1, %v3471_v0  ;;  %v3684_v4 = vld [vmem:[%s6906_s5 + $0x98] sm:$0xf0]  ;;  %v3447_v6 = vld [vmem:[%s6906_s5 + $0x78] sm:$0xf]  ;;  %v3681_v7 = vld [vmem:[%s6906_s5 + $0x80] sm:$0xf0] }
   0x8   :  { %v3460_v5 = vor.u32 %v3684_v4, %v3459_v2  ;;  %v3579_v8 = vld [vmem:[%s6915_s14 + $0xa8] sm:$0xf]  ;;  %v3714_v9 = vld [vmem:[%s6915_s14 + $0xb0] sm:$0xf0]  ;;  %v3448_v11 = vor.u32 %v3681_v7, %v3447_v6  ;;  %v3567_v12 = vld [vmem:[%s6915_s14 + $0x90] sm:$0xf] }
   0x9   :  { %3724 = vmatpush.bf16.msra.mxu2 %v3472_v3  ;;  %266 = vmatpush.bf16.msra.mxu1 %v3472_v3  ;;  %v3580_v10 = vor.u32 %v3714_v9, %v3579_v8  ;;  %v3711_v13 = vld [vmem:[%s6915_s14 + $0x98] sm:$0xf0]  ;;  %v3435_v14 = vld [vmem:[%s6906_s5 + $0x60] sm:$0xf]  ;;  %v3678_v15 = vld [vmem:[%s6906_s5 + $0x68] sm:$0xf0] }
   0xa   :  { %v3568_v16 = vor.u32 %v3711_v13, %v3567_v12  ;;  %v3555_v17 = vld [vmem:[%s6915_s14 + $0x78] sm:$0xf]  ;;  %v3708_v18 = vld [vmem:[%s6915_s14 + $0x80] sm:$0xf0]  ;;  %v3436_v19 = vor.u32 %v3678_v15, %v3435_v14  ;;  %v3423_v20 = vld [vmem:[%s6906_s5 + $0x48] sm:$0xf] }
   0xb   :  { %574 = vmatpush.bf16.msra.mxu3 %v3580_v10  ;;  %v3675_v21 = vld [vmem:[%s6906_s5 + $0x50] sm:$0xf0]  ;;  %v3556_v22 = vor.u32 %v3708_v18, %v3555_v17  ;;  %v3543_v23 = vld [vmem:[%s6915_s14 + $0x60] sm:$0xf]  ;;  %v3705_v24 = vld [vmem:[%s6915_s14 + $0x68] sm:$0xf0] }
   0xd   :  { %3725 = vmatpush.bf16.msra.mxu2 %v3460_v5  ;;  %267 = vmatpush.bf16.msra.mxu1 %v3460_v5 }
   0xf   :  { %575 = vmatpush.bf16.msra.mxu3 %v3568_v16 }
  0x11   :  { %3726 = vmatpush.bf16.msra.mxu2 %v3448_v11  ;;  %268 = vmatpush.bf16.msra.mxu1 %v3448_v11 }
  0x12   :  { %25 = vsyncpa [#allocation6], 0  ;;  %v3424_v25 = vor.u32 %v3675_v21, %v3423_v20  ;;  %v3411_v26 = vld [vmem:[%s6906_s5 + $0x30] sm:$0xf]  ;;  %v3672_v27 = vld [vmem:[%s6906_s5 + $0x38] sm:$0xf0]  ;;  %v3544_v28 = vor.u32 %v3705_v24, %v3543_v23 }
  0x13   :  { %576 = vmatpush.bf16.msra.mxu3 %v3556_v22  ;;  %v3531_v29 = vld [vmem:[%s6915_s14 + $0x48] sm:$0xf]  ;;  %v3702_v30 = vld [vmem:[%s6915_s14 + $0x50] sm:$0xf0]  ;;  %v3412_v31 = vor.u32 %v3672_v27, %v3411_v26  ;;  %v3399_v32 = vld [vmem:[%s6906_s5 + $0x18] sm:$0xf] }
  0x14   :  { %v3669_v33 = vld [vmem:[%s6906_s5 + $0x20] sm:$0xf0]  ;;  %v3532_v34 = vor.u32 %v3702_v30, %v3531_v29  ;;  %v3519_v35 = vld [vmem:[%s6915_s14 + $0x30] sm:$0xf]  ;;  %v3699_v36 = vld [vmem:[%s6915_s14 + $0x38] sm:$0xf0] }
  0x15   :  { %3727 = vmatpush.bf16.msra.mxu2 %v3436_v19  ;;  %269 = vmatpush.bf16.msra.mxu1 %v3436_v19  ;;  %v3400_v37 = vor.u32 %v3669_v33, %v3399_v32  ;;  %v3387_v38 = vld [vmem:[%s6906_s5] sm:$0xf]  ;;  %v3666_v39 = vld [vmem:[%s6906_s5 + $0x8] sm:$0xf0]  ;;  %v3479_v40 = vld [vmem:[%s6906_s5 + $0xb0] sm:$0xf]  ;;  %v3520_v41 = vor.u32 %v3699_v36, %v3519_v35 }
  0x16   :  { %v3688_v42 = vld [vmem:[%s6906_s5 + $0xb8] sm:$0xf0]  ;;  %v3507_v43 = vld [vmem:[%s6915_s14 + $0x18] sm:$0xf]  ;;  %v3696_v44 = vld [vmem:[%s6915_s14 + $0x20] sm:$0xf0]  ;;  %v3388_v45 = vor.u32 %v3666_v39, %v3387_v38 }
  0x17   :  { %577 = vmatpush.bf16.msra.mxu3 %v3544_v28  ;;  %v3480_v46 = vor.u32 %v3688_v42, %v3479_v40  ;;  %v3467_v47 = vld [vmem:[%s6906_s5 + $0x98] sm:$0xf]  ;;  %v3508_v48 = vor.u32 %v3696_v44, %v3507_v43  ;;  %v3685_v49 = vld [vmem:[%s6906_s5 + $0xa0] sm:$0xf0]  ;;  %v3495_v50 = vld [vmem:[%s6915_s14] sm:$0xf] }
  0x18   :  { %v3693_v51 = vld [vmem:[%s6915_s14 + $0x8] sm:$0xf0]  ;;  %s6984_s21 = sld [smem:[#allocation63_spill]]  ;;  %v3468_v53 = vor.u32 %v3685_v49, %v3467_v47  ;;  %v3455_v56 = vld [vmem:[%s6906_s5 + $0x80] sm:$0xf]  ;;  %v4252_v59 = vld [vmem:[%s6908_s7 + $0x170] sm:$0xff] }
  0x19   :  { %3728 = vmatpush.bf16.msra.mxu2 %v3424_v25  ;;  %270 = vmatpush.bf16.msra.mxu1 %v3424_v25  ;;  %v3496_v54 = vor.u32 %v3693_v51, %v3495_v50  ;;  %v3682_v57 = vld [vmem:[%s6906_s5 + $0x88] sm:$0xf0]  ;;  %s6985_s27 = sld [smem:[#allocation64_spill]]  ;;  %v3443_v61 = vld [vmem:[%s6906_s5 + $0x68] sm:$0xf]  ;;  %v4264_v63 = vld [vmem:[%s6908_s7 + $0x158] sm:$0xff] }
  0x1a   :  { %v3456_v60 = vor.u32 %v3682_v57, %v3455_v56  ;;  %v3679_v62 = vld [vmem:[%s6906_s5 + $0x70] sm:$0xf0]  ;;  %v3431_v1 = vld [vmem:[%s6906_s5 + $0x50] sm:$0xf]  ;;  %v3676_v2 = vld [vmem:[%s6906_s5 + $0x58] sm:$0xf0] }
  0x1b   :  { %578 = vmatpush.bf16.msra.mxu3 %v3532_v34  ;;  %v3444_v0 = vor.u32 %v3679_v62, %v3443_v61  ;;  %v3432_v3 = vor.u32 %v3676_v2, %v3431_v1  ;;  %v3419_v4 = vld [vmem:[%s6906_s5 + $0x38] sm:$0xf]  ;;  %v3673_v5 = vld [vmem:[%s6906_s5 + $0x40] sm:$0xf0]  ;;  %v3407_v9 = vld [vmem:[%s6906_s5 + $0x20] sm:$0xf] }
  0x1c   :  { %v3420_v7 = vor.u32 %v3673_v5, %v3419_v4  ;;  %v3670_v10 = vld [vmem:[%s6906_s5 + $0x28] sm:$0xf0]  ;;  %v4300_v11 = vld [vmem:[%s6908_s7 + $0x140] sm:$0xff]  ;;  %v3395_v15 = vld [vmem:[%s6906_s5 + $0x8] sm:$0xf]  ;;  %s6991_s26 = sld [smem:[#allocation62_spill]] }
  0x1d   :  { %3729 = vmatpush.bf16.msra.mxu2 %v3412_v31  ;;  %271 = vmatpush.bf16.msra.mxu1 %v3412_v31  ;;  %v4312_v13 = vld [vmem:[%s6908_s7 + $0x128] sm:$0xff]  ;;  %v3408_v14 = vor.u32 %v3670_v10, %v3407_v9  ;;  %v3667_v16 = vld [vmem:[%s6906_s5 + $0x10] sm:$0xf0]  ;;  %v4330_v18 = vld [vmem:[%s6908_s7 + $0xf8] sm:$0xff]  ;;  %s6995_s30 = sld [smem:[#allocation65_spill]]  ;;  %s4012_s2 = smov [#allocation5]  }
  0x1e   :  { %v4229_v52 = vld [vmem:[%s6984_s21 + $0x10] sm:$0xff]  ;;  %v4234_v55 = vld [vmem:[%s6984_s21] sm:$0xff]  ;;  %v4283_v6 = vld [vmem:[%s6984_s21 + $0x18] sm:$0xff]  ;;  %v3396_v19 = vor.u32 %v3667_v16, %v3395_v15  ;;  %s3345_s25 = sshll.u32 %s4012_s2, 4  ;;  %s3346_s25 = int_to_ptr.vmem [resolvable:$true] %s3345_s25 }
  0x1f   :  { %579 = vmatpush.bf16.msra.mxu3 %v3520_v41  ;;  %v4247_v58 = vld [vmem:[%s6985_s27] sm:$0xff]  ;;  %v4288_v8 = vld [vmem:[%s6984_s21 + $0x8] sm:$0xff]  ;;  %v4324_v17 = vld [vmem:[%s6908_s7 + $0x110] sm:$0xff]  ;;  %s7116_s21 = sld [smem:[#allocation66_spill]] }
  0x20   :  { %v4306_v12 = vld [vmem:[%s6985_s27 + $0x8] sm:$0xff]  ;;  %v4342_v21 = vld [vmem:[%s6908_s7 + $0x150] sm:$0xff]  ;;  %v4348_v22 = vld [vmem:[%s6908_s7 + $0x138] sm:$0xff] }
  0x21   :  { %3730 = vmatpush.bf16.msra.mxu2 %v3400_v37  ;;  %272 = vmatpush.bf16.msra.mxu1 %v3400_v37  ;;  %v4336_v20 = vld [vmem:[%s6908_s7 + $0x168] sm:$0xff]  ;;  %v4354_v23 = vld [vmem:[%s6908_s7 + $0x120] sm:$0xff]  ;;  %v4375_v27 = vld [vmem:[%s6985_s27 + $0x10] sm:$0xff] }
  0x22   :  { %v4361_v24 = vld [vmem:[%s6908_s7 + $0x108] sm:$0xff]  ;;  %v4366_v25 = vld [vmem:[%s6908_s7 + $0xe0] sm:$0xff]  ;;  %v3473_v28 = vld [vmem:[%s6906_s5 + $0xb4] sm:$0xf0] }
  0x23   :  { %580 = vmatpush.bf16.msra.mxu3 %v3508_v48  ;;  %v3686_v26 = vld [vmem:[%s6906_s5 + $0xac] sm:$0xf]  ;;  %v4389_v30 = vld [vmem:[%s6908_s7 + $0xf0] sm:$0xff]  ;;  %v3461_v33 = vld [vmem:[%s6906_s5 + $0x9c] sm:$0xf0] }
  0x24   :  { %v4384_v29 = vld [vmem:[%s6908_s7 + $0xc8] sm:$0xff]  ;;  %v3476_v31 = vor.u32 %v3686_v26, %v3473_v28  ;;  %v3683_v32 = vld [vmem:[%s6906_s5 + $0x94] sm:$0xf]  ;;  %v4407_v35 = vld [vmem:[%s6908_s7 + $0xd8] sm:$0xff] }
  0x25   :  { %3731 = vmatpush.bf16.msra.mxu2 %v3388_v45  ;;  %273 = vmatpush.bf16.msra.mxu1 %v3388_v45  ;;  %v4402_v34 = vld [vmem:[%s6908_s7 + $0xb0] sm:$0xff]  ;;  %v3464_v36 = vor.u32 %v3683_v32, %v3461_v33  ;;  %v3680_v37 = vld [vmem:[%s6906_s5 + $0x7c] sm:$0xf]  ;;  %v3449_v38 = vld [vmem:[%s6906_s5 + $0x84] sm:$0xf0] }
  0x26   :  { %v4420_v39 = vld [vmem:[%s6908_s7 + $0x98] sm:$0xff]  ;;  %v4425_v40 = vld [vmem:[%s6908_s7 + $0xc0] sm:$0xff]  ;;  %v4432_v41 = vld [vmem:[%s6908_s7 + $0xa8] sm:$0xff]  ;;  %v3452_v42 = vor.u32 %v3680_v37, %v3449_v38 }
  0x27   :  { %581 = vmatpush.bf16.msra.mxu3 %v3496_v54  ;;  %v3677_v43 = vld [vmem:[%s6906_s5 + $0x64] sm:$0xf]  ;;  %v3437_v44 = vld [vmem:[%s6906_s5 + $0x6c] sm:$0xf0]  ;;  %v4454_v47 = vld [vmem:[%s6908_s7 + $0x78] sm:$0xff] }
  0x28   :  { %284 = vmatmul.bf16.vlgmr.msra.gmra.mxu2 %v4229_v52  ;;  %274 = vmatmul.bf16.vlgmr.msra.gmra.mxu1 %v4234_v55  ;;  %v4445_v45 = vld [vmem:[%s6908_s7 + $0x90] sm:$0xff]  ;;  %v3440_v48 = vor.u32 %v3677_v43, %v3437_v44  ;;  %v4460_v50 = vld [vmem:[%s6908_s7 + $0x60] sm:$0xff]  ;;  %v4467_v51 = vld [vmem:[%s6908_s7 + $0x48] sm:$0xff] }
  0x29   :  { %324 = vmatpush.bf16.msrb.mxu2 %v3480_v46  ;;  %295 = vmatpush.bf16.msrb.mxu1 %v3476_v31  ;;  %v383_v46 = vld [vmem:[%s6985_s27 + $0x18] sm:$0xf]  ;;  %v3674_v54 = vld [vmem:[%s6906_s5 + $0x4c] sm:$0xf]  ;;  %v4492_v62 = vld [vmem:[%s6908_s7 + $0x30] sm:$0xff] }
  0x2a   :  { %582 = vmatmul.bf16.vlgmr.msra.gmra.mxu3 %v4247_v58  ;;  %v437_v49 = vunpack.c.l.b16 %v383_v46  ;;  %v3425_v57 = vld [vmem:[%s6906_s5 + $0x54] sm:$0xf0]  ;;  %6986 = vst [vmem:[#allocation8_spill] sm:$0xff] %v4492_v62  ;;  %v3413_v1 = vld [vmem:[%s6906_s5 + $0x3c] sm:$0xf0]  ;;  %v4505_v2 = vld [vmem:[%s6908_s7 + $0x50] sm:$0xff] }
  0x2b   :  { %762 = vmatpush.msrb.mxu3 %v4252_v59  ;;  %v3428_v61 = vor.u32 %v3674_v54, %v3425_v57  ;;  %v4510_v4 = vld [vmem:[%s6908_s7 + $0x18] sm:$0xff]  ;;  %v3401_v9 = vld [vmem:[%s6906_s5 + $0x24] sm:$0xf0]  ;;  %v4529_v10 = vld [vmem:[%s6908_s7] sm:$0xff] }
  0x2c   :  { %v4477_v56 = vpack.c.b16 %v437_v49, %v437_v49  ;;  %6987 = vst [vmem:[#allocation9_spill] sm:$0xff] %v4510_v4  ;;  %v4517_v5 = vld [vmem:[%s6908_s7 + $0x38] sm:$0xff]  ;;  %v3665_v26 = vld [vmem:[%s6906_s5 + $0x4] sm:$0xf]  ;;  %v3389_v28 = vld [vmem:[%s6906_s5 + $0xc] sm:$0xf0] }
  0x2d   :  { %325 = vmatpush.bf16.msrb.mxu2 %v3468_v53  ;;  %763 = vmatpush.msrb.mxu3 %v4264_v63  ;;  %v4472_v53 = vld [vmem:[%s6908_s7 + $0x80] sm:$0xff]  ;;  %6988 = vst [vmem:[#allocation10_spill] sm:$0xff] %v4529_v10  ;;  %v4540_v15 = vld [vmem:[%s6908_s7 + $0x178] sm:$0xff]  ;;  %v3392_v31 = vor.u32 %v3665_v26, %v3389_v28  ;;  %v4569_v33 = vld [vmem:[%s6908_s7 + $0x148] sm:$0xff] }
  0x2e   :  { %296 = vmatpush.bf16.msrb.mxu1 %v3464_v36  ;;  %v4564_v32 = vld [vmem:[%s6908_s7 + $0x160] sm:$0xff]  ;;  %v6928_v36 = vmov 0   ;;  %v4576_v37 = vld [vmem:[%s6908_s7 + $0x130] sm:$0xff]  ;;  %v4585_v38 = vld [vmem:[%s6908_s7 + $0x118] sm:$0xff] }
  0x2f   :  { %764 = vmatpush.msrb.mxu3 %v4300_v11  ;;  %3742 = vset.pattern.permute.xlu0 %v6928_v36  ;;  %v4601_v43 = vld [vmem:[%s6908_s7 + $0xe8] sm:$0xff]  ;;  %v4606_v44 = vld [vmem:[%s6991_s26] sm:$0xff]  ;;  %v4614_v46 = vld [vmem:[%s6908_s7 + $0xd0] sm:$0xff] }
  0x30   :  { %3743 = vset.pattern.permute.xlu1 %v6928_v36  ;;  %3744 = vset.pattern.permute.xlu2 %v6928_v36  ;;  %6992 = vst [vmem:[#allocation13_spill] sm:$0xff] %v4606_v44  ;;  %vm849_vm0 = vcmp.gt.s32.totalorder %v4606_v44, 0  ;;  %v4622_v49 = vld [vmem:[%s6908_s7 + $0xb8] sm:$0xff]  ;;  %v4629_v54 = vld [vmem:[%s6908_s7 + $0xa0] sm:$0xff]  ;;  %v4637_v57 = vld [vmem:[%s6908_s7 + $0x88] sm:$0xff]  ;;  %vm969_vm1 = vcmp.gt.s32.totalorder %v4606_v44, 1 }
  0x31   :  { %326 = vmatpush.bf16.msrb.mxu2 %v3456_v60  ;;  %765 = vmatpush.msrb.mxu3 %v4312_v13  ;;  %v4487_v60 = vld [vmem:[%s6908_s7 + $0x68] sm:$0xff]  ;;  %vm1569_vm2 = vcmp.gt.s32.totalorder %v4606_v44, 6  ;;  %v4734_v26 = vld [vmem:[%s6907_s6] sm:$0x7] }
  0x32   :  { %297 = vmatpush.bf16.msrb.mxu1 %v3452_v42  ;;  %v6926_v42 = vmov 0.0  }
  0x33   :  { %766 = vmatpush.msrb.mxu3 %v4324_v17 }
  0x35   :  { %327 = vmatpush.bf16.msrb.mxu2 %v3444_v0  ;;  %767 = vmatpush.msrb.mxu3 %v4330_v18  ;;  %v3671_v0 = vld [vmem:[%s6906_s5 + $0x34] sm:$0xf] }
  0x36   :  { %298 = vmatpush.bf16.msrb.mxu1 %v3440_v48  ;;  %v850_v48 = vsel %vm849_vm0, 1, %v6928_v36 }
  0x37   :  { %768 = vmatpush.msrb.mxu3 %v4366_v25  ;;  %852 = vperm.xlu0 %3742, %v850_v48   ;;  %v4745_v48 = vld [vmem:[%s6916_s15] sm:$0x7] }
  0x38   :  { %289 = vmatmul.bf16.gmra.mxu2 %v4283_v6  ;;  %279 = vmatmul.bf16.gmra.mxu1 %v4288_v8  ;;  %6999 = vst [vmem:[#allocation19_spill] sm:$0xff] %v4745_v48 }
  0x39   :  { %328 = vmatpush.bf16.msrb.mxu2 %v3432_v3  ;;  %769 = vmatpush.msrb.mxu3 %v4384_v29  ;;  %v3416_v3 = vor.u32 %v3671_v0, %v3413_v1  ;;  %v4652_v0 = vld [vmem:[%s6908_s7 + $0x58] sm:$0xff]  ;;  %v4659_v1 = vld [vmem:[%s6908_s7 + $0x40] sm:$0xff] }
  0x3a   :  { %587 = vmatmul.bf16.gmra.mxu3 %v4306_v12  ;;  %299 = vmatpush.bf16.msrb.mxu1 %v3428_v61  ;;  %v4644_v61 = vld [vmem:[%s6908_s7 + $0x70] sm:$0xff] }
  0x3b   :  { %770 = vmatpush.msrb.mxu3 %v4402_v34 }
  0x3d   :  { %329 = vmatpush.bf16.msrb.mxu2 %v3420_v7  ;;  %771 = vmatpush.msrb.mxu3 %v4420_v39  ;;  %v3668_v7 = vld [vmem:[%s6906_s5 + $0x1c] sm:$0xf] }
  0x3e   :  { %300 = vmatpush.bf16.msrb.mxu1 %v3416_v3  ;;  %v3404_v16 = vor.u32 %v3668_v7, %v3401_v9  ;;  %v4673_v3 = vld [vmem:[%s6908_s7 + $0x10] sm:$0xff]  ;;  %v970_v7 = vsel %vm969_vm1, 1, %v6928_v36  ;;  %v3112_v9 = vld [vmem:[%s6995_s30 + $0x8] sm:$0xff] }
  0x3f   :  { %772 = vmatpush.msrb.mxu3 %v4472_v53  ;;  %6994 = vst [vmem:[#allocation15_spill] sm:$0xff] %v4673_v3  ;;  %972 = vperm.xlu0 %3742, %v970_v7  }
  0x41   :  { %330 = vmatpush.bf16.msrb.mxu2 %v3408_v14  ;;  %773 = vmatpush.msrb.mxu3 %v4487_v60  ;;  %v4535_v14 = vld [vmem:[%s6908_s7 + $0x20] sm:$0xff] }
  0x42   :  { %6989 = vst [vmem:[#allocation11_spill] sm:$0xff] %v4535_v14  ;;  %301 = vmatpush.bf16.msrb.mxu1 %v3404_v16 }
  0x43   :  { %774 = vmatpush.msrb.mxu3 %v4505_v2 }
  0x45   :  { %331 = vmatpush.bf16.msrb.mxu2 %v3396_v19  ;;  %775 = vmatpush.msrb.mxu3 %v4517_v5  ;;  %v4546_v19 = vld [vmem:[%s6908_s7 + $0x8] sm:$0xff] }
  0x46   :  { %6990 = vst [vmem:[#allocation12_spill] sm:$0xff] %v4546_v19  ;;  %302 = vmatpush.bf16.msrb.mxu1 %v3392_v31  ;;  %v4740_v31 = vperm.slane %v4734_v26, 0 }
  0x47   :  { %776 = vmatpush.msrb.mxu3 %v4535_v14 }
  0x48   :  { %332 = vmatmul.bf16.vlgmr.msrb.gmra.mxu2 %v4234_v55  ;;  %6998 = vst [vmem:[#allocation18_spill] sm:$0xff] %v4740_v31 }
  0x49   :  { %742 = vmatpush.msra.mxu2 %v4336_v20  ;;  %777 = vmatpush.msrb.mxu3 %v4546_v19 }
  0x4a   :  { %592 = vmatmul.bf16.gmra.mxu3 %v4375_v27  ;;  %303 = vmatmul.bf16.vlgmr.msrb.gmra.mxu1 %v4234_v55  ;;  %v4594_v55 = vld [vmem:[%s6908_s7 + $0x100] sm:$0xff] }
  0x4b   :  { %743 = vmatpush.msra.mxu2 %v4342_v21  ;;  %862 = vmatpush.msra.mxu3 %v4336_v20 }
  0x4d   :  { %744 = vmatpush.msra.mxu2 %v4348_v22  ;;  %863 = vmatpush.msra.mxu3 %v4342_v21 }
  0x4f   :  { %745 = vmatpush.msra.mxu2 %v4354_v23  ;;  %864 = vmatpush.msra.mxu3 %v4348_v22 }
  0x51   :  { %746 = vmatpush.msra.mxu2 %v4361_v24  ;;  %865 = vmatpush.msra.mxu3 %v4354_v23 }
  0x53   :  { %747 = vmatpush.msra.mxu2 %v4389_v30  ;;  %866 = vmatpush.msra.mxu3 %v4361_v24 }
  0x55   :  { %748 = vmatpush.msra.mxu2 %v4407_v35  ;;  %867 = vmatpush.msra.mxu3 %v4389_v30 }
  0x57   :  { %749 = vmatpush.msra.mxu2 %v4425_v40  ;;  %868 = vmatpush.msra.mxu3 %v4407_v35 }
  0x58   :  { %337 = vmatmul.bf16.gmra.mxu2 %v4288_v8 }
  0x59   :  { %750 = vmatpush.msra.mxu2 %v4432_v41  ;;  %869 = vmatpush.msra.mxu3 %v4425_v40 }
  0x5a   :  { %597 = vmatmul.bf16.gmra.mxu3 %v4477_v56  ;;  %308 = vmatmul.bf16.gmra.mxu1 %v4288_v8  ;;  %v4666_v8 = vld [vmem:[%s6908_s7 + $0x28] sm:$0xff] }
  0x5b   :  { %751 = vmatpush.msra.mxu2 %v4445_v45  ;;  %870 = vmatpush.msra.mxu3 %v4432_v41  ;;  %6993 = vst [vmem:[#allocation14_spill] sm:$0xff] %v4666_v8 }
  0x5d   :  { %752 = vmatpush.msra.mxu2 %v4454_v47  ;;  %871 = vmatpush.msra.mxu3 %v4445_v45 }
  0x5f   :  { %753 = vmatpush.msra.mxu2 %v4460_v50  ;;  %872 = vmatpush.msra.mxu3 %v4454_v47 }
  0x61   :  { %754 = vmatpush.msra.mxu2 %v4467_v51  ;;  %873 = vmatpush.msra.mxu3 %v4460_v50 }
  0x63   :  { %755 = vmatpush.msra.mxu2 %v4492_v62  ;;  %874 = vmatpush.msra.mxu3 %v4467_v51 }
  0x65   :  { %756 = vmatpush.msra.mxu2 %v4510_v4  ;;  %875 = vmatpush.msra.mxu3 %v4492_v62 }
  0x67   :  { %757 = vmatpush.msra.mxu2 %v4529_v10  ;;  %876 = vmatpush.msra.mxu3 %v4510_v4 }
  0x68   :  { %342 = vmatmul.bf16.gmra.mxu2 %v4229_v52 }
  0x69   :  { %782 = vmatpush.msrb.mxu2 %v4540_v15  ;;  %877 = vmatpush.msra.mxu3 %v4529_v10 }
  0x6a   :  { %778 = vmatmul.f32.vlgmr.msrb.gmra.mxu3 %v6926_v42  ;;  %313 = vmatmul.bf16.gmra.mxu1 %v4229_v52  ;;  %v1570_v52 = vsel %vm1569_vm2, 1, %v6928_v36  ;;  %v3713_v36 = vld [vmem:[%s6915_s14 + $0xac] sm:$0xf] }
  0x6b   :  { %783 = vmatpush.msrb.mxu2 %v4564_v32  ;;  %1002 = vmatpush.msrb.mxu3 %v4252_v59 }
  0x6c   :  { %1572 = vperm.xlu0 %3742, %v1570_v52  }
  0x6d   :  { %784 = vmatpush.msrb.mxu2 %v4569_v33  ;;  %1003 = vmatpush.msrb.mxu3 %v4264_v63 }
  0x6f   :  { %785 = vmatpush.msrb.mxu2 %v4576_v37  ;;  %1004 = vmatpush.msrb.mxu3 %v4300_v11 }
  0x71   :  { %786 = vmatpush.msrb.mxu2 %v4585_v38  ;;  %1005 = vmatpush.msrb.mxu3 %v4312_v13 }
  0x73   :  { %787 = vmatpush.msrb.mxu2 %v4594_v55  ;;  %1006 = vmatpush.msrb.mxu3 %v4324_v17 }
  0x74   :  { %3194 = vperm.xlu0 %3742, %v3112_v9   ;;  %v4753_v9 = vperm.slane %v4745_v48, 0  ;;  %v3710_v48 = vld [vmem:[%s6915_s14 + $0x94] sm:$0xf] }
  0x75   :  { %788 = vmatpush.msrb.mxu2 %v4601_v43  ;;  %1007 = vmatpush.msrb.mxu3 %v4330_v18 }
  0x76   :  { %7001 = vst [vmem:[#allocation21_spill] sm:$0xff] %v4753_v9 }
  0x77   :  { %789 = vmatpush.msrb.mxu2 %v4614_v46  ;;  %1008 = vmatpush.msrb.mxu3 %v4366_v25 }
  0x78   :  { %347 = vmatmul.bf16.gmra.mxu2 %v4283_v6 }
  0x79   :  { %790 = vmatpush.msrb.mxu2 %v4622_v49  ;;  %1009 = vmatpush.msrb.mxu3 %v4384_v29 }
  0x7a   :  { %318 = vmatmul.bf16.gmra.mxu1 %v4283_v6  ;;  %v3114_v6 = vld [vmem:[%s6995_s30 + $0x18] sm:$0xff] }
  0x7b   :  { %791 = vmatpush.msrb.mxu2 %v4629_v54  ;;  %1010 = vmatpush.msrb.mxu3 %v4402_v34 }
  0x7c   :  { %3200 = vperm.xlu0 %3742, %v3114_v6  }
  0x7d   :  { %792 = vmatpush.msrb.mxu2 %v4637_v57  ;;  %1011 = vmatpush.msrb.mxu3 %v4420_v39 }
  0x7f   :  { %793 = vmatpush.msrb.mxu2 %v4644_v61  ;;  %1012 = vmatpush.msrb.mxu3 %v4472_v53 }
  0x81   :  { %794 = vmatpush.msrb.mxu2 %v4652_v0  ;;  %1013 = vmatpush.msrb.mxu3 %v4487_v60 }
  0x83   :  { %795 = vmatpush.msrb.mxu2 %v4659_v1  ;;  %1014 = vmatpush.msrb.mxu3 %v4505_v2 }
  0x85   :  { %796 = vmatpush.msrb.mxu2 %v4666_v8  ;;  %1015 = vmatpush.msrb.mxu3 %v4517_v5 }
  0x87   :  { %797 = vmatpush.msrb.mxu2 %v4673_v3  ;;  %1016 = vmatpush.msrb.mxu3 %v4535_v14 }
  0x88   :  { %758 = vmatmul.f32.vlgmr.msra.gmra.mxu2 %v6926_v42 }
  0x89   :  { %982 = vmatpush.msra.mxu2 %v4336_v20  ;;  %1017 = vmatpush.msrb.mxu3 %v4546_v19 }
  0x8b   :  { %983 = vmatpush.msra.mxu2 %v4342_v21 }
  0x8d   :  { %984 = vmatpush.msra.mxu2 %v4348_v22 }
  0x8f   :  { %985 = vmatpush.msra.mxu2 %v4354_v23 }
  0x90   :  { %798 = vmatmul.f32.vlgmr.msrb.gmra.mxu2 %v6926_v42 }
  0x91   :  { %986 = vmatpush.msra.mxu2 %v4361_v24 }
  0x93   :  { %987 = vmatpush.msra.mxu2 %v4389_v30 }
  0x95   :  { %988 = vmatpush.msra.mxu2 %v4407_v35 }
  0x97   :  { %989 = vmatpush.msra.mxu2 %v4425_v40 }
  0x99   :  { %990 = vmatpush.msra.mxu2 %v4432_v41 }
  0x9b   :  { %991 = vmatpush.msra.mxu2 %v4445_v45 }
  0x9d   :  { %992 = vmatpush.msra.mxu2 %v4454_v47 }
  0x9f   :  { %993 = vmatpush.msra.mxu2 %v4460_v50 }
  0xa1   :  { %994 = vmatpush.msra.mxu2 %v4467_v51 }
  0xa3   :  { %995 = vmatpush.msra.mxu2 %v4492_v62  ;;  %v3497_v62 = vld [vmem:[%s6915_s14 + $0xc] sm:$0xf0] }
  0xa5   :  { %996 = vmatpush.msra.mxu2 %v4510_v4  ;;  %v3692_v4 = vld [vmem:[%s6915_s14 + $0x4] sm:$0xf] }
  0xa7   :  { %997 = vmatpush.msra.mxu2 %v4529_v10  ;;  %v3701_v10 = vld [vmem:[%s6915_s14 + $0x4c] sm:$0xf] }
  0xa9   :  { %1122 = vmatpush.msrb.mxu2 %v4252_v59 }
  0xab   :  { %1123 = vmatpush.msrb.mxu2 %v4264_v63  ;;  %v4727_v16 = vpop.f32.mrf.mxu2 }
  0xac   :  { %6996 = vst [vmem:[#allocation16_spill] sm:$0xff] %v4727_v16  ;;  %v3715_v16 = vld [vmem:[%s6915_s14 + $0xb8] sm:$0xf0] }
  0xad   :  { %1124 = vmatpush.msrb.mxu2 %v4300_v11  ;;  %v4736_v28 = vpop.f32.mrf.mxu3 }
  0xae   :  { %6997 = vst [vmem:[#allocation17_spill] sm:$0xff] %v4736_v28  ;;  %v3587_v28 = vld [vmem:[%s6915_s14 + $0xb0] sm:$0xf] }
  0xaf   :  { %1125 = vmatpush.msrb.mxu2 %v4312_v13 }
  0xb1   :  { %1126 = vmatpush.msrb.mxu2 %v4324_v17 }
  0xb3   :  { %1127 = vmatpush.msrb.mxu2 %v4330_v18  ;;  %v287_v7 = vpop.f32.mrf.mxu2 }
  0xb4   :  { %v4749_v52 = vadd.f32 %v287_v7, %v4740_v31  ;;  %v3581_v7 = vld [vmem:[%s6915_s14 + $0xb4] sm:$0xf0] }
  0xb5   :  { %1128 = vmatpush.msrb.mxu2 %v4366_v25  ;;  %v585_v6 = vpop.f32.mrf.mxu3 }
  0xb6   :  { %7000 = vst [vmem:[#allocation20_spill] sm:$0xff] %v4749_v52  ;;  %v4758_v42 = vadd.f32 %v585_v6, %v4753_v9  ;;  %v3584_v52 = vor.u32 %v3713_v36, %v3581_v7  ;;  %v3569_v36 = vld [vmem:[%s6915_s14 + $0x9c] sm:$0xf0]  ;;  %v3575_v7 = vld [vmem:[%s6915_s14 + $0x98] sm:$0xf] }
  0xb7   :  { %1129 = vmatpush.msrb.mxu2 %v4384_v29 }
  0xb8   :  { %7002 = vst [vmem:[#allocation22_spill] sm:$0xff] %v4758_v42  ;;  %v3588_v42 = vor.u32 %v3715_v16, %v3587_v28  ;;  %602 = vmatpush.bf16.msra.mxu0 %v3584_v52  ;;  %v3572_v16 = vor.u32 %v3710_v48, %v3569_v36  ;;  %v3712_v28 = vld [vmem:[%s6915_s14 + $0xa0] sm:$0xf0]  ;;  %v3557_v48 = vld [vmem:[%s6915_s14 + $0x84] sm:$0xf0] }
  0xb9   :  { %1130 = vmatpush.msrb.mxu2 %v4402_v34  ;;  %v3576_v52 = vor.u32 %v3712_v28, %v3575_v7  ;;  %v3563_v36 = vld [vmem:[%s6915_s14 + $0x80] sm:$0xf] }
  0xba   :  { %630 = vmatpush.bf16.msra.mxu1 %v3588_v42  ;;  %v3707_v42 = vld [vmem:[%s6915_s14 + $0x7c] sm:$0xf] }
  0xbb   :  { %1131 = vmatpush.msrb.mxu2 %v4420_v39  ;;  %v290_v6 = vpop.f32.mrf.mxu2  ;;  %v3560_v7 = vor.u32 %v3707_v42, %v3557_v48  ;;  %v3545_v42 = vld [vmem:[%s6915_s14 + $0x6c] sm:$0xf0]  ;;  %v3551_v48 = vld [vmem:[%s6915_s14 + $0x68] sm:$0xf] }
  0xbc   :  { %v4774_v44 = vadd.f32 %v290_v6, %v4740_v31  ;;  %603 = vmatpush.bf16.msra.mxu0 %v3572_v16  ;;  %v3709_v16 = vld [vmem:[%s6915_s14 + $0x88] sm:$0xf0] }
  0xbd   :  { %1132 = vmatpush.msrb.mxu2 %v4472_v53  ;;  %v588_v6 = vpop.f32.mrf.mxu3 }
  0xbe   :  { %7003 = vst [vmem:[#allocation23_spill] sm:$0xff] %v4774_v44  ;;  %v4792_v44 = vadd.f32 %v588_v6, %v4753_v9  ;;  %631 = vmatpush.bf16.msra.mxu1 %v3576_v52  ;;  %v3564_v52 = vor.u32 %v3709_v16, %v3563_v36 }
  0xbf   :  { %1133 = vmatpush.msrb.mxu2 %v4487_v60 }
  0xc0   :  { %7004 = vst [vmem:[#allocation24_spill] sm:$0xff] %v4792_v44  ;;  %604 = vmatpush.bf16.msra.mxu0 %v3560_v7  ;;  %v3704_v44 = vld [vmem:[%s6915_s14 + $0x64] sm:$0xf]  ;;  %v3706_v7 = vld [vmem:[%s6915_s14 + $0x70] sm:$0xf0] }
  0xc1   :  { %1134 = vmatpush.msrb.mxu2 %v4505_v2  ;;  %v3548_v36 = vor.u32 %v3704_v44, %v3545_v42  ;;  %v3552_v16 = vor.u32 %v3706_v7, %v3551_v48  ;;  %v3533_v44 = vld [vmem:[%s6915_s14 + $0x54] sm:$0xf0]  ;;  %v3703_v48 = vld [vmem:[%s6915_s14 + $0x58] sm:$0xf0] }
  0xc2   :  { %632 = vmatpush.bf16.msra.mxu1 %v3564_v52  ;;  %v3539_v52 = vld [vmem:[%s6915_s14 + $0x50] sm:$0xf]  ;;  %v3536_v42 = vor.u32 %v3701_v10, %v3533_v44  ;;  %v3527_v10 = vld [vmem:[%s6915_s14 + $0x38] sm:$0xf] }
  0xc3   :  { %1135 = vmatpush.msrb.mxu2 %v4517_v5  ;;  %v292_v28 = vpop.f32.mrf.mxu2  ;;  %v3540_v7 = vor.u32 %v3703_v48, %v3539_v52 }
  0xc4   :  { %v4808_v6 = vadd.f32 %v292_v28, %v4740_v31  ;;  %605 = vmatpush.bf16.msra.mxu0 %v3548_v36 }
  0xc5   :  { %1136 = vmatpush.msrb.mxu2 %v4535_v14  ;;  %v590_v28 = vpop.f32.mrf.mxu3 }
  0xc6   :  { %7005 = vst [vmem:[#allocation25_spill] sm:$0xff] %v4808_v6  ;;  %v4825_v6 = vadd.f32 %v590_v28, %v4753_v9  ;;  %633 = vmatpush.bf16.msra.mxu1 %v3552_v16  ;;  %v3698_v16 = vld [vmem:[%s6915_s14 + $0x34] sm:$0xf]  ;;  %v3521_v28 = vld [vmem:[%s6915_s14 + $0x3c] sm:$0xf0] }
  0xc7   :  { %1137 = vmatpush.msrb.mxu2 %v4546_v19  ;;  %v3524_v44 = vor.u32 %v3698_v16, %v3521_v28  ;;  %v3515_v16 = vld [vmem:[%s6915_s14 + $0x20] sm:$0xf]  ;;  %v4868_v28 = vpop.f32.mrf.mxu1 }
  0xc8   :  { %7006 = vst [vmem:[#allocation26_spill] sm:$0xff] %v4825_v6  ;;  %606 = vmatpush.bf16.msra.mxu0 %v3536_v42  ;;  %v3700_v6 = vld [vmem:[%s6915_s14 + $0x40] sm:$0xf0] }
  0xc9   :  { %v3528_v52 = vor.u32 %v3700_v6, %v3527_v10  ;;  %v4866_v6 = vperm.slane %v4734_v26, 2 }
  0xca   :  { %634 = vmatpush.bf16.msra.mxu1 %v3540_v7  ;;  %v3509_v7 = vld [vmem:[%s6915_s14 + $0x24] sm:$0xf0] }
  0xcb   :  { %v4839_v36 = vpop.f32.mrf.mxu2 }
  0xcc   :  { %7007 = vst [vmem:[#allocation27_spill] sm:$0xff] %v4839_v36  ;;  %607 = vmatpush.bf16.msra.mxu0 %v3524_v44  ;;  %v3695_v36 = vld [vmem:[%s6915_s14 + $0x1c] sm:$0xf]  ;;  %v3697_v44 = vld [vmem:[%s6915_s14 + $0x28] sm:$0xf0] }
  0xcd   :  { %v593_v42 = vpop.f32.mrf.mxu3  ;;  %v3512_v10 = vor.u32 %v3695_v36, %v3509_v7  ;;  %v3503_v36 = vld [vmem:[%s6915_s14 + $0x8] sm:$0xf]  ;;  %v3500_v7 = vor.u32 %v3692_v4, %v3497_v62 }
  0xce   :  { %v4854_v48 = vadd.f32 %v593_v42, %v4753_v9  ;;  %635 = vmatpush.bf16.msra.mxu1 %v3528_v52  ;;  %v3516_v42 = vor.u32 %v3697_v44, %v3515_v16  ;;  %v3694_v16 = vld [vmem:[%s6915_s14 + $0x10] sm:$0xf0] }
  0xcf   :  { %v3504_v44 = vor.u32 %v3694_v16, %v3503_v36  ;;  %v4897_v4 = vpop.f32.mrf.mxu1 }
  0xd0   :  { %7008 = vst [vmem:[#allocation28_spill] sm:$0xff] %v4854_v48  ;;  %608 = vmatpush.bf16.msra.mxu0 %v3512_v10 }
  0xd1   :  { %7012 = vst [vmem:[#allocation32_spill] sm:$0xff] %v4897_v4 }
  0xd2   :  { %636 = vmatpush.bf16.msra.mxu1 %v3516_v42 }
  0xd3   :  { %v335_v52 = vpop.f32.mrf.mxu2 }
  0xd4   :  { %v4874_v48 = vadd.f32 %v335_v52, %v4866_v6  ;;  %609 = vmatpush.bf16.msra.mxu0 %v3500_v7 }
  0xd5   :  { %v595_v10 = vpop.f32.mrf.mxu3 }
  0xd6   :  { %7009 = vst [vmem:[#allocation29_spill] sm:$0xff] %v4874_v48  ;;  %v4889_v52 = vadd.f32 %v595_v10, %v4753_v9  ;;  %637 = vmatpush.bf16.msra.mxu1 %v3504_v44 }
  0xd7   :  { %610 = vmatmul.bf16.vlgmr.msra.gmra.mxu0 %v4247_v58 }
  0xd8   :  { %7010 = vst [vmem:[#allocation30_spill] sm:$0xff] %v4889_v52  ;;  %882 = vmatpush.msrb.mxu0 %v4252_v59 }
  0xd9   :  { %638 = vmatmul.bf16.vlgmr.msra.gmra.mxu1 %v4247_v58 }
  0xda   :  { %902 = vmatpush.msrb.mxu1 %v4540_v15  ;;  %883 = vmatpush.msrb.mxu0 %v4264_v63  ;;  %v4916_v63 = vpop.f32.mrf.mxu1 }
  0xdb   :  { %v338_v48 = vpop.f32.mrf.mxu2  ;;  %7015 = vst [vmem:[#allocation35_spill] sm:$0xff] %v4916_v63 }
  0xdc   :  { %v4895_v62 = vadd.f32 %v338_v48, %v4866_v6  ;;  %903 = vmatpush.msrb.mxu1 %v4564_v32  ;;  %884 = vmatpush.msrb.mxu0 %v4300_v11 }
  0xdd   :  { %v598_v59 = vpop.f32.mrf.mxu3 }
  0xde   :  { %7011 = vst [vmem:[#allocation31_spill] sm:$0xff] %v4895_v62  ;;  %904 = vmatpush.msrb.mxu1 %v4569_v33  ;;  %885 = vmatpush.msrb.mxu0 %v4312_v13  ;;  %v4906_v42 = vadd.f32 %v598_v59, %v4753_v9  ;;  %v4947_v59 = vld [vmem:[%s6909_s8] sm:$0x7]  ;;  %s4011_s8 = smov 1.0  }
  0xdf   :  { %v5014_v63 = vperm.slane %v4947_v59, 2 }
  0xe0   :  { %7013 = vst [vmem:[#allocation33_spill] sm:$0xff] %v4906_v42  ;;  %905 = vmatpush.msrb.mxu1 %v4576_v37  ;;  %886 = vmatpush.msrb.mxu0 %v4324_v17 }
  0xe1   :  { %7029 = vst [vmem:[#allocation45_spill] sm:$0xff] %v5014_v63 }
  0xe2   :  { %906 = vmatpush.msrb.mxu1 %v4585_v38  ;;  %887 = vmatpush.msrb.mxu0 %v4330_v18  ;;  %v4933_v44 = vpop.f32.mrf.mxu1 }
  0xe3   :  { %v340_v48 = vpop.f32.mrf.mxu2  ;;  %7017 = vst [vmem:[#allocation37_spill] sm:$0xff] %v4933_v44 }
  0xe4   :  { %v4912_v58 = vadd.f32 %v340_v48, %v4866_v6  ;;  %907 = vmatpush.msrb.mxu1 %v4594_v55  ;;  %888 = vmatpush.msrb.mxu0 %v4366_v25  ;;  %v4953_v48 = vperm.slane %v4734_v26, 1 }
  0xe5   :  { %v600_v36 = vpop.f32.mrf.mxu3 }
  0xe6   :  { %7014 = vst [vmem:[#allocation34_spill] sm:$0xff] %v4912_v58  ;;  %908 = vmatpush.msrb.mxu1 %v4601_v43  ;;  %889 = vmatpush.msrb.mxu0 %v4384_v29  ;;  %v4956_v36 = vperm.slane %v4947_v59, 1 }
  0xe7   :  { %615 = vmatmul.bf16.gmra.mxu0 %v4306_v12  ;;  %7019 = vst [vmem:[#allocation39_spill] sm:$0xff] %v4953_v48 }
  0xe8   :  { %909 = vmatpush.msrb.mxu1 %v4614_v46  ;;  %890 = vmatpush.msrb.mxu0 %v4402_v34  ;;  %7020 = vst [vmem:[#allocation40_spill] sm:$0xff] %v4956_v36 }
  0xe9   :  { %643 = vmatmul.bf16.gmra.mxu1 %v4306_v12 }
  0xea   :  { %910 = vmatpush.msrb.mxu1 %v4622_v49  ;;  %891 = vmatpush.msrb.mxu0 %v4420_v39 }
  0xeb   :  { %v343_v7 = vpop.f32.mrf.mxu2 }
  0xec   :  { %v4926_v16 = vadd.f32 %v343_v7, %v4866_v6  ;;  %911 = vmatpush.msrb.mxu1 %v4629_v54  ;;  %892 = vmatpush.msrb.mxu0 %v4472_v53  ;;  %v304_v7 = vpop.f32.mrf.mxu1 }
  0xed   :  { %v305_v26 = vadd.f32 %v304_v7, %v4953_v48 }
  0xee   :  { %7016 = vst [vmem:[#allocation36_spill] sm:$0xff] %v4926_v16  ;;  %912 = vmatpush.msrb.mxu1 %v4637_v57  ;;  %893 = vmatpush.msrb.mxu0 %v4487_v60 }
  0xf0   :  { %913 = vmatpush.msrb.mxu1 %v4644_v61  ;;  %894 = vmatpush.msrb.mxu0 %v4505_v2 }
  0xf2   :  { %914 = vmatpush.msrb.mxu1 %v4652_v0  ;;  %895 = vmatpush.msrb.mxu0 %v4517_v5 }
  0xf3   :  { %v345_v10 = vpop.f32.mrf.mxu2 }
  0xf4   :  { %v4940_v12 = vadd.f32 %v345_v10, %v4866_v6  ;;  %915 = vmatpush.msrb.mxu1 %v4659_v1  ;;  %896 = vmatpush.msrb.mxu0 %v4535_v14  ;;  %v779_v10 = vpop.f32.mrf.mxu3 }
  0xf5   :  { %v780_v9 = vadd.f32 %v779_v10, %v4956_v36 }
  0xf6   :  { %7018 = vst [vmem:[#allocation38_spill] sm:$0xff] %v4940_v12  ;;  %916 = vmatpush.msrb.mxu1 %v4666_v8  ;;  %897 = vmatpush.msrb.mxu0 %v4546_v19 }
  0xf7   :  { %620 = vmatmul.bf16.gmra.mxu0 %v4375_v27  ;;  %v822_v12 = vadd.f32 %v780_v9, %v305_v26  ;;  %v4984_v9 = vperm.slane %v4947_v59, 0 }
  0xf8   :  { %917 = vmatpush.msrb.mxu1 %v4673_v3  ;;  %1022 = vmatpush.msra.mxu0 %v4540_v15 }
  0xf9   :  { %648 = vmatmul.bf16.gmra.mxu1 %v4375_v27  ;;  %v3590_v7 = vmul.f32 -1.442695, %v822_v12  ;;  %7023 = vst [vmem:[#allocation43_spill] sm:$0xff] %v4984_v9  ;;  %v276_v12 = vadd.f32 %v4868_v28, %v4740_v31 }
  0xfa   :  { %1102 = vmatpush.msra.mxu1 %v4336_v20  ;;  %1023 = vmatpush.msra.mxu0 %v4564_v32 }
  0xfb   :  { %v348_v42 = vpop.f32.mrf.mxu2  ;;  %3748 = vpow2.f32 %v3590_v7 }
  0xfc   :  { %v4963_v52 = vadd.f32 %v348_v42, %v4866_v6  ;;  %1103 = vmatpush.msra.mxu1 %v4342_v21  ;;  %1024 = vmatpush.msra.mxu0 %v4569_v33 }
  0xfe   :  { %7021 = vst [vmem:[#allocation41_spill] sm:$0xff] %v4963_v52  ;;  %1104 = vmatpush.msra.mxu1 %v4348_v22  ;;  %1025 = vmatpush.msra.mxu0 %v4576_v37 }
 0x100   :  { %1105 = vmatpush.msra.mxu1 %v4354_v23  ;;  %1026 = vmatpush.msra.mxu0 %v4585_v38 }
 0x101   :  { %v3749_v7 = vpop.eup %3748 }
 0x102   :  { %1106 = vmatpush.msra.mxu1 %v4361_v24  ;;  %1027 = vmatpush.msra.mxu0 %v4594_v55  ;;  %v826_v28 = vadd.f32 1.0, %v3749_v7 }
 0x103   :  { %v350_v27 = vpop.f32.mrf.mxu2 }
 0x104   :  { %v4977_v42 = vadd.f32 %v350_v27, %v4866_v6  ;;  %1107 = vmatpush.msra.mxu1 %v4389_v30  ;;  %1028 = vmatpush.msra.mxu0 %v4601_v43  ;;  %vm832_vm5 = vweird.f32 %v826_v28  ;;  %v836_v14 = vand.u32 2147483647, %v826_v28 }
 0x106   :  { %7022 = vst [vmem:[#allocation42_spill] sm:$0xff] %v4977_v42  ;;  %1108 = vmatpush.msra.mxu1 %v4407_v35  ;;  %1029 = vmatpush.msra.mxu0 %v4614_v46  ;;  %vm837_vm10 = vcmp.eq.f32.partialorder %v836_v14, 8.507059e+37  ;;  %v5032_v14 = vld [vmem:[%s6908_s7 + $0x170] sm:$0xff] }
 0x107   :  { %625 = vmatmul.bf16.gmra.mxu0 %v4477_v56 }
 0x108   :  { %1109 = vmatpush.msra.mxu1 %v4425_v40  ;;  %1030 = vmatpush.msra.mxu0 %v4622_v49 }
 0x109   :  { %653 = vmatmul.bf16.gmra.mxu1 %v4477_v56  ;;  %v5004_v56 = vpop.f32.mrf.mxu1 }
 0x10a   :  { %1110 = vmatpush.msra.mxu1 %v4432_v41  ;;  %1031 = vmatpush.msra.mxu0 %v4629_v54  ;;  %7024 = vst [vmem:[#allocation44_spill] sm:$0xff] %v5004_v56 }
 0x10b   :  { %v759_v10 = vpop.f32.mrf.mxu2 }
 0x10c   :  { %v760_v26 = vadd.f32 %v759_v10, %v4984_v9  ;;  %1111 = vmatpush.msra.mxu1 %v4445_v45  ;;  %1032 = vmatpush.msra.mxu0 %v4637_v57  ;;  %v7025_v10 = vld [vmem:[#allocation8_spill] sm:$0xff] }
 0x10e   :  { %v802_v27 = vadd.f32 %v760_v26, %v276_v12  ;;  %1112 = vmatpush.msra.mxu1 %v4454_v47  ;;  %1033 = vmatpush.msra.mxu0 %v4644_v61  ;;  %v7026_v12 = vld [vmem:[#allocation9_spill] sm:$0xff] }
 0x110   :  { %v3589_v42 = vmul.f32 -1.442695, %v802_v27  ;;  %1113 = vmatpush.msra.mxu1 %v4460_v50  ;;  %1034 = vmatpush.msra.mxu0 %v4652_v0 }
 0x111   :  { %v5011_v52 = vpop.f32.mrf.mxu1 }
 0x112   :  { %3750 = vpow2.f32 %v3589_v42  ;;  %1114 = vmatpush.msra.mxu1 %v4467_v51  ;;  %1035 = vmatpush.msra.mxu0 %v4659_v1  ;;  %v7027_v42 = vld [vmem:[#allocation10_spill] sm:$0xff]  ;;  %7028 = vst [vmem:[#allocation8_spill] sm:$0xff] %v5011_v52  ;;  %v838_v52 = vand.u32 2147483648, %v826_v28 }
 0x113   :  { %3752 = vrcp.f32 %v826_v28  ;;  %v799_v4 = vpop.f32.mrf.mxu2 }
 0x114   :  { %1115 = vmatpush.msra.mxu1 %v7025_v10  ;;  %1036 = vmatpush.msra.mxu0 %v4666_v8  ;;  %v800_v19 = vadd.f32 %v799_v4, %v5014_v63 }
 0x116   :  { %1116 = vmatpush.msra.mxu1 %v7026_v12  ;;  %1037 = vmatpush.msra.mxu0 %v4673_v3 }
 0x118   :  { %v3751_v26 = vpop.eup %3750  ;;  %1117 = vmatpush.msra.mxu1 %v7027_v42 }
 0x119   :  { %v806_v27 = vadd.f32 1.0, %v3751_v26  ;;  %v3753_v7 = vpop.eup %3752  ;;  %v5016_v48 = vpop.f32.mrf.mxu1 }
 0x11a   :  { %v828_v16 = vmul.f32 %v3753_v7, %v826_v28  ;;  %7030 = vst [vmem:[#allocation46_spill] sm:$0xff] %v5016_v48  ;;  %vm833_vm6 = vweird.f32 %v3753_v7  ;;  %v839_v48 = vor.u32 1.1754944e-38, %v838_v52  ;;  %v7060_v52 = vld [vmem:[#allocation44_spill] sm:$0xff] }
 0x11b   :  { %3754 = vrcp.f32 %v806_v27  ;;  %v818_v31 = vand.u32 2147483648, %v806_v27  ;;  %v816_v56 = vand.u32 2147483647, %v806_v27  ;;  %vm812_vm4 = vweird.f32 %v806_v27  ;;  %vm834_vm9 = vmor %vm832_vm5, %vm833_vm6 }
 0x11c   :  { %v829_v62 = vsub.f32 1.0, %v828_v16 }
 0x11d   :  { %v819_v16 = vor.u32 1.1754944e-38, %v818_v31  ;;  %vm817_vm8 = vcmp.eq.f32.partialorder %v816_v56, 8.507059e+37 }
 0x11e   :  { %v830_v26 = vmul.f32 %v3753_v7, %v829_v62 }
 0x120   :  { %v831_v3 = vadd.f32 %v3753_v7, %v830_v26 }
 0x121   :  { %v3755_v58 = vpop.eup %3754 }
 0x122   :  { %v808_v44 = vmul.f32 %v3755_v58, %v806_v27  ;;  %vm813_vm3 = vweird.f32 %v3755_v58  ;;  %v835_v4 = vsel %vm834_vm9, %v3753_v7, %v831_v3  ;;  %v7059_v3 = vld [vmem:[#allocation39_spill] sm:$0xff] }
 0x123   :  { %vm814_vm7 = vmor %vm812_vm4, %vm813_vm3  ;;  %v840_v27 = vsel %vm837_vm10, %v839_v48, %v835_v4  ;;  %v7061_v48 = vld [vmem:[#allocation40_spill] sm:$0xff] }
 0x124   :  { %v809_v9 = vsub.f32 1.0, %v808_v44  ;;  %v845_v31 = vsub.f32 1.0, %v840_v27 }
 0x126   :  { %v810_v36 = vmul.f32 %v3755_v58, %v809_v9  ;;  %v7031_v9 = vld [vmem:[#allocation27_spill] sm:$0xff] }
 0x127   :  { %v334_v12 = vadd.f32 %v7031_v9, %v4866_v6  ;;  %v7064_v9 = vld [vmem:[#allocation43_spill] sm:$0xff] }
 0x128   :  { %v811_v42 = vadd.f32 %v3755_v58, %v810_v36  ;;  %v5021_v36 = vpop.f32.mrf.mxu1 }
 0x129   :  { %7032 = vst [vmem:[#allocation27_spill] sm:$0xff] %v5021_v36 }
 0x12a   :  { %v815_v59 = vsel %vm814_vm7, %v3755_v58, %v811_v42  ;;  %v853_v58 = vpop.permute.xlu0 %852  ;;  %v847_v42 = vmul.f32 0.0, %v840_v27 }
 0x12b   :  { %v820_v44 = vsel %vm817_vm8, %v819_v16, %v815_v59  ;;  %vm854_vm11 = vcmp.eq.s32.totalorder %v853_v58, 1  ;;  %v7062_v16 = vld [vmem:[#allocation18_spill] sm:$0xff]  ;;  %v7063_v59 = vld [vmem:[#allocation32_spill] sm:$0xff] }
 0x12c   :  { %v842_v62 = vmul.f32 %v820_v44, %v800_v19  ;;  %v278_v44 = vadd.f32 %v7063_v59, %v7062_v16 }
 0x12e   :  { %v843_v8 = vadd.f32 %v842_v62, %v334_v12 }
 0x130   :  { %3756 = vtanh.f32 %v843_v8  ;;  %v5023_v6 = vpop.f32.mrf.mxu1  ;;  %v5040_v8 = vld [vmem:[%s6908_s7 + $0x158] sm:$0xff] }
 0x131   :  { %7033 = vst [vmem:[#allocation47_spill] sm:$0xff] %v5023_v6 }
 0x136   :  { %v3757_v63 = vpop.eup %3756 }
 0x137   :  { %v846_v56 = vmul.f32 %v3757_v63, %v845_v31  ;;  %v307_v63 = vadd.f32 %v7060_v52, %v7059_v3 }
 0x139   :  { %v848_v28 = vadd.f32 %v847_v42, %v846_v56 }
 0x13b   :  { %3591 = vmatmul.msk.f32.vlgmr.msra.gmra.mxu3 %vm854_vm11, %v848_v28  ;;  %3592 = vmatmul.msk.f32.vlgmr.msrb.gmra.mxu0 %vm854_vm11, %v848_v28  ;;  %v5025_v19 = vsel %vm854_vm11, %v848_v28, 0.0 }
 0x13c   :  { %3593 = vmatmul.msk.f32.vlgmr.msrb.gmra.mxu1 %vm854_vm11, %v848_v28  ;;  %1142 = vmatpush.msra.mxu3 %v4540_v15 }
 0x13d   :  { %1222 = vmatpush.msrb.mxu0 %v4336_v20  ;;  %1242 = vmatpush.msrb.mxu1 %v5032_v14  ;;  %v5050_v20 = vpop.f32.mrf.mxu1 }
 0x13e   :  { %1143 = vmatpush.msra.mxu3 %v4564_v32  ;;  %7034 = vst [vmem:[#allocation48_spill] sm:$0xff] %v5050_v20 }
 0x13f   :  { %1223 = vmatpush.msrb.mxu0 %v4342_v21  ;;  %1243 = vmatpush.msrb.mxu1 %v5040_v8  ;;  %v7039_v21 = vld [vmem:[#allocation9_spill] sm:$0xff] }
 0x140   :  { %1144 = vmatpush.msra.mxu3 %v4569_v33 }
 0x141   :  { %1224 = vmatpush.msrb.mxu0 %v4348_v22  ;;  %1244 = vmatpush.msrb.mxu1 %v4300_v11  ;;  %v7040_v22 = vld [vmem:[#allocation11_spill] sm:$0xff] }
 0x142   :  { %1145 = vmatpush.msra.mxu3 %v4576_v37 }
 0x143   :  { %1225 = vmatpush.msrb.mxu0 %v4354_v23  ;;  %1245 = vmatpush.msrb.mxu1 %v4312_v13  ;;  %v7041_v23 = vld [vmem:[#allocation15_spill] sm:$0xff] }
 0x144   :  { %1146 = vmatpush.msra.mxu3 %v4585_v38 }
 0x145   :  { %1226 = vmatpush.msrb.mxu0 %v4361_v24  ;;  %1246 = vmatpush.msrb.mxu1 %v4324_v17  ;;  %v5067_v11 = vpop.f32.mrf.mxu1  ;;  %v7037_v17 = vld [vmem:[#allocation14_spill] sm:$0xff] }
 0x146   :  { %1147 = vmatpush.msra.mxu3 %v4594_v55  ;;  %7035 = vst [vmem:[#allocation49_spill] sm:$0xff] %v5067_v11  ;;  %v7042_v24 = vld [vmem:[#allocation10_spill] sm:$0xff] }
 0x147   :  { %1227 = vmatpush.msrb.mxu0 %v4389_v30  ;;  %1247 = vmatpush.msrb.mxu1 %v4330_v18 }
 0x148   :  { %1148 = vmatpush.msra.mxu3 %v4601_v43 }
 0x149   :  { %1228 = vmatpush.msrb.mxu0 %v4407_v35  ;;  %1248 = vmatpush.msrb.mxu1 %v4366_v25  ;;  %v7043_v25 = vld [vmem:[#allocation12_spill] sm:$0xff] }
 0x14a   :  { %1149 = vmatpush.msra.mxu3 %v4614_v46 }
 0x14b   :  { %1229 = vmatpush.msrb.mxu0 %v4425_v40  ;;  %1249 = vmatpush.msrb.mxu1 %v4384_v29  ;;  %v7044_v29 = vld [vmem:[#allocation19_spill] sm:$0xff] }
 0x14c   :  { %1150 = vmatpush.msra.mxu3 %v4622_v49  ;;  %v5094_v30 = vperm.slane %v7044_v29, 1 }
 0x14d   :  { %1230 = vmatpush.msrb.mxu0 %v4432_v41  ;;  %1250 = vmatpush.msrb.mxu1 %v4402_v34  ;;  %v5097_v34 = vperm.slane %v7044_v29, 2 }
 0x14e   :  { %1151 = vmatpush.msra.mxu3 %v4629_v54  ;;  %7045 = vst [vmem:[#allocation9_spill] sm:$0xff] %v5094_v30 }
 0x14f   :  { %1231 = vmatpush.msrb.mxu0 %v4445_v45  ;;  %1251 = vmatpush.msrb.mxu1 %v4420_v39  ;;  %7046 = vst [vmem:[#allocation11_spill] sm:$0xff] %v5097_v34 }
 0x150   :  { %1152 = vmatpush.msra.mxu3 %v4637_v57 }
 0x151   :  { %1232 = vmatpush.msrb.mxu0 %v4454_v47  ;;  %1252 = vmatpush.msrb.mxu1 %v4472_v53 }
 0x152   :  { %1153 = vmatpush.msra.mxu3 %v4644_v61 }
 0x153   :  { %1233 = vmatpush.msrb.mxu0 %v4460_v50  ;;  %1253 = vmatpush.msrb.mxu1 %v4487_v60 }
 0x154   :  { %1154 = vmatpush.msra.mxu3 %v4652_v0  ;;  %v5083_v13 = vpop.f32.mrf.mxu0 }
 0x155   :  { %1234 = vmatpush.msrb.mxu0 %v4467_v51  ;;  %1254 = vmatpush.msrb.mxu1 %v4505_v2  ;;  %7036 = vst [vmem:[#allocation50_spill] sm:$0xff] %v5083_v13 }
 0x156   :  { %1155 = vmatpush.msra.mxu3 %v4659_v1  ;;  %v5086_v18 = vpop.f32.mrf.mxu1 }
 0x157   :  { %1235 = vmatpush.msrb.mxu0 %v7025_v10  ;;  %1255 = vmatpush.msrb.mxu1 %v4517_v5  ;;  %7038 = vst [vmem:[#allocation14_spill] sm:$0xff] %v5086_v18 }
 0x158   :  { %1156 = vmatpush.msra.mxu3 %v7037_v17  ;;  %v7065_v17 = vld [vmem:[#allocation13_spill] sm:$0xff] }
 0x159   :  { %1236 = vmatpush.msrb.mxu0 %v7039_v21  ;;  %1256 = vmatpush.msrb.mxu1 %v7040_v22  ;;  %vm1089_vm12 = vcmp.gt.s32.totalorder %v7065_v17, 2  ;;  %v7066_v21 = vmov 0   ;;  %vm1209_vm13 = vcmp.gt.s32.totalorder %v7065_v17, 3  ;;  %vm1689_vm1 = vcmp.gt.s32.totalorder %v7065_v17, 7 }
 0x15a   :  { %1157 = vmatpush.msra.mxu3 %v7041_v23  ;;  %v1090_v22 = vsel %vm1089_vm12, 1, %v7066_v21 }
 0x15b   :  { %1237 = vmatpush.msrb.mxu0 %v7042_v24  ;;  %1257 = vmatpush.msrb.mxu1 %v7043_v25 }
 0x15c   :  { %v613_v35 = vpop.f32.mrf.mxu0  ;;  %1092 = vperm.xlu1 %3743, %v1090_v22   ;;  %v5161_v22 = vld [vmem:[%s6908_s7 + $0x178] sm:$0xff] }
 0x15d   :  { %v5100_v39 = vadd.f32 %v613_v35, %v5094_v30 }
 0x15e   :  { %v641_v40 = vpop.f32.mrf.mxu1 }
 0x15f   :  { %7047 = vst [vmem:[#allocation15_spill] sm:$0xff] %v5100_v39  ;;  %v5103_v41 = vadd.f32 %v641_v40, %v5097_v34  ;;  %v1210_v40 = vsel %vm1209_vm13, 1, %v7066_v21 }
 0x161   :  { %7048 = vst [vmem:[#allocation10_spill] sm:$0xff] %v5103_v41  ;;  %v5433_v41 = vld [vmem:[%s6908_s7 + $0x8] sm:$0xff] }
 0x162   :  { %7076 = vst [vmem:[#allocation61_spill] sm:$0xff] %v5433_v41 }
 0x164   :  { %v5105_v45 = vpop.f32.mrf.mxu0  ;;  %1212 = vperm.xlu1 %3743, %v1210_v40   ;;  %v5205_v40 = vld [vmem:[%s6908_s7 + $0x130] sm:$0xff] }
 0x165   :  { %7049 = vst [vmem:[#allocation12_spill] sm:$0xff] %v5105_v45  ;;  %v5427_v45 = vld [vmem:[%s6908_s7] sm:$0xff] }
 0x166   :  { %v644_v47 = vpop.f32.mrf.mxu1  ;;  %7075 = vst [vmem:[#allocation60_spill] sm:$0xff] %v5427_v45 }
 0x167   :  { %v5108_v50 = vadd.f32 %v644_v47, %v5097_v34 }
 0x169   :  { %7050 = vst [vmem:[#allocation19_spill] sm:$0xff] %v5108_v50  ;;  %v5421_v50 = vld [vmem:[%s6908_s7 + $0x10] sm:$0xff] }
 0x16a   :  { %7074 = vst [vmem:[#allocation59_spill] sm:$0xff] %v5421_v50 }
 0x16c   :  { %v618_v51 = vpop.f32.mrf.mxu0 }
 0x16d   :  { %v5111_v53 = vadd.f32 %v618_v51, %v5094_v30 }
 0x16e   :  { %v646_v60 = vpop.f32.mrf.mxu1 }
 0x16f   :  { %7051 = vst [vmem:[#allocation51_spill] sm:$0xff] %v5111_v53  ;;  %v5114_v2 = vadd.f32 %v646_v60, %v5097_v34  ;;  %v5415_v53 = vld [vmem:[%s6908_s7 + $0x20] sm:$0xff] }
 0x171   :  { %7052 = vst [vmem:[#allocation52_spill] sm:$0xff] %v5114_v2  ;;  %v5409_v2 = vld [vmem:[%s6908_s7 + $0x18] sm:$0xff] }
 0x174   :  { %v621_v5 = vpop.f32.mrf.mxu0 }
 0x175   :  { %v5117_v15 = vadd.f32 %v621_v5, %v5094_v30 }
 0x176   :  { %v649_v32 = vpop.f32.mrf.mxu1 }
 0x177   :  { %7053 = vst [vmem:[#allocation53_spill] sm:$0xff] %v5117_v15  ;;  %v5120_v33 = vadd.f32 %v649_v32, %v5097_v34  ;;  %v5403_v15 = vld [vmem:[%s6908_s7 + $0x28] sm:$0xff] }
 0x178   :  { %7071 = vst [vmem:[#allocation13_spill] sm:$0xff] %v5403_v15 }
 0x179   :  { %7054 = vst [vmem:[#allocation54_spill] sm:$0xff] %v5120_v33  ;;  %v5397_v33 = vld [vmem:[%s6908_s7 + $0x38] sm:$0xff] }
 0x17a   :  { %7070 = vst [vmem:[#allocation32_spill] sm:$0xff] %v5397_v33 }
 0x17c   :  { %v623_v37 = vpop.f32.mrf.mxu0 }
 0x17d   :  { %v5123_v38 = vadd.f32 %v623_v37, %v5094_v30 }
 0x17e   :  { %v651_v55 = vpop.f32.mrf.mxu1 }
 0x17f   :  { %7055 = vst [vmem:[#allocation55_spill] sm:$0xff] %v5123_v38  ;;  %v5126_v43 = vadd.f32 %v651_v55, %v5097_v34  ;;  %v5391_v38 = vld [vmem:[%s6908_s7 + $0x30] sm:$0xff] }
 0x180   :  { %7069 = vst [vmem:[#allocation44_spill] sm:$0xff] %v5391_v38 }
 0x181   :  { %7056 = vst [vmem:[#allocation56_spill] sm:$0xff] %v5126_v43  ;;  %v5385_v43 = vld [vmem:[%s6908_s7 + $0x40] sm:$0xff] }
 0x184   :  { %v626_v46 = vpop.f32.mrf.mxu0 }
 0x185   :  { %v5129_v49 = vadd.f32 %v626_v46, %v5094_v30  ;;  %v7067_v46 = vld [vmem:[#allocation45_spill] sm:$0xff]  ;;  %v7078_v30 = vld [vmem:[#allocation8_spill] sm:$0xff] }
 0x186   :  { %v654_v54 = vpop.f32.mrf.mxu1  ;;  %7072 = vst [vmem:[#allocation45_spill] sm:$0xff] %v5409_v2  ;;  %v310_v11 = vadd.f32 %v7078_v30, %v7059_v3 }
 0x187   :  { %7057 = vst [vmem:[#allocation57_spill] sm:$0xff] %v5129_v49  ;;  %v5132_v57 = vadd.f32 %v654_v54, %v5097_v34  ;;  %v5379_v49 = vld [vmem:[%s6908_s7 + $0x50] sm:$0xff]  ;;  %v7077_v34 = vld [vmem:[#allocation35_spill] sm:$0xff] }
 0x188   :  { %v281_v13 = vadd.f32 %v7077_v34, %v7062_v16 }
 0x189   :  { %7058 = vst [vmem:[#allocation58_spill] sm:$0xff] %v5132_v57  ;;  %v5373_v57 = vld [vmem:[%s6908_s7 + $0x48] sm:$0xff] }
 0x18c   :  { %v628_v61 = vpop.f32.mrf.mxu0 }
 0x18e   :  { %v656_v0 = vpop.f32.mrf.mxu1 }
 0x1b8   :  { %v899_v1 = vpop.f32.mrf.mxu0 }
 0x1b9   :  { %v900_v10 = vadd.f32 %v899_v1, %v7061_v48  ;;  %v919_v5 = vpop.f32.mrf.mxu1 }
 0x1ba   :  { %v920_v54 = vadd.f32 %v919_v5, %v7067_v46  ;;  %v5229_v5 = vld [vmem:[%s6908_s7 + $0x108] sm:$0xff] }
 0x1bb   :  { %v942_v12 = vadd.f32 %v900_v10, %v307_v63  ;;  %v1690_v10 = vsel %vm1689_vm1, 1, %v7066_v21 }
 0x1bc   :  { %1692 = vperm.xlu1 %3743, %v1690_v10   ;;  %v5289_v10 = vld [vmem:[%s6908_s7 + $0xc8] sm:$0xff] }
 0x1bd   :  { %v3595_v7 = vmul.f32 -1.442695, %v942_v12 }
 0x1be   :  { %v879_v26 = vpop.f32.mrf.mxu3 }
 0x1bf   :  { %3758 = vpow2.f32 %v3595_v7  ;;  %v880_v62 = vadd.f32 %v879_v26, %v7064_v9  ;;  %v7068_v7 = vld [vmem:[#allocation29_spill] sm:$0xff] }
 0x1c0   :  { %7073 = vst [vmem:[#allocation29_spill] sm:$0xff] %v5415_v53 }
 0x1c1   :  { %v922_v4 = vadd.f32 %v880_v62, %v278_v44 }
 0x1c3   :  { %v3594_v27 = vmul.f32 -1.442695, %v922_v4  ;;  %v3113_v4 = vld [vmem:[%s6995_s30 + $0x10] sm:$0xff] }
 0x1c4   :  { %3197 = vperm.xlu1 %3743, %v3113_v4   ;;  %v5331_v4 = vld [vmem:[%s6908_s7 + $0x88] sm:$0xff] }
 0x1c5   :  { %v3759_v31 = vpop.eup %3758  ;;  %3760 = vpow2.f32 %v3594_v27 }
 0x1c6   :  { %v946_v58 = vadd.f32 1.0, %v3759_v31 }
 0x1c8   :  { %3762 = vrcp.f32 %v946_v58  ;;  %v958_v63 = vand.u32 2147483648, %v946_v58  ;;  %vm952_vm4 = vweird.f32 %v946_v58  ;;  %v956_v12 = vand.u32 2147483647, %v946_v58 }
 0x1ca   :  { %v959_v44 = vor.u32 1.1754944e-38, %v958_v63  ;;  %vm957_vm6 = vcmp.eq.f32.partialorder %v956_v12, 8.507059e+37  ;;  %v5283_v63 = vld [vmem:[%s6908_s7 + $0xc0] sm:$0xff]  ;;  %v5295_v12 = vld [vmem:[%s6908_s7 + $0xb8] sm:$0xff] }
 0x1cb   :  { %v3761_v56 = vpop.eup %3760 }
 0x1cc   :  { %v926_v42 = vadd.f32 1.0, %v3761_v56 }
 0x1ce   :  { %3764 = vrcp.f32 %v926_v42  ;;  %v3763_v28 = vpop.eup %3762  ;;  %v938_v47 = vand.u32 2147483648, %v926_v42  ;;  %v936_v60 = vand.u32 2147483647, %v926_v42  ;;  %vm932_vm15 = vweird.f32 %v926_v42 }
 0x1cf   :  { %v948_v23 = vmul.f32 %v3763_v28, %v946_v58  ;;  %vm953_vm3 = vweird.f32 %v3763_v28  ;;  %v973_v58 = vpop.permute.xlu0 %972 }
 0x1d0   :  { %v939_v55 = vor.u32 1.1754944e-38, %v938_v47  ;;  %vm937_vm2 = vcmp.eq.f32.partialorder %v936_v60, 8.507059e+37  ;;  %vm954_vm5 = vmor %vm952_vm4, %vm953_vm3  ;;  %vm974_vm7 = vcmp.eq.s32.totalorder %v973_v58, 1  ;;  %v5211_v47 = vld [vmem:[%s6908_s7 + $0x120] sm:$0xff]  ;;  %v5223_v60 = vld [vmem:[%s6908_s7 + $0x118] sm:$0xff] }
 0x1d1   :  { %v949_v29 = vsub.f32 1.0, %v948_v23  ;;  %v5167_v23 = vld [vmem:[%s6908_s7 + $0x168] sm:$0xff] }
 0x1d2   :  { %v5361_v58 = vld [vmem:[%s6908_s7 + $0x68] sm:$0xff] }
 0x1d3   :  { %v950_v32 = vmul.f32 %v3763_v28, %v949_v29  ;;  %v5193_v29 = vld [vmem:[%s6908_s7 + $0x138] sm:$0xff] }
 0x1d4   :  { %v3765_v24 = vpop.eup %3764 }
 0x1d5   :  { %v928_v25 = vmul.f32 %v3765_v24, %v926_v42  ;;  %vm933_vm14 = vweird.f32 %v3765_v24  ;;  %v951_v1 = vadd.f32 %v3763_v28, %v950_v32  ;;  %v5235_v32 = vld [vmem:[%s6908_s7 + $0x110] sm:$0xff] }
 0x1d6   :  { %vm934_vm0 = vmor %vm932_vm15, %vm933_vm14 }
 0x1d7   :  { %v929_v35 = vsub.f32 1.0, %v928_v25  ;;  %v955_v59 = vsel %vm954_vm5, %v3763_v28, %v951_v1  ;;  %v5187_v25 = vld [vmem:[%s6908_s7 + $0x148] sm:$0xff]  ;;  %v5271_v1 = vld [vmem:[%s6908_s7 + $0xe0] sm:$0xff] }
 0x1d8   :  { %v960_v62 = vsel %vm957_vm6, %v959_v44, %v955_v59  ;;  %v5313_v59 = vld [vmem:[%s6908_s7 + $0xa0] sm:$0xff]  ;;  %v5319_v44 = vld [vmem:[%s6908_s7 + $0x90] sm:$0xff] }
 0x1d9   :  { %v930_v51 = vmul.f32 %v3765_v24, %v929_v35  ;;  %v965_v27 = vsub.f32 1.0, %v960_v62  ;;  %v967_v42 = vmul.f32 %v960_v62, %v5025_v19  ;;  %v5199_v35 = vld [vmem:[%s6908_s7 + $0x140] sm:$0xff]  ;;  %v5325_v62 = vld [vmem:[%s6908_s7 + $0x98] sm:$0xff] }
 0x1db   :  { %v931_v37 = vadd.f32 %v3765_v24, %v930_v51  ;;  %v5217_v51 = vld [vmem:[%s6908_s7 + $0x128] sm:$0xff] }
 0x1dd   :  { %v935_v61 = vsel %vm934_vm0, %v3765_v24, %v931_v37  ;;  %v5180_v24 = vld [vmem:[%s6908_s7 + $0x150] sm:$0xff]  ;;  %v5241_v37 = vld [vmem:[%s6908_s7 + $0x100] sm:$0xff] }
 0x1de   :  { %v940_v0 = vsel %vm937_vm2, %v939_v55, %v935_v61  ;;  %v5247_v55 = vld [vmem:[%s6908_s7 + $0xf0] sm:$0xff]  ;;  %v5259_v61 = vld [vmem:[%s6908_s7 + $0xe8] sm:$0xff] }
 0x1df   :  { %v962_v52 = vmul.f32 %v940_v0, %v920_v54  ;;  %v5253_v54 = vld [vmem:[%s6908_s7 + $0xf8] sm:$0xff] }
 0x1e0   :  { %v5265_v0 = vld [vmem:[%s6908_s7 + $0xd8] sm:$0xff] }
 0x1e1   :  { %v963_v26 = vadd.f32 %v962_v52, %v7068_v7  ;;  %v5277_v52 = vld [vmem:[%s6908_s7 + $0xd0] sm:$0xff]  ;;  %v5301_v7 = vld [vmem:[%s6908_s7 + $0xa8] sm:$0xff] }
 0x1e3   :  { %3766 = vtanh.f32 %v963_v26  ;;  %v5307_v26 = vld [vmem:[%s6908_s7 + $0xb0] sm:$0xff] }
 0x1e9   :  { %v3767_v31 = vpop.eup %3766 }
 0x1ea   :  { %v966_v56 = vmul.f32 %v3767_v31, %v965_v27  ;;  %v5337_v27 = vld [vmem:[%s6908_s7 + $0x78] sm:$0xff]  ;;  %v5343_v31 = vld [vmem:[%s6908_s7 + $0x80] sm:$0xff] }
 0x1ec   :  { %v968_v17 = vadd.f32 %v967_v42, %v966_v56  ;;  %v5349_v56 = vld [vmem:[%s6908_s7 + $0x70] sm:$0xff]  ;;  %v5355_v42 = vld [vmem:[%s6908_s7 + $0x60] sm:$0xff] }
 0x1ee   :  { %v5153_v28 = vsel %vm974_vm7, %v968_v17, %v5025_v19  ;;  %v5174_v19 = vld [vmem:[%s6908_s7 + $0x160] sm:$0xff]  ;;  %v5367_v17 = vld [vmem:[%s6908_s7 + $0x58] sm:$0xff] }
 0x1ef   :  { %998 = vmatmul.f32.vlgmr.msra.gmra.mxu2 %v5153_v28  ;;  %1018 = vmatmul.f32.vlgmr.msrb.gmra.mxu3 %v5153_v28 }
 0x1f0   :  { %1038 = vmatmul.f32.vlgmr.msra.gmra.mxu0 %v5153_v28  ;;  %1262 = vmatpush.msra.mxu2 %v5161_v22 }
 0x1f1   :  { %1342 = vmatpush.msrb.mxu3 %v5167_v23  ;;  %1362 = vmatpush.msra.mxu0 %v5032_v14 }
 0x1f2   :  { %1263 = vmatpush.msra.mxu2 %v5174_v19 }
 0x1f3   :  { %1343 = vmatpush.msrb.mxu3 %v5180_v24  ;;  %1363 = vmatpush.msra.mxu0 %v5040_v8 }
 0x1f4   :  { %1264 = vmatpush.msra.mxu2 %v5187_v25 }
 0x1f5   :  { %1344 = vmatpush.msrb.mxu3 %v5193_v29  ;;  %1364 = vmatpush.msra.mxu0 %v5199_v35 }
 0x1f6   :  { %1265 = vmatpush.msra.mxu2 %v5205_v40 }
 0x1f7   :  { %1345 = vmatpush.msrb.mxu3 %v5211_v47  ;;  %1365 = vmatpush.msra.mxu0 %v5217_v51 }
 0x1f8   :  { %1266 = vmatpush.msra.mxu2 %v5223_v60 }
 0x1f9   :  { %1346 = vmatpush.msrb.mxu3 %v5229_v5  ;;  %1366 = vmatpush.msra.mxu0 %v5235_v32 }
 0x1fa   :  { %1267 = vmatpush.msra.mxu2 %v5241_v37 }
 0x1fb   :  { %1347 = vmatpush.msrb.mxu3 %v5247_v55  ;;  %1367 = vmatpush.msra.mxu0 %v5253_v54 }
 0x1fc   :  { %1268 = vmatpush.msra.mxu2 %v5259_v61 }
 0x1fd   :  { %1348 = vmatpush.msrb.mxu3 %v5265_v0  ;;  %1368 = vmatpush.msra.mxu0 %v5271_v1 }
 0x1fe   :  { %1269 = vmatpush.msra.mxu2 %v5277_v52 }
 0x1ff   :  { %1349 = vmatpush.msrb.mxu3 %v5283_v63  ;;  %1369 = vmatpush.msra.mxu0 %v5289_v10 }
 0x200   :  { %1270 = vmatpush.msra.mxu2 %v5295_v12 }
 0x201   :  { %1350 = vmatpush.msrb.mxu3 %v5301_v7  ;;  %1370 = vmatpush.msra.mxu0 %v5307_v26 }
 0x202   :  { %1271 = vmatpush.msra.mxu2 %v5313_v59 }
 0x203   :  { %1351 = vmatpush.msrb.mxu3 %v5319_v44  ;;  %1371 = vmatpush.msra.mxu0 %v5325_v62 }
 0x204   :  { %1272 = vmatpush.msra.mxu2 %v5331_v4 }
 0x205   :  { %1352 = vmatpush.msrb.mxu3 %v5337_v27  ;;  %1372 = vmatpush.msra.mxu0 %v5343_v31 }
 0x206   :  { %1273 = vmatpush.msra.mxu2 %v5349_v56 }
 0x207   :  { %1353 = vmatpush.msrb.mxu3 %v5355_v42  ;;  %1373 = vmatpush.msra.mxu0 %v5361_v58 }
 0x208   :  { %1274 = vmatpush.msra.mxu2 %v5367_v17 }
 0x209   :  { %1354 = vmatpush.msrb.mxu3 %v5373_v57  ;;  %1374 = vmatpush.msra.mxu0 %v5379_v49 }
 0x20a   :  { %1275 = vmatpush.msra.mxu2 %v5385_v43 }
 0x20b   :  { %1355 = vmatpush.msrb.mxu3 %v5391_v38  ;;  %1375 = vmatpush.msra.mxu0 %v5397_v33 }
 0x20c   :  { %1276 = vmatpush.msra.mxu2 %v5403_v15 }
 0x20d   :  { %1356 = vmatpush.msrb.mxu3 %v5409_v2  ;;  %1376 = vmatpush.msra.mxu0 %v5415_v53 }
 0x20e   :  { %1277 = vmatpush.msra.mxu2 %v5421_v50 }
 0x20f   :  { %1357 = vmatpush.msrb.mxu3 %v5427_v45  ;;  %1377 = vmatpush.msra.mxu0 %v5433_v41 }
 0x272   :  { %v999_v39 = vpop.f32.mrf.mxu2  ;;  %v1019_v18 = vpop.f32.mrf.mxu3 }
 0x273   :  { %v1000_v20 = vadd.f32 %v999_v39, %v7064_v9  ;;  %v1020_v6 = vadd.f32 %v1019_v18, %v7061_v48 }
 0x275   :  { %v1042_v36 = vadd.f32 %v1000_v20, %v281_v13  ;;  %v1062_v21 = vadd.f32 %v1020_v6, %v310_v11 }
 0x277   :  { %v3596_v45 = vmul.f32 -1.442695, %v1042_v36  ;;  %v3597_v50 = vmul.f32 -1.442695, %v1062_v21  ;;  %v1039_v36 = vpop.f32.mrf.mxu0 }
 0x279   :  { %3768 = vpow2.f32 %v3596_v45 }
 0x27a   :  { %3770 = vpow2.f32 %v3597_v50 }
 0x27f   :  { %v3769_v53 = vpop.eup %3768 }
 0x280   :  { %v3771_v41 = vpop.eup %3770  ;;  %v1046_v2 = vadd.f32 1.0, %v3769_v53 }
 0x281   :  { %v1066_v15 = vadd.f32 1.0, %v3771_v41  ;;  %v1040_v41 = vadd.f32 %v1039_v36, %v7067_v46  ;;  %v1093_v36 = vpop.permute.xlu1 %1092 }
 0x282   :  { %3772 = vrcp.f32 %v1046_v2  ;;  %v1058_v39 = vand.u32 2147483648, %v1046_v2  ;;  %v1056_v6 = vand.u32 2147483647, %v1046_v2  ;;  %vm1052_vm9 = vweird.f32 %v1046_v2 }
 0x283   :  { %3774 = vrcp.f32 %v1066_v15  ;;  %v1078_v21 = vand.u32 2147483648, %v1066_v15  ;;  %vm1072_vm13 = vweird.f32 %v1066_v15  ;;  %vm1094_vm0 = vcmp.eq.s32.totalorder %v1093_v36, 1  ;;  %v7092_v36 = vld [vmem:[#allocation46_spill] sm:$0xff] }
 0x284   :  { %v1059_v13 = vor.u32 1.1754944e-38, %v1058_v39  ;;  %vm1057_vm11 = vcmp.eq.f32.partialorder %v1056_v6, 8.507059e+37 }
 0x288   :  { %v3773_v34 = vpop.eup %3772 }
 0x289   :  { %v3775_v16 = vpop.eup %3774  ;;  %v1048_v33 = vmul.f32 %v3773_v34, %v1046_v2  ;;  %vm1053_vm8 = vweird.f32 %v3773_v34 }
 0x28a   :  { %v1068_v30 = vmul.f32 %v3775_v16, %v1066_v15  ;;  %vm1054_vm10 = vmor %vm1052_vm9, %vm1053_vm8  ;;  %vm1073_vm12 = vweird.f32 %v3775_v16 }
 0x28b   :  { %v1049_v3 = vsub.f32 1.0, %v1048_v33  ;;  %vm1074_vm14 = vmor %vm1072_vm13, %vm1073_vm12 }
 0x28c   :  { %v1069_v9 = vsub.f32 1.0, %v1068_v30  ;;  %v1076_v30 = vand.u32 2147483647, %v1066_v15  ;;  %v7080_v15 = vld [vmem:[#allocation44_spill] sm:$0xff] }
 0x28d   :  { %v1050_v18 = vmul.f32 %v3773_v34, %v1049_v3  ;;  %v7079_v3 = vld [vmem:[#allocation31_spill] sm:$0xff] }
 0x28e   :  { %v1070_v20 = vmul.f32 %v3775_v16, %v1069_v9  ;;  %v1079_v9 = vor.u32 1.1754944e-38, %v1078_v21  ;;  %vm1077_vm15 = vcmp.eq.f32.partialorder %v1076_v30, 8.507059e+37  ;;  %v7089_v21 = vld [vmem:[#allocation37_spill] sm:$0xff]  ;;  %v7090_v30 = vld [vmem:[#allocation43_spill] sm:$0xff] }
 0x28f   :  { %v1051_v11 = vadd.f32 %v3773_v34, %v1050_v18 }
 0x290   :  { %v1071_v53 = vadd.f32 %v3775_v16, %v1070_v20 }
 0x291   :  { %v1055_v45 = vsel %vm1054_vm10, %v3773_v34, %v1051_v11 }
 0x292   :  { %v1060_v50 = vsel %vm1057_vm11, %v1059_v13, %v1055_v45  ;;  %v1075_v38 = vsel %vm1074_vm14, %v3775_v16, %v1071_v53  ;;  %v7083_v16 = vld [vmem:[#allocation45_spill] sm:$0xff]  ;;  %v7085_v13 = vld [vmem:[#allocation59_spill] sm:$0xff]  ;;  %v7088_v53 = vld [vmem:[#allocation18_spill] sm:$0xff] }
 0x293   :  { %v1082_v33 = vmul.f32 %v1060_v50, %v1040_v41  ;;  %v1080_v2 = vsel %vm1077_vm15, %v1079_v9, %v1075_v38  ;;  %v7081_v38 = vld [vmem:[#allocation32_spill] sm:$0xff]  ;;  %v7087_v45 = vld [vmem:[#allocation61_spill] sm:$0xff] }
 0x294   :  { %v1085_v39 = vsub.f32 1.0, %v1080_v2  ;;  %v1087_v6 = vmul.f32 %v1080_v2, %v5153_v28  ;;  %v7086_v41 = vld [vmem:[#allocation60_spill] sm:$0xff] }
 0x295   :  { %v1083_v48 = vadd.f32 %v1082_v33, %v7079_v3  ;;  %v283_v33 = vadd.f32 %v7089_v21, %v7088_v53  ;;  %v3978_v21 = vld [vmem:[%s6991_s26] sm:$0xff] }
 0x296   :  { %vm1329_vm1 = vcmp.gt.s32.totalorder %v3978_v21, 4  ;;  %vm1449_vm2 = vcmp.gt.s32.totalorder %v3978_v21, 5 }
 0x297   :  { %3776 = vtanh.f32 %v1083_v48  ;;  %v7082_v48 = vld [vmem:[#allocation13_spill] sm:$0xff] }
 0x29d   :  { %v3777_v18 = vpop.eup %3776 }
 0x29e   :  { %v1086_v34 = vmul.f32 %v3777_v18, %v1085_v39  ;;  %v7091_v18 = vld [vmem:[#allocation39_spill] sm:$0xff] }
 0x2a0   :  { %v1088_v20 = vadd.f32 %v1087_v6, %v1086_v34  ;;  %v312_v34 = vadd.f32 %v7092_v36, %v7091_v18  ;;  %v7093_v6 = vld [vmem:[#allocation40_spill] sm:$0xff] }
 0x2a2   :  { %v5446_v11 = vsel %vm1094_vm0, %v1088_v20, %v5153_v28  ;;  %v7084_v28 = vld [vmem:[#allocation29_spill] sm:$0xff] }
 0x2a3   :  { %1118 = vmatmul.f32.vlgmr.msra.gmra.mxu1 %v5446_v11  ;;  %1138 = vmatmul.f32.vlgmr.msrb.gmra.mxu2 %v5446_v11 }
 0x2a4   :  { %1158 = vmatmul.f32.vlgmr.msra.gmra.mxu3 %v5446_v11  ;;  %1382 = vmatpush.msra.mxu1 %v5161_v22 }
 0x2a5   :  { %1462 = vmatpush.msrb.mxu2 %v5167_v23  ;;  %1482 = vmatpush.msra.mxu3 %v5032_v14 }
 0x2a6   :  { %1383 = vmatpush.msra.mxu1 %v5174_v19 }
 0x2a7   :  { %1463 = vmatpush.msrb.mxu2 %v5180_v24  ;;  %1483 = vmatpush.msra.mxu3 %v5040_v8 }
 0x2a8   :  { %1384 = vmatpush.msra.mxu1 %v5187_v25 }
 0x2a9   :  { %1464 = vmatpush.msrb.mxu2 %v5193_v29  ;;  %1484 = vmatpush.msra.mxu3 %v5199_v35 }
 0x2aa   :  { %1385 = vmatpush.msra.mxu1 %v5205_v40 }
 0x2ab   :  { %1465 = vmatpush.msrb.mxu2 %v5211_v47  ;;  %1485 = vmatpush.msra.mxu3 %v5217_v51 }
 0x2ac   :  { %1386 = vmatpush.msra.mxu1 %v5223_v60 }
 0x2ad   :  { %1466 = vmatpush.msrb.mxu2 %v5229_v5  ;;  %1486 = vmatpush.msra.mxu3 %v5235_v32 }
 0x2ae   :  { %1387 = vmatpush.msra.mxu1 %v5241_v37 }
 0x2af   :  { %1467 = vmatpush.msrb.mxu2 %v5247_v55  ;;  %1487 = vmatpush.msra.mxu3 %v5253_v54 }
 0x2b0   :  { %1388 = vmatpush.msra.mxu1 %v5259_v61 }
 0x2b1   :  { %1468 = vmatpush.msrb.mxu2 %v5265_v0  ;;  %1488 = vmatpush.msra.mxu3 %v5271_v1 }
 0x2b2   :  { %1389 = vmatpush.msra.mxu1 %v5277_v52 }
 0x2b3   :  { %1469 = vmatpush.msrb.mxu2 %v5283_v63  ;;  %1489 = vmatpush.msra.mxu3 %v5289_v10 }
 0x2b4   :  { %1390 = vmatpush.msra.mxu1 %v5295_v12 }
 0x2b5   :  { %1470 = vmatpush.msrb.mxu2 %v5301_v7  ;;  %1490 = vmatpush.msra.mxu3 %v5307_v26 }
 0x2b6   :  { %1391 = vmatpush.msra.mxu1 %v5313_v59 }
 0x2b7   :  { %1471 = vmatpush.msrb.mxu2 %v5319_v44  ;;  %1491 = vmatpush.msra.mxu3 %v5325_v62 }
 0x2b8   :  { %1392 = vmatpush.msra.mxu1 %v5331_v4 }
 0x2b9   :  { %1472 = vmatpush.msrb.mxu2 %v5337_v27  ;;  %1492 = vmatpush.msra.mxu3 %v5343_v31 }
 0x2ba   :  { %1393 = vmatpush.msra.mxu1 %v5349_v56 }
 0x2bb   :  { %1473 = vmatpush.msrb.mxu2 %v5355_v42  ;;  %1493 = vmatpush.msra.mxu3 %v5361_v58 }
 0x2bc   :  { %1394 = vmatpush.msra.mxu1 %v5367_v17 }
 0x2bd   :  { %1474 = vmatpush.msrb.mxu2 %v5373_v57  ;;  %1494 = vmatpush.msra.mxu3 %v5379_v49 }
 0x2be   :  { %1395 = vmatpush.msra.mxu1 %v5385_v43 }
 0x2bf   :  { %1475 = vmatpush.msrb.mxu2 %v7080_v15  ;;  %1495 = vmatpush.msra.mxu3 %v7081_v38 }
 0x2c0   :  { %1396 = vmatpush.msra.mxu1 %v7082_v48  ;;  %v3111_v48 = vld [vmem:[%s6995_s30] sm:$0xff] }
 0x2c1   :  { %1476 = vmatpush.msrb.mxu2 %v7083_v16  ;;  %1496 = vmatpush.msra.mxu3 %v7084_v28 }
 0x2c2   :  { %1397 = vmatpush.msra.mxu1 %v7085_v13 }
 0x2c3   :  { %1477 = vmatpush.msrb.mxu2 %v7086_v41  ;;  %1497 = vmatpush.msra.mxu3 %v7087_v45 }
 0x320   :  { %v1119_v50 = vpop.f32.mrf.mxu1 }
 0x321   :  { %v1120_v3 = vadd.f32 %v1119_v50, %v7090_v30 }
 0x323   :  { %v1162_v9 = vadd.f32 %v1120_v3, %v283_v33  ;;  %v7094_v33 = vmov 0  }
 0x324   :  { %v1330_v3 = vsel %vm1329_vm1, 1, %v7094_v33 }
 0x325   :  { %v3598_v2 = vmul.f32 -1.442695, %v1162_v9  ;;  %1332 = vperm.xlu2 %3744, %v1330_v3  }
 0x326   :  { %v1139_v39 = vpop.f32.mrf.mxu2 }
 0x327   :  { %3778 = vpow2.f32 %v3598_v2  ;;  %v1140_v20 = vadd.f32 %v1139_v39, %v7093_v6  ;;  %v1159_v6 = vpop.f32.mrf.mxu3 }
 0x328   :  { %v1160_v53 = vadd.f32 %v1159_v6, %v7067_v46 }
 0x329   :  { %v1182_v13 = vadd.f32 %v1140_v20, %v312_v34 }
 0x32b   :  { %v3599_v28 = vmul.f32 -1.442695, %v1182_v13  ;;  %v1450_v13 = vsel %vm1449_vm2, 1, %v7094_v33 }
 0x32d   :  { %v3779_v41 = vpop.eup %3778  ;;  %3780 = vpow2.f32 %v3599_v28  ;;  %1452 = vperm.xlu2 %3744, %v1450_v13  }
 0x32e   :  { %v1166_v45 = vadd.f32 1.0, %v3779_v41 }
 0x330   :  { %3782 = vrcp.f32 %v1166_v45  ;;  %v1178_v28 = vand.u32 2147483648, %v1166_v45  ;;  %v1176_v34 = vand.u32 2147483647, %v1166_v45  ;;  %vm1172_vm4 = vweird.f32 %v1166_v45 }
 0x332   :  { %vm1177_vm6 = vcmp.eq.f32.partialorder %v1176_v34, 8.507059e+37 }
 0x333   :  { %v3781_v50 = vpop.eup %3780 }
 0x334   :  { %v1186_v9 = vadd.f32 1.0, %v3781_v50  ;;  %v1179_v50 = vor.u32 1.1754944e-38, %v1178_v28 }
 0x335   :  { %3191 = vperm.xlu2 %3744, %v3111_v48  }
 0x336   :  { %v3783_v36 = vpop.eup %3782  ;;  %3784 = vrcp.f32 %v1186_v9  ;;  %v1198_v33 = vand.u32 2147483648, %v1186_v9  ;;  %v1196_v13 = vand.u32 2147483647, %v1186_v9  ;;  %vm1192_vm8 = vweird.f32 %v1186_v9 }
 0x337   :  { %v1168_v2 = vmul.f32 %v3783_v36, %v1166_v45  ;;  %vm1173_vm3 = vweird.f32 %v3783_v36  ;;  %v7095_v45 = vld [vmem:[#allocation34_spill] sm:$0xff] }
 0x338   :  { %vm1174_vm5 = vmor %vm1172_vm4, %vm1173_vm3  ;;  %vm1197_vm10 = vcmp.eq.f32.partialorder %v1196_v13, 8.507059e+37 }
 0x339   :  { %v1169_v39 = vsub.f32 1.0, %v1168_v2 }
 0x33b   :  { %v1170_v41 = vmul.f32 %v3783_v36, %v1169_v39 }
 0x33c   :  { %v3785_v20 = vpop.eup %3784 }
 0x33d   :  { %v1188_v30 = vmul.f32 %v3785_v20, %v1186_v9  ;;  %v1171_v18 = vadd.f32 %v3783_v36, %v1170_v41  ;;  %vm1193_vm7 = vweird.f32 %v3785_v20 }
 0x33e   :  { %vm1194_vm9 = vmor %vm1192_vm8, %vm1193_vm7 }
 0x33f   :  { %v1189_v3 = vsub.f32 1.0, %v1188_v30  ;;  %v1175_v21 = vsel %vm1174_vm5, %v3783_v36, %v1171_v18  ;;  %v1199_v30 = vor.u32 1.1754944e-38, %v1198_v33 }
 0x340   :  { %v1180_v2 = vsel %vm1177_vm6, %v1179_v50, %v1175_v21  ;;  %v1213_v50 = vpop.permute.xlu1 %1212 }
 0x341   :  { %v1190_v16 = vmul.f32 %v3785_v20, %v1189_v3  ;;  %v1202_v39 = vmul.f32 %v1180_v2, %v1160_v53  ;;  %vm1214_vm11 = vcmp.eq.s32.totalorder %v1213_v50, 1 }
 0x343   :  { %v1191_v41 = vadd.f32 %v3785_v20, %v1190_v16  ;;  %v1203_v38 = vadd.f32 %v1202_v39, %v7095_v45 }
 0x345   :  { %v1195_v6 = vsel %vm1194_vm9, %v3785_v20, %v1191_v41  ;;  %3786 = vtanh.f32 %v1203_v38 }
 0x346   :  { %v1200_v18 = vsel %vm1197_vm10, %v1199_v30, %v1195_v6 }
 0x347   :  { %v1205_v36 = vsub.f32 1.0, %v1200_v18  ;;  %v1207_v53 = vmul.f32 %v1200_v18, %v5446_v11 }
 0x34b   :  { %v3787_v28 = vpop.eup %3786 }
 0x34c   :  { %v1206_v34 = vmul.f32 %v3787_v28, %v1205_v36 }
 0x34e   :  { %v1208_v3 = vadd.f32 %v1207_v53, %v1206_v34 }
 0x350   :  { %v5517_v9 = vsel %vm1214_vm11, %v1208_v3, %v5446_v11  ;;  %v7109_v3 = vld [vmem:[#allocation36_spill] sm:$0xff] }
 0x351   :  { %1238 = vmatmul.f32.vlgmr.msrb.gmra.mxu0 %v5517_v9  ;;  %1258 = vmatmul.f32.vlgmr.msrb.gmra.mxu1 %v5517_v9 }
 0x352   :  { %1278 = vmatmul.f32.vlgmr.msra.gmra.mxu2 %v5517_v9  ;;  %1502 = vmatpush.msrb.mxu0 %v5161_v22 }
 0x353   :  { %1582 = vmatpush.msrb.mxu1 %v5167_v23  ;;  %1602 = vmatpush.msra.mxu2 %v5032_v14  ;;  %v7096_v14 = vld [vmem:[#allocation32_spill] sm:$0xff]  ;;  %v7098_v23 = vld [vmem:[#allocation45_spill] sm:$0xff] }
 0x354   :  { %1503 = vmatpush.msrb.mxu0 %v5174_v19 }
 0x355   :  { %1583 = vmatpush.msrb.mxu1 %v5180_v24  ;;  %1603 = vmatpush.msra.mxu2 %v5040_v8  ;;  %v7097_v8 = vld [vmem:[#allocation13_spill] sm:$0xff] }
 0x356   :  { %1504 = vmatpush.msrb.mxu0 %v5187_v25  ;;  %v7099_v24 = vld [vmem:[#allocation29_spill] sm:$0xff] }
 0x357   :  { %1584 = vmatpush.msrb.mxu1 %v5193_v29  ;;  %1604 = vmatpush.msra.mxu2 %v5199_v35  ;;  %v7100_v29 = vld [vmem:[#allocation59_spill] sm:$0xff]  ;;  %v7101_v35 = vld [vmem:[#allocation60_spill] sm:$0xff] }
 0x358   :  { %1505 = vmatpush.msrb.mxu0 %v5205_v40 }
 0x359   :  { %1585 = vmatpush.msrb.mxu1 %v5211_v47  ;;  %1605 = vmatpush.msra.mxu2 %v5217_v51  ;;  %v7102_v47 = vld [vmem:[#allocation61_spill] sm:$0xff]  ;;  %v7103_v51 = vld [vmem:[#allocation18_spill] sm:$0xff] }
 0x35a   :  { %1506 = vmatpush.msrb.mxu0 %v5223_v60 }
 0x35b   :  { %1586 = vmatpush.msrb.mxu1 %v5229_v5  ;;  %1606 = vmatpush.msra.mxu2 %v5235_v32  ;;  %v7104_v5 = vld [vmem:[#allocation16_spill] sm:$0xff] }
 0x35c   :  { %1507 = vmatpush.msrb.mxu0 %v5241_v37  ;;  %v286_v32 = vadd.f32 %v7104_v5, %v7103_v51 }
 0x35d   :  { %1587 = vmatpush.msrb.mxu1 %v5247_v55  ;;  %1607 = vmatpush.msra.mxu2 %v5253_v54  ;;  %v7105_v55 = vld [vmem:[#allocation39_spill] sm:$0xff] }
 0x35e   :  { %1508 = vmatpush.msrb.mxu0 %v5259_v61  ;;  %v7106_v54 = vld [vmem:[#allocation27_spill] sm:$0xff] }
 0x35f   :  { %1588 = vmatpush.msrb.mxu1 %v5265_v0  ;;  %1608 = vmatpush.msra.mxu2 %v5271_v1  ;;  %v315_v0 = vadd.f32 %v7106_v54, %v7105_v55  ;;  %v7107_v1 = vld [vmem:[#allocation43_spill] sm:$0xff] }
 0x360   :  { %1509 = vmatpush.msrb.mxu0 %v5277_v52 }
 0x361   :  { %1589 = vmatpush.msrb.mxu1 %v5283_v63  ;;  %1609 = vmatpush.msra.mxu2 %v5289_v10  ;;  %v7108_v10 = vld [vmem:[#allocation40_spill] sm:$0xff] }
 0x362   :  { %1510 = vmatpush.msrb.mxu0 %v5295_v12 }
 0x363   :  { %1590 = vmatpush.msrb.mxu1 %v5301_v7  ;;  %1610 = vmatpush.msra.mxu2 %v5307_v26 }
 0x364   :  { %1511 = vmatpush.msrb.mxu0 %v5313_v59 }
 0x365   :  { %1591 = vmatpush.msrb.mxu1 %v5319_v44  ;;  %1611 = vmatpush.msra.mxu2 %v5325_v62 }
 0x366   :  { %1512 = vmatpush.msrb.mxu0 %v5331_v4 }
 0x367   :  { %1592 = vmatpush.msrb.mxu1 %v5337_v27  ;;  %1612 = vmatpush.msra.mxu2 %v5343_v31 }
 0x368   :  { %1513 = vmatpush.msrb.mxu0 %v5349_v56 }
 0x369   :  { %1593 = vmatpush.msrb.mxu1 %v5355_v42  ;;  %1613 = vmatpush.msra.mxu2 %v5361_v58 }
 0x36a   :  { %1514 = vmatpush.msrb.mxu0 %v5367_v17 }
 0x36b   :  { %1594 = vmatpush.msrb.mxu1 %v5373_v57  ;;  %1614 = vmatpush.msra.mxu2 %v5379_v49 }
 0x36c   :  { %1515 = vmatpush.msrb.mxu0 %v5385_v43 }
 0x36d   :  { %1595 = vmatpush.msrb.mxu1 %v7080_v15  ;;  %1615 = vmatpush.msra.mxu2 %v7096_v14 }
 0x36e   :  { %1516 = vmatpush.msrb.mxu0 %v7097_v8 }
 0x36f   :  { %1596 = vmatpush.msrb.mxu1 %v7098_v23  ;;  %1616 = vmatpush.msra.mxu2 %v7099_v24 }
 0x370   :  { %1517 = vmatpush.msrb.mxu0 %v7100_v29 }
 0x371   :  { %1597 = vmatpush.msrb.mxu1 %v7101_v35  ;;  %1617 = vmatpush.msra.mxu2 %v7102_v47 }
 0x3ce   :  { %v1239_v57 = vpop.f32.mrf.mxu0  ;;  %v1259_v49 = vpop.f32.mrf.mxu1 }
 0x3cf   :  { %v1240_v63 = vadd.f32 %v1239_v57, %v7107_v1  ;;  %v1260_v7 = vadd.f32 %v1259_v49, %v7108_v10  ;;  %v1333_v49 = vpop.permute.xlu2 %1332 }
 0x3d0   :  { %vm1334_vm4 = vcmp.eq.s32.totalorder %v1333_v49, 1 }
 0x3d1   :  { %v1282_v26 = vadd.f32 %v1240_v63, %v286_v32  ;;  %v1302_v44 = vadd.f32 %v1260_v7, %v315_v0 }
 0x3d3   :  { %v3600_v62 = vmul.f32 -1.442695, %v1282_v26  ;;  %v3601_v27 = vmul.f32 -1.442695, %v1302_v44 }
 0x3d5   :  { %3788 = vpow2.f32 %v3600_v62  ;;  %v1279_v13 = vpop.f32.mrf.mxu2 }
 0x3d6   :  { %3790 = vpow2.f32 %v3601_v27  ;;  %v1280_v6 = vadd.f32 %v1279_v13, %v7067_v46 }
 0x3db   :  { %v3789_v31 = vpop.eup %3788 }
 0x3dc   :  { %v3791_v42 = vpop.eup %3790  ;;  %v1286_v58 = vadd.f32 1.0, %v3789_v31 }
 0x3dd   :  { %v1306_v11 = vadd.f32 1.0, %v3791_v42 }
 0x3de   :  { %3792 = vrcp.f32 %v1286_v58  ;;  %v1298_v2 = vand.u32 2147483648, %v1286_v58  ;;  %v1296_v39 = vand.u32 2147483647, %v1286_v58  ;;  %vm1292_vm13 = vweird.f32 %v1286_v58 }
 0x3df   :  { %3794 = vrcp.f32 %v1306_v11  ;;  %v1318_v53 = vand.u32 2147483648, %v1306_v11  ;;  %vm1312_vm1 = vweird.f32 %v1306_v11  ;;  %v1316_v50 = vand.u32 2147483647, %v1306_v11 }
 0x3e0   :  { %v1299_v30 = vor.u32 1.1754944e-38, %v1298_v2  ;;  %vm1297_vm15 = vcmp.eq.f32.partialorder %v1296_v39, 8.507059e+37 }
 0x3e1   :  { %v1319_v24 = vor.u32 1.1754944e-38, %v1318_v53  ;;  %vm1317_vm3 = vcmp.eq.f32.partialorder %v1316_v50, 8.507059e+37 }
 0x3e4   :  { %v3793_v15 = vpop.eup %3792 }
 0x3e5   :  { %v3795_v38 = vpop.eup %3794  ;;  %v1288_v48 = vmul.f32 %v3793_v15, %v1286_v58  ;;  %vm1293_vm12 = vweird.f32 %v3793_v15 }
 0x3e6   :  { %v1308_v16 = vmul.f32 %v3795_v38, %v1306_v11  ;;  %vm1294_vm14 = vmor %vm1292_vm13, %vm1293_vm12  ;;  %vm1313_vm0 = vweird.f32 %v3795_v38 }
 0x3e7   :  { %v1289_v20 = vsub.f32 1.0, %v1288_v48  ;;  %vm1314_vm2 = vmor %vm1312_vm1, %vm1313_vm0 }
 0x3e8   :  { %v1309_v21 = vsub.f32 1.0, %v1308_v16 }
 0x3e9   :  { %v1290_v33 = vmul.f32 %v3793_v15, %v1289_v20 }
 0x3ea   :  { %v1310_v41 = vmul.f32 %v3795_v38, %v1309_v21 }
 0x3eb   :  { %v1291_v45 = vadd.f32 %v3793_v15, %v1290_v33  ;;  %v7112_v33 = vld [vmem:[#allocation38_spill] sm:$0xff] }
 0x3ec   :  { %v1311_v28 = vadd.f32 %v3795_v38, %v1310_v41 }
 0x3ed   :  { %v1295_v18 = vsel %vm1294_vm14, %v3793_v15, %v1291_v45 }
 0x3ee   :  { %v1300_v36 = vsel %vm1297_vm15, %v1299_v30, %v1295_v18  ;;  %v1315_v23 = vsel %vm1314_vm2, %v3795_v38, %v1311_v28  ;;  %v1453_v28 = vpop.permute.xlu2 %1452 }
 0x3ef   :  { %v1322_v34 = vmul.f32 %v1300_v36, %v1280_v6  ;;  %v1320_v35 = vsel %vm1317_vm3, %v1319_v24, %v1315_v23  ;;  %vm1454_vm13 = vcmp.eq.s32.totalorder %v1453_v28, 1 }
 0x3f0   :  { %v1325_v47 = vsub.f32 1.0, %v1320_v35  ;;  %v1327_v5 = vmul.f32 %v1320_v35, %v5517_v9 }
 0x3f1   :  { %v1323_v14 = vadd.f32 %v1322_v34, %v7109_v3 }
 0x3f3   :  { %3796 = vtanh.f32 %v1323_v14  ;;  %v7113_v14 = vld [vmem:[#allocation48_spill] sm:$0xff] }
 0x3f4   :  { %v320_v23 = vadd.f32 %v7113_v14, %v7105_v55  ;;  %v1697_v14 = vld [vmem:[%s6910_s9] sm:$0xff] }
 0x3f9   :  { %v3797_v57 = vpop.eup %3796 }
 0x3fa   :  { %v1326_v51 = vmul.f32 %v3797_v57, %v1325_v47  ;;  %v7114_v47 = vld [vmem:[#allocation23_spill] sm:$0xff] }
 0x3fc   :  { %v1328_v32 = vadd.f32 %v1327_v5, %v1326_v51 }
 0x3fe   :  { %v5580_v54 = vsel %vm1334_vm4, %v1328_v32, %v5517_v9 }
 0x3ff   :  { %1358 = vmatmul.f32.vlgmr.msrb.gmra.mxu3 %v5580_v54  ;;  %1378 = vmatmul.f32.vlgmr.msra.gmra.mxu0 %v5580_v54 }
 0x400   :  { %1398 = vmatmul.f32.vlgmr.msra.gmra.mxu1 %v5580_v54  ;;  %1622 = vmatpush.msrb.mxu3 %v5161_v22 }
 0x402   :  { %1623 = vmatpush.msrb.mxu3 %v5174_v19  ;;  %v7110_v19 = vld [vmem:[#allocation47_spill] sm:$0xff] }
 0x404   :  { %1624 = vmatpush.msrb.mxu3 %v5187_v25  ;;  %v317_v25 = vadd.f32 %v7110_v19, %v7105_v55 }
 0x406   :  { %1625 = vmatpush.msrb.mxu3 %v5205_v40 }
 0x408   :  { %1626 = vmatpush.msrb.mxu3 %v5223_v60 }
 0x40a   :  { %1627 = vmatpush.msrb.mxu3 %v5241_v37 }
 0x40c   :  { %1628 = vmatpush.msrb.mxu3 %v5259_v61 }
 0x40e   :  { %1629 = vmatpush.msrb.mxu3 %v5277_v52 }
 0x410   :  { %1630 = vmatpush.msrb.mxu3 %v5295_v12  ;;  %v7111_v12 = vld [vmem:[#allocation20_spill] sm:$0xff] }
 0x412   :  { %1631 = vmatpush.msrb.mxu3 %v5313_v59 }
 0x414   :  { %1632 = vmatpush.msrb.mxu3 %v5331_v4 }
 0x416   :  { %1633 = vmatpush.msrb.mxu3 %v5349_v56 }
 0x418   :  { %1634 = vmatpush.msrb.mxu3 %v5367_v17 }
 0x41a   :  { %1635 = vmatpush.msrb.mxu3 %v5385_v43 }
 0x41c   :  { %1636 = vmatpush.msrb.mxu3 %v7097_v8 }
 0x41e   :  { %1637 = vmatpush.msrb.mxu3 %v7100_v29 }
 0x47c   :  { %v1379_v22 = vpop.f32.mrf.mxu0 }
 0x47d   :  { %v1380_v40 = vadd.f32 %v1379_v22, %v7108_v10  ;;  %v1399_v42 = vpop.f32.mrf.mxu1 }
 0x47e   :  { %v1400_v15 = vadd.f32 %v1399_v42, %v7067_v46 }
 0x47f   :  { %v1422_v60 = vadd.f32 %v1380_v40, %v317_v25  ;;  %v1712_v25 = vld [vmem:[%s6910_s9 + $0x78] sm:$0xff]  ;;  %v1711_v40 = vld [vmem:[%s6910_s9 + $0x70] sm:$0xff] }
 0x480   :  { %1717 = vmatpush.msra.mxu0 %v1712_v25 }
 0x481   :  { %v3603_v37 = vmul.f32 -1.442695, %v1422_v60  ;;  %v1710_v60 = vld [vmem:[%s6910_s9 + $0x68] sm:$0xff] }
 0x482   :  { %v1359_v61 = vpop.f32.mrf.mxu3  ;;  %1718 = vmatpush.msra.mxu0 %v1711_v40  ;;  %v1764_v40 = vld [vmem:[%s6913_s12 + $0x58] sm:$0xff] }
 0x483   :  { %3798 = vpow2.f32 %v3603_v37  ;;  %v1360_v52 = vadd.f32 %v1359_v61, %v7107_v1  ;;  %v1709_v61 = vld [vmem:[%s6910_s9 + $0x60] sm:$0xff] }
 0x484   :  { %1719 = vmatpush.msra.mxu0 %v1710_v60  ;;  %v1745_v60 = vld [vmem:[%s6912_s11 + $0x40] sm:$0xff] }
 0x485   :  { %v1402_v59 = vadd.f32 %v1360_v52, %v7111_v12 }
 0x486   :  { %1720 = vmatpush.msra.mxu0 %v1709_v61  ;;  %v1763_v61 = vld [vmem:[%s6913_s12 + $0x50] sm:$0xff] }
 0x487   :  { %v3602_v4 = vmul.f32 -1.442695, %v1402_v59 }
 0x489   :  { %v3799_v43 = vpop.eup %3798  ;;  %3800 = vpow2.f32 %v3602_v4  ;;  %v1708_v4 = vld [vmem:[%s6910_s9 + $0x58] sm:$0xff] }
 0x48a   :  { %v1426_v56 = vadd.f32 1.0, %v3799_v43  ;;  %1721 = vmatpush.msra.mxu0 %v1708_v4  ;;  %v1762_v4 = vld [vmem:[%s6913_s12 + $0x48] sm:$0xff] }
 0x48c   :  { %3802 = vrcp.f32 %v1426_v56  ;;  %v1438_v20 = vand.u32 2147483648, %v1426_v56  ;;  %vm1432_vm10 = vweird.f32 %v1426_v56  ;;  %v1436_v2 = vand.u32 2147483647, %v1426_v56 }
 0x48e   :  { %v1439_v41 = vor.u32 1.1754944e-38, %v1438_v20  ;;  %vm1437_vm12 = vcmp.eq.f32.partialorder %v1436_v2, 8.507059e+37  ;;  %v7115_v20 = vld [vmem:[#allocation41_spill] sm:$0xff] }
 0x48f   :  { %v3801_v17 = vpop.eup %3800 }
 0x490   :  { %v1406_v9 = vadd.f32 1.0, %v3801_v17 }
 0x492   :  { %3804 = vrcp.f32 %v1406_v9  ;;  %v3803_v8 = vpop.eup %3802  ;;  %v1418_v44 = vand.u32 2147483648, %v1406_v9  ;;  %v1416_v27 = vand.u32 2147483647, %v1406_v9  ;;  %vm1412_vm6 = vweird.f32 %v1406_v9 }
 0x493   :  { %v1428_v29 = vmul.f32 %v3803_v8, %v1426_v56  ;;  %vm1433_vm9 = vweird.f32 %v3803_v8 }
 0x494   :  { %v1419_v11 = vor.u32 1.1754944e-38, %v1418_v44  ;;  %vm1417_vm8 = vcmp.eq.f32.partialorder %v1416_v27, 8.507059e+37  ;;  %vm1434_vm11 = vmor %vm1432_vm10, %vm1433_vm9 }
 0x495   :  { %v1429_v7 = vsub.f32 1.0, %v1428_v29 }
 0x497   :  { %v1430_v31 = vmul.f32 %v3803_v8, %v1429_v7  ;;  %v1706_v7 = vld [vmem:[%s6910_s9 + $0x48] sm:$0xff] }
 0x498   :  { %v3805_v0 = vpop.eup %3804 }
 0x499   :  { %v1408_v63 = vmul.f32 %v3805_v0, %v1406_v9  ;;  %vm1413_vm5 = vweird.f32 %v3805_v0  ;;  %v1431_v16 = vadd.f32 %v3803_v8, %v1430_v31  ;;  %v1707_v9 = vld [vmem:[%s6910_s9 + $0x50] sm:$0xff] }
 0x49a   :  { %vm1414_vm7 = vmor %vm1412_vm6, %vm1413_vm5  ;;  %1722 = vmatpush.msra.mxu0 %v1707_v9 }
 0x49b   :  { %v1409_v26 = vsub.f32 1.0, %v1408_v63  ;;  %v1435_v13 = vsel %vm1434_vm11, %v3803_v8, %v1431_v16  ;;  %v1703_v16 = vld [vmem:[%s6910_s9 + $0x30] sm:$0xff] }
 0x49c   :  { %v1440_v45 = vsel %vm1437_vm12, %v1439_v41, %v1435_v13  ;;  %1723 = vmatpush.msra.mxu0 %v1706_v7  ;;  %v1701_v13 = vld [vmem:[%s6910_s9 + $0x20] sm:$0xff] }
 0x49d   :  { %v1410_v62 = vmul.f32 %v3805_v0, %v1409_v26  ;;  %v1445_v30 = vsub.f32 1.0, %v1440_v45  ;;  %v1447_v36 = vmul.f32 %v1440_v45, %v5580_v54  ;;  %v1700_v45 = vld [vmem:[%s6910_s9 + $0x18] sm:$0xff] }
 0x49f   :  { %v1411_v58 = vadd.f32 %v3805_v0, %v1410_v62  ;;  %v1705_v62 = vld [vmem:[%s6910_s9 + $0x40] sm:$0xff] }
 0x4a0   :  { %1724 = vmatpush.msra.mxu0 %v1705_v62 }
 0x4a1   :  { %v1415_v38 = vsel %vm1414_vm7, %v3805_v0, %v1411_v58 }
 0x4a2   :  { %v1420_v48 = vsel %vm1417_vm8, %v1419_v11, %v1415_v38  ;;  %v1704_v11 = vld [vmem:[%s6910_s9 + $0x38] sm:$0xff] }
 0x4a3   :  { %v1442_v21 = vmul.f32 %v1420_v48, %v1400_v15  ;;  %1725 = vmatpush.msra.mxu0 %v1704_v11 }
 0x4a5   :  { %v1443_v39 = vadd.f32 %v1442_v21, %v7112_v33  ;;  %v1702_v33 = vld [vmem:[%s6910_s9 + $0x28] sm:$0xff]  ;;  %1726 = vmatpush.msra.mxu0 %v1703_v16  ;;  %v3745_v16 = vld [vmem:[%s6911_s10] ss:$0 sm:$0xff] }
 0x4a7   :  { %3806 = vtanh.f32 %v1443_v39  ;;  %1727 = vmatpush.msra.mxu0 %v1702_v33  ;;  %v5792_v33 = vld [vmem:[%s6917_s16 + $0x170] sm:$0xff] }
 0x4a9   :  { %1728 = vmatpush.msra.mxu0 %v1701_v13  ;;  %v5798_v13 = vld [vmem:[%s6917_s16 + $0x150] sm:$0xff] }
 0x4ab   :  { %1729 = vmatpush.msra.mxu0 %v1700_v45 }
 0x4ad   :  { %v3807_v6 = vpop.eup %3806 }
 0x4ae   :  { %v1446_v18 = vmul.f32 %v3807_v6, %v1445_v30  ;;  %v1699_v6 = vld [vmem:[%s6910_s9 + $0x10] sm:$0xff] }
 0x4af   :  { %1730 = vmatpush.msra.mxu0 %v1699_v6  ;;  %v1753_v6 = vld [vmem:[%s6913_s12] sm:$0xff] }
 0x4b0   :  { %v1448_v34 = vadd.f32 %v1447_v36, %v1446_v18 }
 0x4b2   :  { %v5610_v53 = vsel %vm1454_vm13, %v1448_v34, %v5580_v54  ;;  %v1698_v34 = vld [vmem:[%s6910_s9 + $0x8] sm:$0xff] }
 0x4b3   :  { %1478 = vmatmul.f32.vlgmr.msrb.gmra.mxu2 %v5610_v53  ;;  %1498 = vmatmul.f32.vlgmr.msra.gmra.mxu3 %v5610_v53 }
 0x4b4   :  { %1518 = vmatmul.f32.vlgmr.msrb.gmra.mxu0 %v5610_v53 }
 0x4b5   :  { %1731 = vmatpush.msra.mxu0 %v1698_v34  ;;  %v5827_v34 = vld [vmem:[%s6917_s16 + $0x178] sm:$0xff] }
 0x4b7   :  { %1732 = vmatpush.msra.mxu0 %v1697_v14  ;;  %v5841_v14 = vld [vmem:[%s6917_s16 + $0x128] sm:$0xff] }
 0x4b9   :  { %1896 = vmatpush.msrb.mxu0 %v5792_v33 }
 0x531   :  { %v1519_v0 = vpop.f32.mrf.mxu0 }
 0x532   :  { %v1520_v27 = vadd.f32 %v1519_v0, %v7067_v46  ;;  %v7118_v0 = vld [vmem:[#allocation49_spill] sm:$0xff] }
 0x536   :  { %v1479_v50 = vpop.f32.mrf.mxu2  ;;  %v1499_v3 = vpop.f32.mrf.mxu3 }
 0x537   :  { %v1480_v24 = vadd.f32 %v1479_v50, %v7107_v1  ;;  %v1500_v35 = vadd.f32 %v1499_v3, %v7108_v10  ;;  %v1573_v50 = vpop.permute.xlu0 %1572 }
 0x538   :  { %vm1574_vm6 = vcmp.eq.s32.totalorder %v1573_v50, 1  ;;  %v5833_v50 = vld [vmem:[%s6917_s16 + $0x120] sm:$0xff] }
 0x539   :  { %v1522_v57 = vadd.f32 %v1480_v24, %v7114_v47  ;;  %v1542_v49 = vadd.f32 %v1500_v35, %v320_v23  ;;  %v1696_v24 = vld [vmem:[%s7116_s21] sm:$0xff]  ;;  %v1752_v35 = vld [vmem:[%s6912_s11 + $0x78] sm:$0xff]  ;;  %v1750_v47 = vld [vmem:[%s6912_s11 + $0x68] sm:$0xff]  ;;  %s3347_s21 = sshll.u32 %s6921_s20, 4  ;;  %s3348_s21 = int_to_ptr.hbm [resolvable:$true] %s3347_s21 }
 0x53a   :  { %1733 = vmatmul.f32.vlgmr.msra.gmra.mxu0 %v1696_v24  ;;  %1789 = vmatpush.msrb.mxu2 %v1752_v35  ;;  %v5846_v24 = vld [vmem:[%s6917_s16 + $0x160] sm:$0xff]  ;;  %v5852_v35 = vld [vmem:[%s6917_s16 + $0x108] sm:$0xff] }
 0x53b   :  { %v3604_v51 = vmul.f32 -1.442695, %v1522_v57  ;;  %v3605_v5 = vmul.f32 -1.442695, %v1542_v49  ;;  %v1768_v57 = vld [vmem:[%s6913_s12 + $0x78] sm:$0xff]  ;;  %v1749_v49 = vld [vmem:[%s6912_s11 + $0x60] sm:$0xff] }
 0x53c   :  { %1769 = vmatpush.msra.mxu1 %v1768_v57 }
 0x53d   :  { %3808 = vpow2.f32 %v3604_v51  ;;  %v1767_v51 = vld [vmem:[%s6913_s12 + $0x70] sm:$0xff] }
 0x53e   :  { %3810 = vpow2.f32 %v3605_v5  ;;  %v1748_v5 = vld [vmem:[%s6912_s11 + $0x58] sm:$0xff]  ;;  %1770 = vmatpush.msra.mxu1 %v1767_v51  ;;  %v5871_v51 = vld [vmem:[%s6917_s16 + $0xf0] sm:$0xff] }
 0x543   :  { %v3809_v32 = vpop.eup %3808 }
 0x544   :  { %v3811_v54 = vpop.eup %3810  ;;  %v1526_v22 = vadd.f32 1.0, %v3809_v32  ;;  %v1766_v32 = vld [vmem:[%s6913_s12 + $0x68] sm:$0xff] }
 0x545   :  { %v1546_v19 = vadd.f32 1.0, %v3811_v54  ;;  %v1747_v54 = vld [vmem:[%s6912_s11 + $0x50] sm:$0xff]  ;;  %1771 = vmatpush.msra.mxu1 %v1766_v32 }
 0x546   :  { %3812 = vrcp.f32 %v1526_v22  ;;  %v1538_v56 = vand.u32 2147483648, %v1526_v22  ;;  %v1536_v29 = vand.u32 2147483647, %v1526_v22  ;;  %vm1532_vm15 = vweird.f32 %v1526_v22 }
 0x547   :  { %3814 = vrcp.f32 %v1546_v19  ;;  %v1558_v38 = vand.u32 2147483648, %v1546_v19  ;;  %vm1552_vm3 = vweird.f32 %v1546_v19  ;;  %v1556_v48 = vand.u32 2147483647, %v1546_v19 }
 0x548   :  { %v1539_v44 = vor.u32 1.1754944e-38, %v1538_v56  ;;  %vm1537_vm1 = vcmp.eq.f32.partialorder %v1536_v29, 8.507059e+37  ;;  %v1761_v56 = vld [vmem:[%s6913_s12 + $0x40] sm:$0xff] }
 0x549   :  { %v1559_v39 = vor.u32 1.1754944e-38, %v1558_v38  ;;  %vm1557_vm5 = vcmp.eq.f32.partialorder %v1556_v48, 8.507059e+37  ;;  %v1741_v29 = vld [vmem:[%s6912_s11 + $0x20] sm:$0xff]  ;;  %v1755_v48 = vld [vmem:[%s6913_s12 + $0x10] sm:$0xff] }
 0x54a   :  { %v1737_v38 = vld [vmem:[%s6912_s11] sm:$0xff] }
 0x54c   :  { %v3813_v37 = vpop.eup %3812 }
 0x54d   :  { %v3815_v52 = vpop.eup %3814  ;;  %v1528_v12 = vmul.f32 %v3813_v37, %v1526_v22  ;;  %vm1533_vm14 = vweird.f32 %v3813_v37  ;;  %v1765_v22 = vld [vmem:[%s6913_s12 + $0x60] sm:$0xff] }
 0x54e   :  { %v1548_v59 = vmul.f32 %v3815_v52, %v1546_v19  ;;  %vm1534_vm0 = vmor %vm1532_vm15, %vm1533_vm14  ;;  %vm1553_vm2 = vweird.f32 %v3815_v52  ;;  %v1746_v19 = vld [vmem:[%s6912_s11 + $0x48] sm:$0xff]  ;;  %1772 = vmatpush.msra.mxu1 %v1765_v22 }
 0x54f   :  { %v1529_v43 = vsub.f32 1.0, %v1528_v12  ;;  %vm1554_vm4 = vmor %vm1552_vm3, %vm1553_vm2  ;;  %v7117_v12 = vld [vmem:[#allocation25_spill] sm:$0xff] }
 0x550   :  { %v1549_v17 = vsub.f32 1.0, %v1548_v59  ;;  %1773 = vmatpush.msra.mxu1 %v1764_v40  ;;  %v5893_v40 = vld [vmem:[%s6917_s16 + $0xd8] sm:$0xff] }
 0x551   :  { %v1530_v8 = vmul.f32 %v3813_v37, %v1529_v43 }
 0x552   :  { %v1550_v63 = vmul.f32 %v3815_v52, %v1549_v17  ;;  %1774 = vmatpush.msra.mxu1 %v1763_v61  ;;  %v1742_v17 = vld [vmem:[%s6912_s11 + $0x28] sm:$0xff]  ;;  %v5904_v61 = vld [vmem:[%s6917_s16 + $0xe0] sm:$0xff] }
 0x553   :  { %v1531_v26 = vadd.f32 %v3813_v37, %v1530_v8  ;;  %v1760_v8 = vld [vmem:[%s6913_s12 + $0x38] sm:$0xff] }
 0x554   :  { %v1551_v58 = vadd.f32 %v3815_v52, %v1550_v63  ;;  %1775 = vmatpush.msra.mxu1 %v1762_v4  ;;  %v322_v63 = vadd.f32 %v7118_v0, %v7105_v55  ;;  %v1758_v55 = vld [vmem:[%s6913_s12 + $0x28] sm:$0xff] }
 0x555   :  { %v1535_v31 = vsel %vm1534_vm0, %v3813_v37, %v1531_v26  ;;  %v1759_v26 = vld [vmem:[%s6913_s12 + $0x30] sm:$0xff] }
 0x556   :  { %v1540_v42 = vsel %vm1537_vm1, %v1539_v44, %v1535_v31  ;;  %v1555_v2 = vsel %vm1554_vm4, %v3815_v52, %v1551_v58  ;;  %v1744_v52 = vld [vmem:[%s6912_s11 + $0x38] sm:$0xff]  ;;  %1776 = vmatpush.msra.mxu1 %v1761_v56  ;;  %v1757_v31 = vld [vmem:[%s6913_s12 + $0x20] sm:$0xff]  ;;  %v5925_v56 = vld [vmem:[%s6917_s16 + $0xc8] sm:$0xff] }
 0x557   :  { %v1562_v15 = vmul.f32 %v1540_v42, %v1520_v27  ;;  %v1560_v41 = vsel %vm1557_vm5, %v1559_v39, %v1555_v2  ;;  %v1740_v44 = vld [vmem:[%s6912_s11 + $0x18] sm:$0xff]  ;;  %v1738_v42 = vld [vmem:[%s6912_s11 + $0x8] sm:$0xff] }
 0x558   :  { %v1565_v30 = vsub.f32 1.0, %v1560_v41  ;;  %v1567_v28 = vmul.f32 %v1560_v41, %v5610_v53  ;;  %1777 = vmatpush.msra.mxu1 %v1760_v8  ;;  %v5787_v2 = vld [vmem:[%s6917_s16 + $0x168] sm:$0xff]  ;;  %v5803_v41 = vld [vmem:[%s6917_s16 + $0x158] sm:$0xff] }
 0x559   :  { %v1563_v21 = vadd.f32 %v1562_v15, %v7115_v20  ;;  %v1756_v15 = vld [vmem:[%s6913_s12 + $0x18] sm:$0xff]  ;;  %1876 = vmatpush.msra.mxu3 %v5787_v2  ;;  %1897 = vmatpush.msrb.mxu0 %v5803_v41 }
 0x55a   :  { %1778 = vmatpush.msra.mxu1 %v1759_v26  ;;  %v5953_v26 = vld [vmem:[%s6917_s16 + $0xe8] sm:$0xff] }
 0x55b   :  { %3816 = vtanh.f32 %v1563_v21  ;;  %v1754_v21 = vld [vmem:[%s6913_s12 + $0x8] sm:$0xff]  ;;  %1877 = vmatpush.msra.mxu3 %v5798_v13 }
 0x55c   :  { %1779 = vmatpush.msra.mxu1 %v1758_v55 }
 0x55e   :  { %1780 = vmatpush.msra.mxu1 %v1757_v31  ;;  %v5977_v31 = vld [vmem:[%s6917_s16 + $0xd0] sm:$0xff] }
 0x560   :  { %1781 = vmatpush.msra.mxu1 %v1756_v15 }
 0x561   :  { %v3817_v18 = vpop.eup %3816 }
 0x562   :  { %v1566_v36 = vmul.f32 %v3817_v18, %v1565_v30  ;;  %1782 = vmatpush.msra.mxu1 %v1755_v48  ;;  %v5814_v18 = vld [vmem:[%s6917_s16 + $0x138] sm:$0xff] }
 0x563   :  { %1878 = vmatpush.msra.mxu3 %v5814_v18 }
 0x564   :  { %v1568_v3 = vadd.f32 %v1567_v28, %v1566_v36  ;;  %1783 = vmatpush.msra.mxu1 %v1754_v21  ;;  %v5821_v36 = vld [vmem:[%s6917_s16 + $0x140] sm:$0xff] }
 0x565   :  { %1898 = vmatpush.msrb.mxu0 %v5821_v36  ;;  %1879 = vmatpush.msra.mxu3 %v5833_v50 }
 0x566   :  { %v5672_v23 = vsel %vm1574_vm6, %v1568_v3, %v5610_v53  ;;  %v1751_v53 = vld [vmem:[%s6912_s11 + $0x70] sm:$0xff]  ;;  %1784 = vmatpush.msra.mxu1 %v1753_v6  ;;  %v6005_v6 = vld [vmem:[%s6917_s16 + $0x78] sm:$0xff] }
 0x567   :  { %1598 = vmatmul.f32.vlgmr.msrb.gmra.mxu1 %v5672_v23  ;;  %1618 = vmatmul.f32.vlgmr.msra.gmra.mxu2 %v5672_v23 }
 0x568   :  { %1638 = vmatmul.f32.vlgmr.msrb.gmra.mxu3 %v5672_v23  ;;  %1790 = vmatpush.msrb.mxu2 %v1751_v53 }
 0x569   :  { %1916 = vmatpush.msrb.mxu1 %v5827_v34  ;;  %1899 = vmatpush.msrb.mxu0 %v5841_v14 }
 0x56a   :  { %1791 = vmatpush.msrb.mxu2 %v1750_v47  ;;  %v5859_v47 = vld [vmem:[%s6917_s16 + $0x110] sm:$0xff]  ;;  %1880 = vmatpush.msra.mxu3 %v5852_v35 }
 0x56b   :  { %1917 = vmatpush.msrb.mxu1 %v5846_v24  ;;  %1900 = vmatpush.msrb.mxu0 %v5859_v47 }
 0x56c   :  { %1792 = vmatpush.msrb.mxu2 %v1749_v49  ;;  %v5865_v49 = vld [vmem:[%s6917_s16 + $0x148] sm:$0xff]  ;;  %1881 = vmatpush.msra.mxu3 %v5871_v51 }
 0x56d   :  { %1918 = vmatpush.msrb.mxu1 %v5865_v49 }
 0x56e   :  { %1793 = vmatpush.msrb.mxu2 %v1748_v5  ;;  %1882 = vmatpush.msra.mxu3 %v5893_v40 }
 0x570   :  { %1794 = vmatpush.msrb.mxu2 %v1747_v54  ;;  %v5880_v54 = vld [vmem:[%s6917_s16 + $0xf8] sm:$0xff] }
 0x571   :  { %1901 = vmatpush.msrb.mxu0 %v5880_v54 }
 0x572   :  { %1795 = vmatpush.msrb.mxu2 %v1746_v19 }
 0x573   :  { %1902 = vmatpush.msrb.mxu0 %v5904_v61 }
 0x574   :  { %1796 = vmatpush.msrb.mxu2 %v1745_v60 }
 0x575   :  { %1903 = vmatpush.msrb.mxu0 %v5925_v56 }
 0x576   :  { %1797 = vmatpush.msrb.mxu2 %v1744_v52 }
 0x5b7   :  { %v1734_v20 = vpop.f32.mrf.mxu0 }
 0x5b8   :  { %v1735_v30 = vadd.f32 %v3745_v16, %v1734_v20 }
 0x5ba   :  { %1785 = vmatmul.f32.vlgmr.msra.gmra.mxu1 %v1735_v30 }
 0x5e4   :  { %v1599_v25 = vpop.f32.mrf.mxu1 }
 0x5e5   :  { %v1600_v37 = vadd.f32 %v1599_v25, %v7107_v1  ;;  %v1743_v1 = vld [vmem:[%s6912_s11 + $0x30] sm:$0xff] }
 0x5e6   :  { %1798 = vmatpush.msrb.mxu2 %v1743_v1  ;;  %v5887_v25 = vld [vmem:[%s6917_s16 + $0x130] sm:$0xff] }
 0x5e7   :  { %v1642_v59 = vadd.f32 %v1600_v37, %v7117_v12  ;;  %v5910_v12 = vld [vmem:[%s6917_s16 + $0x118] sm:$0xff]  ;;  %1919 = vmatpush.msrb.mxu1 %v5887_v25 }
 0x5e8   :  { %1799 = vmatpush.msrb.mxu2 %v1742_v17 }
 0x5e9   :  { %v3606_v43 = vmul.f32 -1.442695, %v1642_v59  ;;  %v5916_v59 = vld [vmem:[%s6917_s16 + $0xc0] sm:$0xff]  ;;  %1920 = vmatpush.msrb.mxu1 %v5910_v12 }
 0x5ea   :  { %v1619_v9 = vpop.f32.mrf.mxu2  ;;  %1800 = vmatpush.msrb.mxu2 %v1741_v29  ;;  %1883 = vmatpush.msra.mxu3 %v5916_v59 }
 0x5eb   :  { %3818 = vpow2.f32 %v3606_v43  ;;  %v1620_v7 = vadd.f32 %v1619_v9, %v7108_v10  ;;  %v1739_v10 = vld [vmem:[%s6912_s11 + $0x10] sm:$0xff]  ;;  %v1639_v19 = vpop.f32.mrf.mxu3  ;;  %v5930_v9 = vld [vmem:[%s6917_s16 + $0x100] sm:$0xff] }
 0x5ec   :  { %1801 = vmatpush.msrb.mxu2 %v1740_v44  ;;  %v1640_v1 = vadd.f32 %v1639_v19, %v7067_v46  ;;  %v5936_v46 = vld [vmem:[%s6917_s16 + $0xa8] sm:$0xff]  ;;  %v5959_v44 = vld [vmem:[%s6917_s16 + $0x90] sm:$0xff]  ;;  %1921 = vmatpush.msrb.mxu1 %v5930_v9 }
 0x5ed   :  { %v1662_v62 = vadd.f32 %v1620_v7, %v322_v63  ;;  %v5947_v63 = vld [vmem:[%s6917_s16 + $0xb0] sm:$0xff]  ;;  %1884 = vmatpush.msra.mxu3 %v5936_v46 }
 0x5ee   :  { %1802 = vmatpush.msrb.mxu2 %v1739_v10  ;;  %1904 = vmatpush.msrb.mxu0 %v5947_v63  ;;  %v6060_v19 = vld [vmem:[%s6917_s16 + $0x30] sm:$0xff] }
 0x5ef   :  { %v3607_v27 = vmul.f32 -1.442695, %v1662_v62  ;;  %v7119_v62 = vld [vmem:[#allocation42_spill] sm:$0xff]  ;;  %1922 = vmatpush.msrb.mxu1 %v5953_v26  ;;  %1885 = vmatpush.msra.mxu3 %v5959_v44 }
 0x5f0   :  { %1803 = vmatpush.msrb.mxu2 %v1738_v42 }
 0x5f1   :  { %v3819_v58 = vpop.eup %3818  ;;  %3820 = vpow2.f32 %v3607_v27  ;;  %v5970_v27 = vld [vmem:[%s6917_s16 + $0x98] sm:$0xff]  ;;  %1923 = vmatpush.msrb.mxu1 %v5977_v31  ;;  %1886 = vmatpush.msra.mxu3 %v6005_v6 }
 0x5f2   :  { %v5766_v11 = vadd.f32 1.0, %v3819_v58  ;;  %1804 = vmatpush.msrb.mxu2 %v1737_v38  ;;  %1905 = vmatpush.msrb.mxu0 %v5970_v27  ;;  %v5995_v38 = vld [vmem:[%s6917_s16 + $0xa0] sm:$0xff] }
 0x5f4   :  { %3822 = vrcp.f32 %v5766_v11  ;;  %2045 = vmatpush.msra.mxu2 %v5787_v2  ;;  %v1658_v57 = vand.u32 2147483648, %v5766_v11  ;;  %v1656_v32 = vand.u32 2147483647, %v5766_v11  ;;  %vm1652_vm8 = vweird.f32 %v5766_v11 }
 0x5f6   :  { %2046 = vmatpush.msra.mxu2 %v5798_v13  ;;  %v1659_v52 = vor.u32 1.1754944e-38, %v1658_v57  ;;  %vm1657_vm10 = vcmp.eq.f32.partialorder %v1656_v32, 8.507059e+37  ;;  %v6033_v57 = vld [vmem:[%s6917_s16 + $0x70] sm:$0xff] }
 0x5f7   :  { %v3821_v39 = vpop.eup %3820  ;;  %v6047_v32 = vld [vmem:[%s6917_s16 + $0x50] sm:$0xff] }
 0x5f8   :  { %v5805_v45 = vadd.f32 1.0, %v3821_v39  ;;  %2047 = vmatpush.msra.mxu2 %v5814_v18  ;;  %v1693_v39 = vpop.permute.xlu1 %1692 }
 0x5f9   :  { %vm1694_vm15 = vcmp.eq.s32.totalorder %v1693_v39, 1 }
 0x5fa   :  { %v3823_v28 = vpop.eup %3822  ;;  %3824 = vrcp.f32 %v5805_v45  ;;  %2048 = vmatpush.msra.mxu2 %v5833_v50  ;;  %v1678_v0 = vand.u32 2147483648, %v5805_v45  ;;  %v1676_v7 = vand.u32 2147483647, %v5805_v45  ;;  %vm1672_vm12 = vweird.f32 %v5805_v45 }
 0x5fb   :  { %v1648_v3 = vmul.f32 %v3823_v28, %v5766_v11  ;;  %vm1653_vm7 = vweird.f32 %v3823_v28  ;;  %v5987_v11 = vld [vmem:[%s6917_s16 + $0xb8] sm:$0xff] }
 0x5fc   :  { %vm1654_vm9 = vmor %vm1652_vm8, %vm1653_vm7  ;;  %2049 = vmatpush.msra.mxu2 %v5852_v35  ;;  %v1679_v58 = vor.u32 1.1754944e-38, %v1678_v0  ;;  %vm1677_vm14 = vcmp.eq.f32.partialorder %v1676_v7, 8.507059e+37  ;;  %1924 = vmatpush.msrb.mxu1 %v5987_v11  ;;  %v3746_v0 = vld [vmem:[%s6914_s13] ss:$0 sm:$0xff] }
 0x5fd   :  { %v1649_v53 = vsub.f32 1.0, %v1648_v3  ;;  %v6017_v3 = vld [vmem:[%s6917_s16 + $0x88] sm:$0xff] }
 0x5fe   :  { %2050 = vmatpush.msra.mxu2 %v5871_v51  ;;  %1925 = vmatpush.msrb.mxu1 %v5995_v38 }
 0x5ff   :  { %v1650_v5 = vmul.f32 %v3823_v28, %v1649_v53  ;;  %v6028_v53 = vld [vmem:[%s6917_s16 + $0x68] sm:$0xff] }
 0x600   :  { %v5882_v22 = vpop.eup %3824  ;;  %2051 = vmatpush.msra.mxu2 %v5893_v40  ;;  %1926 = vmatpush.msrb.mxu1 %v6017_v3 }
 0x601   :  { %v1668_v60 = vmul.f32 %v5882_v22, %v5805_v45  ;;  %v1651_v37 = vadd.f32 %v3823_v28, %v1650_v5  ;;  %vm1673_vm11 = vweird.f32 %v5882_v22  ;;  %v6042_v5 = vld [vmem:[%s6917_s16 + $0x48] sm:$0xff] }
 0x602   :  { %vm1674_vm13 = vmor %vm1672_vm12, %vm1673_vm11  ;;  %2052 = vmatpush.msra.mxu2 %v5916_v59  ;;  %1927 = vmatpush.msrb.mxu1 %v6033_v57 }
 0x603   :  { %v1669_v4 = vsub.f32 1.0, %v1668_v60  ;;  %v1655_v43 = vsel %vm1654_vm9, %v3823_v28, %v1651_v37  ;;  %v6010_v28 = vld [vmem:[%s6917_s16 + $0x80] sm:$0xff]  ;;  %v6065_v60 = vld [vmem:[%s6917_s16 + $0x38] sm:$0xff] }
 0x604   :  { %v1660_v17 = vsel %vm1657_vm10, %v1659_v52, %v1655_v43  ;;  %2053 = vmatpush.msra.mxu2 %v5936_v46  ;;  %1906 = vmatpush.msrb.mxu0 %v6010_v28  ;;  %v6070_v37 = vld [vmem:[%s6917_s16 + $0x40] sm:$0xff]  ;;  %v6076_v52 = vld [vmem:[%s6917_s16 + $0x18] sm:$0xff] }
 0x605   :  { %v1682_v8 = vmul.f32 %v1660_v17, %v1640_v1  ;;  %v1670_v29 = vmul.f32 %v5882_v22, %v1669_v4  ;;  %v6081_v4 = vld [vmem:[%s6917_s16 + $0x20] sm:$0xff]  ;;  %v6089_v1 = vld [vmem:[%s6917_s16 + $0x28] sm:$0xff] }
 0x606   :  { %2054 = vmatpush.msra.mxu2 %v5959_v44  ;;  %1907 = vmatpush.msrb.mxu0 %v6028_v53  ;;  %v6095_v43 = vld [vmem:[%s6917_s16] sm:$0xff]  ;;  %v6100_v17 = vld [vmem:[%s6917_s16 + $0x8] sm:$0xff] }
 0x607   :  { %v1683_v55 = vadd.f32 %v1682_v8, %v7119_v62  ;;  %v1671_v10 = vadd.f32 %v5882_v22, %v1670_v29  ;;  %v6108_v8 = vld [vmem:[%s6917_s16 + $0x10] sm:$0xff] }
 0x608   :  { %2055 = vmatpush.msra.mxu2 %v6005_v6  ;;  %1908 = vmatpush.msrb.mxu0 %v6047_v32 }
 0x609   :  { %3826 = vtanh.f32 %v1683_v55  ;;  %v1675_v42 = vsel %vm1674_vm13, %v5882_v22, %v1671_v10  ;;  %v6052_v22 = vld [vmem:[%s6917_s16 + $0x58] sm:$0xff] }
 0x60a   :  { %v1680_v15 = vsel %vm1677_vm14, %v1679_v58, %v1675_v42  ;;  %1928 = vmatpush.msrb.mxu1 %v6052_v22  ;;  %1909 = vmatpush.msrb.mxu0 %v6065_v60 }
 0x60b   :  { %v1685_v48 = vsub.f32 1.0, %v1680_v15  ;;  %v1687_v21 = vmul.f32 %v1680_v15, %v5672_v23 }
 0x60c   :  { %1929 = vmatpush.msrb.mxu1 %v6070_v37  ;;  %1910 = vmatpush.msrb.mxu0 %v6081_v4 }
 0x60e   :  { %1930 = vmatpush.msrb.mxu1 %v6089_v1  ;;  %1911 = vmatpush.msrb.mxu0 %v6100_v17 }
 0x60f   :  { %v3827_v16 = vpop.eup %3826 }
 0x610   :  { %v1686_v20 = vmul.f32 %v3827_v16, %v1685_v48  ;;  %1931 = vmatpush.msrb.mxu1 %v6108_v8  ;;  %2085 = vmatpush.msra.mxu0 %v5827_v34 }
 0x612   :  { %v1688_v45 = vadd.f32 %v1687_v21, %v1686_v20  ;;  %2215 = vmatpush.msra.mxu1 %v5787_v2  ;;  %2086 = vmatpush.msra.mxu0 %v5846_v24 }
 0x614   :  { %v1695_v30 = vsel %vm1694_vm15, %v1688_v45, %v5672_v23  ;;  %v6023_v23 = vld [vmem:[%s6917_s16 + $0x60] sm:$0xff]  ;;  %2216 = vmatpush.msra.mxu1 %v5798_v13  ;;  %2087 = vmatpush.msra.mxu0 %v5865_v49 }
 0x615   :  { %1805 = vmatmul.f32.vlgmr.msrb.gmra.mxu2 %v1695_v30  ;;  %1887 = vmatpush.msra.mxu3 %v6023_v23 }
 0x616   :  { %2056 = vmatpush.msra.mxu2 %v6023_v23  ;;  %2217 = vmatpush.msra.mxu1 %v5814_v18 }
 0x617   :  { %1888 = vmatpush.msra.mxu3 %v6042_v5  ;;  %2088 = vmatpush.msra.mxu0 %v5887_v25 }
 0x618   :  { %2057 = vmatpush.msra.mxu2 %v6042_v5  ;;  %2218 = vmatpush.msra.mxu1 %v5833_v50 }
 0x619   :  { %1889 = vmatpush.msra.mxu3 %v6060_v19  ;;  %2089 = vmatpush.msra.mxu0 %v5910_v12 }
 0x61a   :  { %2058 = vmatpush.msra.mxu2 %v6060_v19  ;;  %2219 = vmatpush.msra.mxu1 %v5852_v35 }
 0x61b   :  { %1890 = vmatpush.msra.mxu3 %v6076_v52  ;;  %2090 = vmatpush.msra.mxu0 %v5930_v9 }
 0x61c   :  { %2059 = vmatpush.msra.mxu2 %v6076_v52  ;;  %2220 = vmatpush.msra.mxu1 %v5871_v51 }
 0x61d   :  { %1891 = vmatpush.msra.mxu3 %v6095_v43  ;;  %2091 = vmatpush.msra.mxu0 %v5953_v26 }
 0x61e   :  { %2060 = vmatpush.msra.mxu2 %v6095_v43  ;;  %2221 = vmatpush.msra.mxu1 %v5893_v40 }
 0x61f   :  { %2065 = vmatpush.msrb.mxu3 %v5792_v33  ;;  %2092 = vmatpush.msra.mxu0 %v5977_v31 }
 0x620   :  { %2235 = vmatpush.msrb.mxu2 %v5792_v33  ;;  %2222 = vmatpush.msra.mxu1 %v5916_v59 }
 0x621   :  { %2066 = vmatpush.msrb.mxu3 %v5803_v41  ;;  %2093 = vmatpush.msra.mxu0 %v5987_v11 }
 0x622   :  { %2236 = vmatpush.msrb.mxu2 %v5803_v41  ;;  %2223 = vmatpush.msra.mxu1 %v5936_v46 }
 0x623   :  { %2067 = vmatpush.msrb.mxu3 %v5821_v36  ;;  %2094 = vmatpush.msra.mxu0 %v5995_v38 }
 0x624   :  { %2237 = vmatpush.msrb.mxu2 %v5821_v36  ;;  %2224 = vmatpush.msra.mxu1 %v5959_v44 }
 0x625   :  { %2068 = vmatpush.msrb.mxu3 %v5841_v14  ;;  %2095 = vmatpush.msra.mxu0 %v6017_v3 }
 0x626   :  { %2238 = vmatpush.msrb.mxu2 %v5841_v14  ;;  %2225 = vmatpush.msra.mxu1 %v6005_v6 }
 0x627   :  { %2069 = vmatpush.msrb.mxu3 %v5859_v47  ;;  %2096 = vmatpush.msra.mxu0 %v6033_v57 }
 0x628   :  { %2239 = vmatpush.msrb.mxu2 %v5859_v47  ;;  %2226 = vmatpush.msra.mxu1 %v6023_v23 }
 0x629   :  { %2070 = vmatpush.msrb.mxu3 %v5880_v54  ;;  %2097 = vmatpush.msra.mxu0 %v6052_v22 }
 0x62a   :  { %2240 = vmatpush.msrb.mxu2 %v5880_v54  ;;  %2227 = vmatpush.msra.mxu1 %v6042_v5 }
 0x62b   :  { %2071 = vmatpush.msrb.mxu3 %v5904_v61  ;;  %2098 = vmatpush.msra.mxu0 %v6070_v37 }
 0x62c   :  { %2241 = vmatpush.msrb.mxu2 %v5904_v61  ;;  %2228 = vmatpush.msra.mxu1 %v6060_v19 }
 0x62d   :  { %2072 = vmatpush.msrb.mxu3 %v5925_v56  ;;  %2099 = vmatpush.msra.mxu0 %v6089_v1 }
 0x62e   :  { %2242 = vmatpush.msrb.mxu2 %v5925_v56  ;;  %2229 = vmatpush.msra.mxu1 %v6076_v52 }
 0x62f   :  { %2073 = vmatpush.msrb.mxu3 %v5947_v63  ;;  %2100 = vmatpush.msra.mxu0 %v6108_v8 }
 0x630   :  { %2243 = vmatpush.msrb.mxu2 %v5947_v63  ;;  %2230 = vmatpush.msra.mxu1 %v6095_v43 }
 0x631   :  { %2074 = vmatpush.msrb.mxu3 %v5970_v27 }
 0x632   :  { %2244 = vmatpush.msrb.mxu2 %v5970_v27 }
 0x633   :  { %2075 = vmatpush.msrb.mxu3 %v6010_v28 }
 0x634   :  { %2245 = vmatpush.msrb.mxu2 %v6010_v28 }
 0x635   :  { %2076 = vmatpush.msrb.mxu3 %v6028_v53 }
 0x636   :  { %2246 = vmatpush.msrb.mxu2 %v6028_v53 }
 0x637   :  { %v1786_v29 = vpop.f32.mrf.mxu1  ;;  %2077 = vmatpush.msrb.mxu3 %v6047_v32 }
 0x638   :  { %2247 = vmatpush.msrb.mxu2 %v6047_v32 }
 0x639   :  { %2078 = vmatpush.msrb.mxu3 %v6065_v60 }
 0x63a   :  { %2248 = vmatpush.msrb.mxu2 %v6065_v60 }
 0x63b   :  { %2079 = vmatpush.msrb.mxu3 %v6081_v4 }
 0x63c   :  { %2249 = vmatpush.msrb.mxu2 %v6081_v4 }
 0x63d   :  { %2080 = vmatpush.msrb.mxu3 %v6100_v17 }
 0x63e   :  { %2250 = vmatpush.msrb.mxu2 %v6100_v17 }
 0x698   :  { %v1806_v7 = vpop.f32.mrf.mxu2 }
 0x699   :  { %v1807_v62 = vadd.f32 %v1806_v7, %v1786_v29 }
 0x69b   :  { %v1813_v55 = vadd.f32 %v3746_v0, %v1807_v62 }
 0x69d   :  { %3828 = vtanh.f32 %v1813_v55 }
 0x6a3   :  { %v6177_v10 = vpop.eup %3828 }
 0x6a4   :  { %1892 = vmatmul.f32.vlgmr.msra.gmra.mxu3 %v6177_v10  ;;  %1912 = vmatmul.f32.vlgmr.msrb.gmra.mxu0 %v6177_v10 }
 0x6a5   :  { %1932 = vmatmul.f32.vlgmr.msrb.gmra.mxu1 %v6177_v10  ;;  %2255 = vmatpush.msra.mxu3 %v5827_v34 }
 0x6a6   :  { %2385 = vmatpush.msrb.mxu0 %v5787_v2  ;;  %2405 = vmatpush.msrb.mxu1 %v5792_v33  ;;  %v1868_v2 = vld [vmem:[%s6918_s17] sm:$0x7] }
 0x6a7   :  { %2256 = vmatpush.msra.mxu3 %v5846_v24  ;;  %v1871_v33 = vperm.slane %v1868_v2, 1  ;;  %v1872_v45 = vperm.slane %v1868_v2, 2 }
 0x6a8   :  { %2386 = vmatpush.msrb.mxu0 %v5798_v13  ;;  %2406 = vmatpush.msrb.mxu1 %v5803_v41  ;;  %v7120_v41 = vld [vmem:[#allocation9_spill] sm:$0xff] }
 0x6a9   :  { %2257 = vmatpush.msra.mxu3 %v5865_v49 }
 0x6aa   :  { %2387 = vmatpush.msrb.mxu0 %v5814_v18  ;;  %2407 = vmatpush.msrb.mxu1 %v5821_v36  ;;  %v7121_v18 = vld [vmem:[#allocation50_spill] sm:$0xff] }
 0x6ab   :  { %2258 = vmatpush.msra.mxu3 %v5887_v25  ;;  %v612_v36 = vadd.f32 %v7121_v18, %v7120_v41 }
 0x6ac   :  { %2388 = vmatpush.msrb.mxu0 %v5833_v50  ;;  %2408 = vmatpush.msrb.mxu1 %v5841_v14 }
 0x6ad   :  { %2259 = vmatpush.msra.mxu3 %v5910_v12 }
 0x6ae   :  { %2389 = vmatpush.msrb.mxu0 %v5852_v35  ;;  %2409 = vmatpush.msrb.mxu1 %v5859_v47  ;;  %v1870_v35 = vperm.slane %v1868_v2, 0 }
 0x6af   :  { %2260 = vmatpush.msra.mxu3 %v5930_v9 }
 0x6b0   :  { %2390 = vmatpush.msrb.mxu0 %v5871_v51  ;;  %2410 = vmatpush.msrb.mxu1 %v5880_v54  ;;  %v7122_v54 = vld [vmem:[#allocation21_spill] sm:$0xff] }
 0x6b1   :  { %2261 = vmatpush.msra.mxu3 %v5953_v26 }
 0x6b2   :  { %2391 = vmatpush.msrb.mxu0 %v5893_v40  ;;  %2411 = vmatpush.msrb.mxu1 %v5904_v61  ;;  %v7123_v40 = vld [vmem:[#allocation17_spill] sm:$0xff] }
 0x6b3   :  { %2262 = vmatpush.msra.mxu3 %v5977_v31  ;;  %v584_v61 = vadd.f32 %v7123_v40, %v7122_v54 }
 0x6b4   :  { %2392 = vmatpush.msrb.mxu0 %v5916_v59  ;;  %2412 = vmatpush.msrb.mxu1 %v5925_v56 }
 0x6b5   :  { %2263 = vmatpush.msra.mxu3 %v5987_v11 }
 0x6b6   :  { %2393 = vmatpush.msrb.mxu0 %v5936_v46  ;;  %2413 = vmatpush.msrb.mxu1 %v5947_v63 }
 0x6b7   :  { %2264 = vmatpush.msra.mxu3 %v5995_v38 }
 0x6b8   :  { %2394 = vmatpush.msrb.mxu0 %v5959_v44  ;;  %2414 = vmatpush.msrb.mxu1 %v5970_v27 }
 0x6b9   :  { %2265 = vmatpush.msra.mxu3 %v6017_v3 }
 0x6ba   :  { %2395 = vmatpush.msrb.mxu0 %v6005_v6  ;;  %2415 = vmatpush.msrb.mxu1 %v6010_v28 }
 0x6bb   :  { %2266 = vmatpush.msra.mxu3 %v6033_v57 }
 0x6bc   :  { %2396 = vmatpush.msrb.mxu0 %v6023_v23  ;;  %2416 = vmatpush.msrb.mxu1 %v6028_v53 }
 0x6bd   :  { %2267 = vmatpush.msra.mxu3 %v6052_v22 }
 0x6be   :  { %2397 = vmatpush.msrb.mxu0 %v6042_v5  ;;  %2417 = vmatpush.msrb.mxu1 %v6047_v32 }
 0x6bf   :  { %2268 = vmatpush.msra.mxu3 %v6070_v37 }
 0x6c0   :  { %2398 = vmatpush.msrb.mxu0 %v6060_v19  ;;  %2418 = vmatpush.msrb.mxu1 %v6065_v60 }
 0x6c1   :  { %2269 = vmatpush.msra.mxu3 %v6089_v1 }
 0x6c2   :  { %2399 = vmatpush.msrb.mxu0 %v6076_v52  ;;  %2419 = vmatpush.msrb.mxu1 %v6081_v4  ;;  %v7124_v4 = vld [vmem:[#allocation11_spill] sm:$0xff] }
 0x6c3   :  { %2270 = vmatpush.msra.mxu3 %v6108_v8 }
 0x6c4   :  { %2400 = vmatpush.msrb.mxu0 %v6095_v43  ;;  %2420 = vmatpush.msrb.mxu1 %v6100_v17  ;;  %v7125_v43 = vld [vmem:[#allocation14_spill] sm:$0xff] }
 0x6c5   :  { %v640_v17 = vadd.f32 %v7125_v43, %v7124_v4  ;;  %v2207_v4 = vld [vmem:[%s6918_s17] sm:$0x7] }
 0x6c6   :  { %v2209_v43 = vperm.slane %v2207_v4, 0 }
 0x721   :  { %v1913_v13 = vpop.f32.mrf.mxu0 }
 0x722   :  { %v1914_v50 = vadd.f32 %v1913_v13, %v1871_v33  ;;  %v1933_v23 = vpop.f32.mrf.mxu1 }
 0x723   :  { %v1934_v32 = vadd.f32 %v1933_v23, %v1872_v45 }
 0x724   :  { %v1956_v14 = vadd.f32 %v1914_v50, %v612_v36 }
 0x726   :  { %v3609_v47 = vmul.f32 -1.442695, %v1956_v14 }
 0x727   :  { %v1893_v51 = vpop.f32.mrf.mxu3 }
 0x728   :  { %3830 = vpow2.f32 %v3609_v47  ;;  %v1894_v59 = vadd.f32 %v1893_v51, %v1870_v35 }
 0x72a   :  { %v1936_v56 = vadd.f32 %v1894_v59, %v584_v61 }
 0x72c   :  { %v3608_v46 = vmul.f32 -1.442695, %v1936_v56 }
 0x72e   :  { %v3831_v63 = vpop.eup %3830  ;;  %3832 = vpow2.f32 %v3608_v46 }
 0x72f   :  { %v1960_v44 = vadd.f32 1.0, %v3831_v63 }
 0x731   :  { %3834 = vrcp.f32 %v1960_v44  ;;  %v1972_v29 = vand.u32 2147483648, %v1960_v44  ;;  %vm1966_vm5 = vweird.f32 %v1960_v44  ;;  %v1970_v7 = vand.u32 2147483647, %v1960_v44 }
 0x733   :  { %v1973_v2 = vor.u32 1.1754944e-38, %v1972_v29  ;;  %vm1971_vm7 = vcmp.eq.f32.partialorder %v1970_v7, 8.507059e+37 }
 0x734   :  { %v3833_v27 = vpop.eup %3832 }
 0x735   :  { %v1940_v42 = vadd.f32 1.0, %v3833_v27 }
 0x737   :  { %3836 = vrcp.f32 %v1940_v42  ;;  %v3835_v58 = vpop.eup %3834  ;;  %v1952_v39 = vand.u32 2147483648, %v1940_v42  ;;  %v1950_v6 = vand.u32 2147483647, %v1940_v42  ;;  %vm1946_vm1 = vweird.f32 %v1940_v42 }
 0x738   :  { %v1962_v15 = vmul.f32 %v3835_v58, %v1960_v44  ;;  %vm1967_vm4 = vweird.f32 %v3835_v58 }
 0x739   :  { %v1953_v5 = vor.u32 1.1754944e-38, %v1952_v39  ;;  %vm1951_vm3 = vcmp.eq.f32.partialorder %v1950_v6, 8.507059e+37  ;;  %vm1968_vm6 = vmor %vm1966_vm5, %vm1967_vm4 }
 0x73a   :  { %v1963_v20 = vsub.f32 1.0, %v1962_v15 }
 0x73c   :  { %v1964_v28 = vmul.f32 %v3835_v58, %v1963_v20 }
 0x73d   :  { %v3837_v48 = vpop.eup %3836 }
 0x73e   :  { %v1942_v16 = vmul.f32 %v3837_v48, %v1940_v42  ;;  %vm1947_vm0 = vweird.f32 %v3837_v48  ;;  %v1965_v52 = vadd.f32 %v3835_v58, %v1964_v28 }
 0x73f   :  { %vm1948_vm2 = vmor %vm1946_vm1, %vm1947_vm0 }
 0x740   :  { %v1943_v21 = vsub.f32 1.0, %v1942_v16  ;;  %v1969_v55 = vsel %vm1968_vm6, %v3835_v58, %v1965_v52 }
 0x741   :  { %v1974_v33 = vsel %vm1971_vm7, %v1973_v2, %v1969_v55 }
 0x742   :  { %v1944_v30 = vmul.f32 %v3837_v48, %v1943_v21  ;;  %v1979_v13 = vsub.f32 1.0, %v1974_v33  ;;  %v1981_v50 = vmul.f32 %v6177_v10, %v1974_v33  ;;  %v7130_v33 = vld [vmem:[#allocation12_spill] sm:$0xff] }
 0x744   :  { %v1945_v53 = vadd.f32 %v3837_v48, %v1944_v30  ;;  %v7128_v30 = vld [vmem:[#allocation10_spill] sm:$0xff] }
 0x746   :  { %v1949_v19 = vsel %vm1948_vm2, %v3837_v48, %v1945_v53 }
 0x747   :  { %v1954_v60 = vsel %vm1951_vm3, %v1953_v5, %v1949_v19 }
 0x748   :  { %v1976_v0 = vmul.f32 %v1954_v60, %v1934_v32 }
 0x74a   :  { %v1977_v62 = vadd.f32 %v1976_v0, %v640_v17  ;;  %v7129_v0 = vld [vmem:[#allocation24_spill] sm:$0xff] }
 0x74c   :  { %3838 = vtanh.f32 %v1977_v62  ;;  %v2210_v62 = vperm.slane %v2207_v4, 1 }
 0x752   :  { %v3839_v18 = vpop.eup %3838 }
 0x753   :  { %v1980_v36 = vmul.f32 %v3839_v18, %v1979_v13  ;;  %v617_v13 = vadd.f32 %v7130_v33, %v7120_v41  ;;  %v6420_v33 = vld [vmem:[%s6917_s16 + $0xe0] sm:$0xff] }
 0x755   :  { %v6246_v14 = vadd.f32 %v1981_v50, %v1980_v36 }
 0x757   :  { %2061 = vmatmul.f32.vlgmr.msra.gmra.mxu2 %v6246_v14  ;;  %2081 = vmatmul.f32.vlgmr.msrb.gmra.mxu3 %v6246_v14 }
 0x758   :  { %2101 = vmatmul.f32.vlgmr.msra.gmra.mxu0 %v6246_v14  ;;  %2425 = vmatpush.msra.mxu2 %v5827_v34  ;;  %v2037_v34 = vld [vmem:[%s6918_s17] sm:$0x7] }
 0x759   :  { %v2041_v56 = vperm.slane %v2037_v34, 2 }
 0x75a   :  { %2426 = vmatpush.msra.mxu2 %v5846_v24  ;;  %v2039_v24 = vperm.slane %v2037_v34, 0 }
 0x75c   :  { %2427 = vmatpush.msra.mxu2 %v5865_v49  ;;  %v2040_v49 = vperm.slane %v2037_v34, 1 }
 0x75e   :  { %2428 = vmatpush.msra.mxu2 %v5887_v25 }
 0x760   :  { %2429 = vmatpush.msra.mxu2 %v5910_v12 }
 0x762   :  { %2430 = vmatpush.msra.mxu2 %v5930_v9 }
 0x764   :  { %2431 = vmatpush.msra.mxu2 %v5953_v26 }
 0x766   :  { %2432 = vmatpush.msra.mxu2 %v5977_v31  ;;  %v7126_v31 = vld [vmem:[#allocation22_spill] sm:$0xff] }
 0x768   :  { %2433 = vmatpush.msra.mxu2 %v5987_v11 }
 0x76a   :  { %2434 = vmatpush.msra.mxu2 %v5995_v38  ;;  %v7127_v38 = vld [vmem:[#allocation15_spill] sm:$0xff] }
 0x76c   :  { %2435 = vmatpush.msra.mxu2 %v6017_v3 }
 0x76e   :  { %2436 = vmatpush.msra.mxu2 %v6033_v57 }
 0x770   :  { %2437 = vmatpush.msra.mxu2 %v6052_v22 }
 0x772   :  { %2438 = vmatpush.msra.mxu2 %v6070_v37 }
 0x774   :  { %2439 = vmatpush.msra.mxu2 %v6089_v1 }
 0x776   :  { %2440 = vmatpush.msra.mxu2 %v6108_v8 }
 0x7d5   :  { %v2102_v44 = vpop.f32.mrf.mxu0 }
 0x7d6   :  { %v2103_v15 = vadd.f32 %v2102_v44, %v2041_v56  ;;  %v7131_v56 = vld [vmem:[#allocation19_spill] sm:$0xff] }
 0x7da   :  { %v2062_v25 = vpop.f32.mrf.mxu2  ;;  %v2082_v12 = vpop.f32.mrf.mxu3 }
 0x7db   :  { %v2063_v9 = vadd.f32 %v2062_v25, %v2039_v24  ;;  %v2083_v26 = vadd.f32 %v2082_v12, %v2040_v49 }
 0x7dd   :  { %v2105_v11 = vadd.f32 %v2063_v9, %v7126_v31  ;;  %v2125_v3 = vadd.f32 %v2083_v26, %v7127_v38 }
 0x7df   :  { %v3610_v57 = vmul.f32 -1.442695, %v2105_v11  ;;  %v3611_v22 = vmul.f32 -1.442695, %v2125_v3  ;;  %v2211_v11 = vperm.slane %v2207_v4, 2  ;;  %v6375_v4 = vld [vmem:[%s6917_s16 + $0x110] sm:$0xff] }
 0x7e1   :  { %3840 = vpow2.f32 %v3610_v57 }
 0x7e2   :  { %3842 = vpow2.f32 %v3611_v22 }
 0x7e7   :  { %v3841_v37 = vpop.eup %3840 }
 0x7e8   :  { %v3843_v1 = vpop.eup %3842  ;;  %v2109_v8 = vadd.f32 1.0, %v3841_v37 }
 0x7e9   :  { %v2129_v10 = vadd.f32 1.0, %v3843_v1 }
 0x7ea   :  { %3844 = vrcp.f32 %v2109_v8  ;;  %v2121_v61 = vand.u32 2147483648, %v2109_v8  ;;  %v2119_v63 = vand.u32 2147483647, %v2109_v8  ;;  %vm2115_vm9 = vweird.f32 %v2109_v8 }
 0x7eb   :  { %3846 = vrcp.f32 %v2129_v10  ;;  %v2141_v39 = vand.u32 2147483648, %v2129_v10  ;;  %vm2135_vm13 = vweird.f32 %v2129_v10  ;;  %v2139_v45 = vand.u32 2147483647, %v2129_v10 }
 0x7ec   :  { %v2122_v58 = vor.u32 1.1754944e-38, %v2121_v61  ;;  %vm2120_vm11 = vcmp.eq.f32.partialorder %v2119_v63, 8.507059e+37 }
 0x7ed   :  { %v2142_v23 = vor.u32 1.1754944e-38, %v2141_v39  ;;  %vm2140_vm15 = vcmp.eq.f32.partialorder %v2139_v45, 8.507059e+37  ;;  %v6305_v39 = vld [vmem:[%s6917_s16 + $0x178] sm:$0xff]  ;;  %v6313_v45 = vld [vmem:[%s6917_s16 + $0x150] sm:$0xff] }
 0x7f0   :  { %v3845_v35 = vpop.eup %3844 }
 0x7f1   :  { %v3847_v47 = vpop.eup %3846  ;;  %v2111_v51 = vmul.f32 %v3845_v35, %v2109_v8  ;;  %vm2116_vm8 = vweird.f32 %v3845_v35 }
 0x7f2   :  { %v2131_v54 = vmul.f32 %v3847_v47, %v2129_v10  ;;  %vm2117_vm10 = vmor %vm2115_vm9, %vm2116_vm8  ;;  %vm2136_vm12 = vweird.f32 %v3847_v47 }
 0x7f3   :  { %v2112_v40 = vsub.f32 1.0, %v2111_v51  ;;  %vm2137_vm14 = vmor %vm2135_vm13, %vm2136_vm12 }
 0x7f4   :  { %v2132_v59 = vsub.f32 1.0, %v2131_v54 }
 0x7f5   :  { %v2113_v46 = vmul.f32 %v3845_v35, %v2112_v40 }
 0x7f6   :  { %v2133_v27 = vmul.f32 %v3847_v47, %v2132_v59 }
 0x7f7   :  { %v2114_v42 = vadd.f32 %v3845_v35, %v2113_v46 }
 0x7f8   :  { %v2134_v20 = vadd.f32 %v3847_v47, %v2133_v27 }
 0x7f9   :  { %v2118_v48 = vsel %vm2117_vm10, %v3845_v35, %v2114_v42 }
 0x7fa   :  { %v2123_v16 = vsel %vm2120_vm11, %v2122_v58, %v2118_v48  ;;  %v2138_v28 = vsel %vm2137_vm14, %v3847_v47, %v2134_v20  ;;  %v6295_v20 = vld [vmem:[%s6917_s16 + $0x168] sm:$0xff] }
 0x7fb   :  { %v2145_v21 = vmul.f32 %v2123_v16, %v2103_v15  ;;  %v2143_v53 = vsel %vm2140_vm15, %v2142_v23, %v2138_v28  ;;  %2555 = vmatpush.msrb.mxu3 %v6295_v20  ;;  %v6332_v28 = vld [vmem:[%s6917_s16 + $0x138] sm:$0xff]  ;;  %v6337_v23 = vld [vmem:[%s6917_s16 + $0x140] sm:$0xff] }
 0x7fc   :  { %v2148_v5 = vsub.f32 1.0, %v2143_v53  ;;  %v2150_v60 = vmul.f32 %v2143_v53, %v6246_v14  ;;  %v6342_v53 = vld [vmem:[%s6917_s16 + $0x148] sm:$0xff] }
 0x7fd   :  { %v2146_v6 = vadd.f32 %v2145_v21, %v7128_v30  ;;  %v6300_v21 = vld [vmem:[%s6917_s16 + $0x170] sm:$0xff]  ;;  %v6318_v30 = vld [vmem:[%s6917_s16 + $0x158] sm:$0xff]  ;;  %2556 = vmatpush.msrb.mxu3 %v6313_v45 }
 0x7fe   :  { %2575 = vmatpush.msra.mxu0 %v6300_v21 }
 0x7ff   :  { %3848 = vtanh.f32 %v2146_v6  ;;  %v6323_v6 = vld [vmem:[%s6917_s16 + $0x160] sm:$0xff]  ;;  %2557 = vmatpush.msrb.mxu3 %v6332_v28 }
 0x800   :  { %2576 = vmatpush.msra.mxu0 %v6318_v30 }
 0x802   :  { %2577 = vmatpush.msra.mxu0 %v6337_v23 }
 0x805   :  { %v3849_v32 = vpop.eup %3848 }
 0x806   :  { %v2149_v19 = vmul.f32 %v3849_v32, %v2148_v5  ;;  %v6351_v5 = vld [vmem:[%s6917_s16 + $0x120] sm:$0xff]  ;;  %v6356_v32 = vld [vmem:[%s6917_s16 + $0x128] sm:$0xff] }
 0x807   :  { %2558 = vmatpush.msrb.mxu3 %v6351_v5  ;;  %2578 = vmatpush.msra.mxu0 %v6356_v32 }
 0x808   :  { %v6274_v52 = vadd.f32 %v2150_v60, %v2149_v19  ;;  %v6361_v19 = vld [vmem:[%s6917_s16 + $0x130] sm:$0xff]  ;;  %v6370_v60 = vld [vmem:[%s6917_s16 + $0x108] sm:$0xff] }
 0x809   :  { %2559 = vmatpush.msrb.mxu3 %v6370_v60  ;;  %2579 = vmatpush.msra.mxu0 %v6375_v4 }
 0x80a   :  { %2231 = vmatmul.f32.vlgmr.msra.gmra.mxu1 %v6274_v52  ;;  %2251 = vmatmul.f32.vlgmr.msrb.gmra.mxu2 %v6274_v52 }
 0x80b   :  { %2271 = vmatmul.f32.vlgmr.msra.gmra.mxu3 %v6274_v52  ;;  %2595 = vmatpush.msra.mxu1 %v6305_v39 }
 0x80c   :  { %2725 = vmatpush.msrb.mxu2 %v6295_v20 }
 0x80d   :  { %2596 = vmatpush.msra.mxu1 %v6323_v6 }
 0x80e   :  { %2726 = vmatpush.msrb.mxu2 %v6313_v45 }
 0x80f   :  { %2597 = vmatpush.msra.mxu1 %v6342_v53 }
 0x810   :  { %2727 = vmatpush.msrb.mxu2 %v6332_v28 }
 0x811   :  { %2598 = vmatpush.msra.mxu1 %v6361_v19 }
 0x812   :  { %2728 = vmatpush.msrb.mxu2 %v6351_v5 }
 0x814   :  { %2729 = vmatpush.msrb.mxu2 %v6370_v60 }
 0x887   :  { %v2232_v17 = vpop.f32.mrf.mxu1 }
 0x888   :  { %v2233_v29 = vadd.f32 %v2232_v17, %v2209_v43  ;;  %v6380_v43 = vld [vmem:[%s6917_s16 + $0x118] sm:$0xff]  ;;  %v6386_v17 = vld [vmem:[%s6918_s17] sm:$0x7] }
 0x889   :  { %2599 = vmatpush.msra.mxu1 %v6380_v43 }
 0x88a   :  { %v2275_v7 = vadd.f32 %v2233_v29, %v7129_v0  ;;  %v6394_v29 = vld [vmem:[%s6917_s16 + $0xf0] sm:$0xff]  ;;  %v6399_v0 = vld [vmem:[%s6917_s16 + $0xf8] sm:$0xff] }
 0x88b   :  { %2560 = vmatpush.msrb.mxu3 %v6394_v29  ;;  %2580 = vmatpush.msra.mxu0 %v6399_v0 }
 0x88c   :  { %v3612_v55 = vmul.f32 -1.442695, %v2275_v7  ;;  %v6404_v7 = vld [vmem:[%s6917_s16 + $0x100] sm:$0xff]  ;;  %2730 = vmatpush.msrb.mxu2 %v6394_v29 }
 0x88d   :  { %v2252_v2 = vpop.f32.mrf.mxu2  ;;  %2600 = vmatpush.msra.mxu1 %v6404_v7  ;;  %2581 = vmatpush.msra.mxu0 %v6420_v33 }
 0x88e   :  { %3850 = vpow2.f32 %v3612_v55  ;;  %v2253_v18 = vadd.f32 %v2252_v2, %v2210_v62  ;;  %v2272_v57 = vpop.f32.mrf.mxu3  ;;  %v2379_v62 = vperm.slane %v6386_v17, 0  ;;  %v2380_v55 = vperm.slane %v6386_v17, 1  ;;  %v6415_v2 = vld [vmem:[%s6917_s16 + $0xd8] sm:$0xff] }
 0x88f   :  { %v2273_v10 = vadd.f32 %v2272_v57, %v2211_v11  ;;  %2561 = vmatpush.msrb.mxu3 %v6415_v2  ;;  %2731 = vmatpush.msrb.mxu2 %v6415_v2  ;;  %v6479_v57 = vld [vmem:[%s6917_s16 + $0x98] sm:$0xff] }
 0x890   :  { %v2295_v36 = vadd.f32 %v2253_v18, %v617_v13  ;;  %v6425_v13 = vld [vmem:[%s6917_s16 + $0xe8] sm:$0xff]  ;;  %v6434_v18 = vld [vmem:[%s6917_s16 + $0xc0] sm:$0xff] }
 0x891   :  { %2601 = vmatpush.msra.mxu1 %v6425_v13  ;;  %2562 = vmatpush.msrb.mxu3 %v6434_v18 }
 0x892   :  { %v3613_v50 = vmul.f32 -1.442695, %v2295_v36  ;;  %v6439_v36 = vld [vmem:[%s6917_s16 + $0xc8] sm:$0xff]  ;;  %2732 = vmatpush.msrb.mxu2 %v6434_v18 }
 0x893   :  { %2582 = vmatpush.msra.mxu0 %v6439_v36 }
 0x894   :  { %v3851_v34 = vpop.eup %3850  ;;  %3852 = vpow2.f32 %v3613_v50  ;;  %v6444_v50 = vld [vmem:[%s6917_s16 + $0xd0] sm:$0xff] }
 0x895   :  { %v2279_v24 = vadd.f32 1.0, %v3851_v34  ;;  %2602 = vmatpush.msra.mxu1 %v6444_v50 }
 0x897   :  { %3854 = vrcp.f32 %v2279_v24  ;;  %v2291_v31 = vand.u32 2147483648, %v2279_v24  ;;  %v2289_v3 = vand.u32 2147483647, %v2279_v24  ;;  %vm2285_vm1 = vweird.f32 %v2279_v24 }
 0x899   :  { %v2292_v1 = vor.u32 1.1754944e-38, %v2291_v31  ;;  %vm2290_vm3 = vcmp.eq.f32.partialorder %v2289_v3, 8.507059e+37  ;;  %v7132_v31 = vld [vmem:[#allocation26_spill] sm:$0xff] }
 0x89a   :  { %v3853_v49 = vpop.eup %3852 }
 0x89b   :  { %v2299_v25 = vadd.f32 1.0, %v3853_v49 }
 0x89d   :  { %v3855_v12 = vpop.eup %3854  ;;  %3856 = vrcp.f32 %v2299_v25  ;;  %v2311_v54 = vand.u32 2147483648, %v2299_v25  ;;  %v2309_v61 = vand.u32 2147483647, %v2299_v25  ;;  %vm2305_vm5 = vweird.f32 %v2299_v25 }
 0x89e   :  { %v2281_v9 = vmul.f32 %v3855_v12, %v2279_v24  ;;  %vm2286_vm0 = vweird.f32 %v3855_v12 }
 0x89f   :  { %vm2287_vm2 = vmor %vm2285_vm1, %vm2286_vm0  ;;  %v2312_v63 = vor.u32 1.1754944e-38, %v2311_v54  ;;  %vm2310_vm7 = vcmp.eq.f32.partialorder %v2309_v61, 8.507059e+37  ;;  %v6522_v54 = vld [vmem:[%s6917_s16 + $0x70] sm:$0xff] }
 0x8a0   :  { %v2282_v26 = vsub.f32 1.0, %v2281_v9  ;;  %v6458_v9 = vld [vmem:[%s6917_s16 + $0xb0] sm:$0xff] }
 0x8a1   :  { %2583 = vmatpush.msra.mxu0 %v6458_v9  ;;  %v6536_v61 = vld [vmem:[%s6917_s16 + $0x50] sm:$0xff] }
 0x8a2   :  { %v2283_v38 = vmul.f32 %v3855_v12, %v2282_v26  ;;  %v6463_v26 = vld [vmem:[%s6917_s16 + $0xb8] sm:$0xff] }
 0x8a3   :  { %v3857_v41 = vpop.eup %3856  ;;  %2603 = vmatpush.msra.mxu1 %v6463_v26  ;;  %2584 = vmatpush.msra.mxu0 %v6479_v57 }
 0x8a4   :  { %v2301_v22 = vmul.f32 %v3857_v41, %v2299_v25  ;;  %v2284_v37 = vadd.f32 %v3855_v12, %v2283_v38  ;;  %vm2306_vm4 = vweird.f32 %v3857_v41  ;;  %v7133_v38 = vld [vmem:[#allocation51_spill] sm:$0xff] }
 0x8a5   :  { %vm2307_vm6 = vmor %vm2305_vm5, %vm2306_vm4 }
 0x8a6   :  { %v2302_v8 = vsub.f32 1.0, %v2301_v22  ;;  %v2288_v35 = vsel %vm2287_vm2, %v3855_v12, %v2284_v37  ;;  %v6453_v12 = vld [vmem:[%s6917_s16 + $0xa8] sm:$0xff]  ;;  %v6484_v22 = vld [vmem:[%s6917_s16 + $0xa0] sm:$0xff] }
 0x8a7   :  { %v2293_v47 = vsel %vm2290_vm3, %v2292_v1, %v2288_v35  ;;  %2563 = vmatpush.msrb.mxu3 %v6453_v12  ;;  %2733 = vmatpush.msrb.mxu2 %v6453_v12  ;;  %v6506_v35 = vld [vmem:[%s6917_s16 + $0x88] sm:$0xff] }
 0x8a8   :  { %v2303_v51 = vmul.f32 %v3857_v41, %v2302_v8  ;;  %v2315_v40 = vmul.f32 %v2293_v47, %v2273_v10  ;;  %2604 = vmatpush.msra.mxu1 %v6484_v22  ;;  %v6493_v8 = vld [vmem:[%s6917_s16 + $0x78] sm:$0xff]  ;;  %v6498_v10 = vld [vmem:[%s6917_s16 + $0x80] sm:$0xff] }
 0x8a9   :  { %2585 = vmatpush.msra.mxu0 %v6498_v10  ;;  %v6512_v47 = vld [vmem:[%s6917_s16 + $0x60] sm:$0xff] }
 0x8aa   :  { %v2304_v59 = vadd.f32 %v3857_v41, %v2303_v51  ;;  %v2316_v46 = vadd.f32 %v2315_v40, %v7131_v56  ;;  %2605 = vmatpush.msra.mxu1 %v6506_v35  ;;  %v6517_v51 = vld [vmem:[%s6917_s16 + $0x68] sm:$0xff]  ;;  %v6550_v56 = vld [vmem:[%s6917_s16 + $0x30] sm:$0xff] }
 0x8ab   :  { %2586 = vmatpush.msra.mxu0 %v6517_v51  ;;  %v6531_v40 = vld [vmem:[%s6917_s16 + $0x48] sm:$0xff] }
 0x8ac   :  { %v2308_v44 = vsel %vm2307_vm6, %v3857_v41, %v2304_v59  ;;  %3858 = vtanh.f32 %v2316_v46  ;;  %v6474_v41 = vld [vmem:[%s6917_s16 + $0x90] sm:$0xff]  ;;  %2606 = vmatpush.msra.mxu1 %v6522_v54  ;;  %v6541_v59 = vld [vmem:[%s6917_s16 + $0x58] sm:$0xff] }
 0x8ad   :  { %v2313_v27 = vsel %vm2310_vm7, %v2312_v63, %v2308_v44  ;;  %2564 = vmatpush.msrb.mxu3 %v6474_v41  ;;  %2734 = vmatpush.msrb.mxu2 %v6474_v41  ;;  %v6555_v46 = vld [vmem:[%s6917_s16 + $0x38] sm:$0xff]  ;;  %v6560_v63 = vld [vmem:[%s6917_s16 + $0x40] sm:$0xff] }
 0x8ae   :  { %v2318_v42 = vsub.f32 1.0, %v2313_v27  ;;  %v2320_v48 = vmul.f32 %v2313_v27, %v6274_v52  ;;  %2587 = vmatpush.msra.mxu0 %v6536_v61  ;;  %2607 = vmatpush.msra.mxu1 %v6541_v59  ;;  %v6568_v44 = vld [vmem:[%s6917_s16 + $0x18] sm:$0xff]  ;;  %v6573_v27 = vld [vmem:[%s6917_s16 + $0x20] sm:$0xff] }
 0x8af   :  { %2565 = vmatpush.msrb.mxu3 %v6493_v8  ;;  %2735 = vmatpush.msrb.mxu2 %v6493_v8 }
 0x8b0   :  { %2588 = vmatpush.msra.mxu0 %v6555_v46  ;;  %2608 = vmatpush.msra.mxu1 %v6560_v63 }
 0x8b1   :  { %2566 = vmatpush.msrb.mxu3 %v6512_v47  ;;  %2736 = vmatpush.msrb.mxu2 %v6512_v47 }
 0x8b2   :  { %v3859_v58 = vpop.eup %3858  ;;  %2589 = vmatpush.msra.mxu0 %v6573_v27 }
 0x8b3   :  { %v2319_v15 = vmul.f32 %v3859_v58, %v2318_v42  ;;  %2567 = vmatpush.msrb.mxu3 %v6531_v40  ;;  %2737 = vmatpush.msrb.mxu2 %v6531_v40  ;;  %v6578_v42 = vld [vmem:[%s6917_s16 + $0x28] sm:$0xff] }
 0x8b4   :  { %2609 = vmatpush.msra.mxu1 %v6578_v42 }
 0x8b5   :  { %v6287_v16 = vadd.f32 %v2320_v48, %v2319_v15  ;;  %2568 = vmatpush.msrb.mxu3 %v6550_v56  ;;  %v6584_v15 = vld [vmem:[%s6917_s16] sm:$0xff]  ;;  %v6589_v48 = vld [vmem:[%s6917_s16 + $0x8] sm:$0xff]  ;;  %2738 = vmatpush.msrb.mxu2 %v6550_v56 }
 0x8b6   :  { %2590 = vmatpush.msra.mxu0 %v6589_v48 }
 0x8b7   :  { %2401 = vmatmul.f32.vlgmr.msrb.gmra.mxu0 %v6287_v16  ;;  %2421 = vmatmul.f32.vlgmr.msrb.gmra.mxu1 %v6287_v16 }
 0x8b8   :  { %2441 = vmatmul.f32.vlgmr.msra.gmra.mxu2 %v6287_v16  ;;  %2569 = vmatpush.msrb.mxu3 %v6568_v44 }
 0x8b9   :  { %2739 = vmatpush.msrb.mxu2 %v6568_v44  ;;  %2765 = vmatpush.msrb.mxu0 %v6305_v39 }
 0x8ba   :  { %2570 = vmatpush.msrb.mxu3 %v6584_v15 }
 0x8bb   :  { %2740 = vmatpush.msrb.mxu2 %v6584_v15  ;;  %2766 = vmatpush.msrb.mxu0 %v6323_v6 }
 0x8bc   :  { %2745 = vmatpush.msra.mxu3 %v6300_v21 }
 0x8bd   :  { %2915 = vmatpush.msra.mxu2 %v6300_v21  ;;  %2767 = vmatpush.msrb.mxu0 %v6342_v53 }
 0x8be   :  { %2746 = vmatpush.msra.mxu3 %v6318_v30 }
 0x8bf   :  { %2916 = vmatpush.msra.mxu2 %v6318_v30  ;;  %2768 = vmatpush.msrb.mxu0 %v6361_v19 }
 0x8c0   :  { %2747 = vmatpush.msra.mxu3 %v6337_v23 }
 0x8c1   :  { %2917 = vmatpush.msra.mxu2 %v6337_v23  ;;  %2769 = vmatpush.msrb.mxu0 %v6380_v43 }
 0x8c2   :  { %2748 = vmatpush.msra.mxu3 %v6356_v32 }
 0x8c3   :  { %2918 = vmatpush.msra.mxu2 %v6356_v32  ;;  %2770 = vmatpush.msrb.mxu0 %v6404_v7 }
 0x8c4   :  { %2749 = vmatpush.msra.mxu3 %v6375_v4 }
 0x8c5   :  { %2919 = vmatpush.msra.mxu2 %v6375_v4  ;;  %2771 = vmatpush.msrb.mxu0 %v6425_v13 }
 0x8c6   :  { %2750 = vmatpush.msra.mxu3 %v6399_v0 }
 0x8c7   :  { %2920 = vmatpush.msra.mxu2 %v6399_v0  ;;  %2772 = vmatpush.msrb.mxu0 %v6444_v50 }
 0x8c8   :  { %2751 = vmatpush.msra.mxu3 %v6420_v33 }
 0x8c9   :  { %2921 = vmatpush.msra.mxu2 %v6420_v33  ;;  %2773 = vmatpush.msrb.mxu0 %v6463_v26 }
 0x8ca   :  { %2752 = vmatpush.msra.mxu3 %v6439_v36 }
 0x8cb   :  { %2922 = vmatpush.msra.mxu2 %v6439_v36  ;;  %2774 = vmatpush.msrb.mxu0 %v6484_v22 }
 0x8cc   :  { %2753 = vmatpush.msra.mxu3 %v6458_v9 }
 0x8cd   :  { %2923 = vmatpush.msra.mxu2 %v6458_v9  ;;  %2775 = vmatpush.msrb.mxu0 %v6506_v35 }
 0x8ce   :  { %2754 = vmatpush.msra.mxu3 %v6479_v57 }
 0x8cf   :  { %2924 = vmatpush.msra.mxu2 %v6479_v57  ;;  %2776 = vmatpush.msrb.mxu0 %v6522_v54 }
 0x8d0   :  { %2755 = vmatpush.msra.mxu3 %v6498_v10 }
 0x8d1   :  { %2925 = vmatpush.msra.mxu2 %v6498_v10  ;;  %2777 = vmatpush.msrb.mxu0 %v6541_v59 }
 0x8d2   :  { %2756 = vmatpush.msra.mxu3 %v6517_v51 }
 0x8d3   :  { %2926 = vmatpush.msra.mxu2 %v6517_v51  ;;  %2778 = vmatpush.msrb.mxu0 %v6560_v63  ;;  %v3720_v51 = vld [vmem:[%s6919_s18 + $0x20] sm:$0xff] }
 0x8d4   :  { %2757 = vmatpush.msra.mxu3 %v6536_v61 }
 0x8d5   :  { %2927 = vmatpush.msra.mxu2 %v6536_v61  ;;  %2779 = vmatpush.msrb.mxu0 %v6578_v42 }
 0x8d6   :  { %2758 = vmatpush.msra.mxu3 %v6555_v46 }
 0x8d7   :  { %2928 = vmatpush.msra.mxu2 %v6555_v46 }
 0x8d8   :  { %2759 = vmatpush.msra.mxu3 %v6573_v27 }
 0x8d9   :  { %2929 = vmatpush.msra.mxu2 %v6573_v27 }
 0x8da   :  { %2760 = vmatpush.msra.mxu3 %v6589_v48 }
 0x8db   :  { %2930 = vmatpush.msra.mxu2 %v6589_v48  ;;  %v3716_v48 = vld [vmem:[%s6919_s18] sm:$0xff] }
 0x934   :  { %v2402_v34 = vpop.f32.mrf.mxu0  ;;  %v2422_v24 = vpop.f32.mrf.mxu1 }
 0x935   :  { %v2403_v49 = vadd.f32 %v2402_v34, %v2379_v62  ;;  %v2423_v25 = vadd.f32 %v2422_v24, %v2380_v55  ;;  %v6597_v34 = vld [vmem:[%s6917_s16 + $0x10] sm:$0xff] }
 0x936   :  { %2610 = vmatpush.msra.mxu1 %v6597_v34  ;;  %2780 = vmatpush.msrb.mxu0 %v6597_v34 }
 0x937   :  { %v2445_v11 = vadd.f32 %v2403_v49, %v7132_v31  ;;  %v2465_v3 = vadd.f32 %v2423_v25, %v7133_v38 }
 0x938   :  { %2895 = vmatpush.msrb.mxu1 %v6295_v20 }
 0x939   :  { %v3614_v37 = vmul.f32 -1.442695, %v2445_v11  ;;  %v3615_v1 = vmul.f32 -1.442695, %v2465_v3 }
 0x93a   :  { %2896 = vmatpush.msrb.mxu1 %v6313_v45 }
 0x93b   :  { %3860 = vpow2.f32 %v3614_v37  ;;  %v2442_v3 = vpop.f32.mrf.mxu2 }
 0x93c   :  { %3862 = vpow2.f32 %v3615_v1  ;;  %2897 = vmatpush.msrb.mxu1 %v6332_v28  ;;  %v2381_v28 = vperm.slane %v6386_v17, 2 }
 0x93e   :  { %2898 = vmatpush.msrb.mxu1 %v6351_v5 }
 0x940   :  { %2899 = vmatpush.msrb.mxu1 %v6370_v60  ;;  %v2443_v60 = vadd.f32 %v2442_v3, %v2381_v28 }
 0x941   :  { %v3861_v58 = vpop.eup %3860 }
 0x942   :  { %v3863_v62 = vpop.eup %3862  ;;  %v2449_v55 = vadd.f32 1.0, %v3861_v58  ;;  %2900 = vmatpush.msrb.mxu1 %v6394_v29 }
 0x943   :  { %v6599_v24 = vadd.f32 1.0, %v3863_v62 }
 0x944   :  { %3864 = vrcp.f32 %v2449_v55  ;;  %v2461_v30 = vand.u32 2147483648, %v2449_v55  ;;  %v2459_v38 = vand.u32 2147483647, %v2449_v55  ;;  %vm2455_vm9 = vweird.f32 %v2449_v55  ;;  %2901 = vmatpush.msrb.mxu1 %v6415_v2  ;;  %v7134_v2 = vld [vmem:[#allocation52_spill] sm:$0xff] }
 0x945   :  { %3866 = vrcp.f32 %v6599_v24  ;;  %v2481_v29 = vand.u32 2147483648, %v6599_v24  ;;  %vm2475_vm13 = vweird.f32 %v6599_v24  ;;  %v2479_v0 = vand.u32 2147483647, %v6599_v24 }
 0x946   :  { %v2462_v32 = vor.u32 1.1754944e-38, %v2461_v30  ;;  %vm2460_vm11 = vcmp.eq.f32.partialorder %v2459_v38, 8.507059e+37  ;;  %2902 = vmatpush.msrb.mxu1 %v6434_v18 }
 0x947   :  { %v2482_v18 = vor.u32 1.1754944e-38, %v2481_v29  ;;  %vm2480_vm15 = vcmp.eq.f32.partialorder %v2479_v0, 8.507059e+37 }
 0x948   :  { %2903 = vmatpush.msrb.mxu1 %v6453_v12 }
 0x94a   :  { %v3865_v49 = vpop.eup %3864  ;;  %2904 = vmatpush.msrb.mxu1 %v6474_v41 }
 0x94b   :  { %v6618_v25 = vpop.eup %3866  ;;  %v2451_v31 = vmul.f32 %v3865_v49, %v2449_v55  ;;  %vm2456_vm8 = vweird.f32 %v3865_v49 }
 0x94c   :  { %v2471_v20 = vmul.f32 %v6618_v25, %v6599_v24  ;;  %vm2457_vm10 = vmor %vm2455_vm9, %vm2456_vm8  ;;  %vm2476_vm12 = vweird.f32 %v6618_v25  ;;  %2905 = vmatpush.msrb.mxu1 %v6493_v8 }
 0x94d   :  { %v2452_v21 = vsub.f32 1.0, %v2451_v31  ;;  %vm2477_vm14 = vmor %vm2475_vm13, %vm2476_vm12 }
 0x94e   :  { %v2472_v45 = vsub.f32 1.0, %v2471_v20  ;;  %2906 = vmatpush.msrb.mxu1 %v6512_v47 }
 0x94f   :  { %v2453_v11 = vmul.f32 %v3865_v49, %v2452_v21 }
 0x950   :  { %v2473_v23 = vmul.f32 %v6618_v25, %v2472_v45  ;;  %2907 = vmatpush.msrb.mxu1 %v6531_v40 }
 0x951   :  { %v2454_v5 = vadd.f32 %v3865_v49, %v2453_v11 }
 0x952   :  { %v2474_v37 = vadd.f32 %v6618_v25, %v2473_v23  ;;  %2908 = vmatpush.msrb.mxu1 %v6550_v56 }
 0x953   :  { %v2458_v17 = vsel %vm2457_vm10, %v3865_v49, %v2454_v5 }
 0x954   :  { %v2463_v4 = vsel %vm2460_vm11, %v2462_v32, %v2458_v17  ;;  %v2478_v33 = vsel %vm2477_vm14, %v6618_v25, %v2474_v37  ;;  %2909 = vmatpush.msrb.mxu1 %v6568_v44 }
 0x955   :  { %v2485_v1 = vmul.f32 %v2463_v4, %v2443_v60  ;;  %v2483_v36 = vsel %vm2480_vm15, %v2482_v18, %v2478_v33  ;;  %v7137_v4 = vld [vmem:[#allocation54_spill] sm:$0xff] }
 0x956   :  { %v2488_v12 = vsub.f32 1.0, %v2483_v36  ;;  %v2490_v57 = vmul.f32 %v2483_v36, %v6287_v16  ;;  %2910 = vmatpush.msrb.mxu1 %v6584_v15 }
 0x957   :  { %v2486_v58 = vadd.f32 %v2485_v1, %v7134_v2 }
 0x959   :  { %3868 = vtanh.f32 %v2486_v58 }
 0x95f   :  { %v3869_v9 = vpop.eup %3868 }
 0x960   :  { %v2489_v41 = vmul.f32 %v3869_v9, %v2488_v12  ;;  %v3011_v12 = vpack.c.bf16 %v6274_v52, %v6246_v14 }
 0x962   :  { %v6678_v8 = vadd.f32 %v2490_v57, %v2489_v41  ;;  %v2717_v57 = vld [vmem:[%s6918_s17] sm:$0x7] }
 0x964   :  { %2571 = vmatmul.f32.vlgmr.msrb.gmra.mxu3 %v6678_v8  ;;  %2591 = vmatmul.f32.vlgmr.msra.gmra.mxu0 %v6678_v8  ;;  %v3012_v9 = vpack.c.bf16 %v6678_v8, %v6287_v16  ;;  %v7139_v16 = vld [vmem:[#allocation55_spill] sm:$0xff] }
 0x965   :  { %2611 = vmatmul.f32.vlgmr.msra.gmra.mxu1 %v6678_v8  ;;  %2935 = vmatpush.msrb.mxu3 %v6305_v39  ;;  %v2547_v39 = vld [vmem:[%s6918_s17] sm:$0x7] }
 0x966   :  { %v2551_v31 = vperm.slane %v2547_v39, 2 }
 0x967   :  { %2936 = vmatpush.msrb.mxu3 %v6323_v6  ;;  %v2550_v6 = vperm.slane %v2547_v39, 1 }
 0x969   :  { %2937 = vmatpush.msrb.mxu3 %v6342_v53  ;;  %v3723_v53 = vld [vmem:[%s6919_s18 + $0x38] sm:$0xff] }
 0x96a   :  { %3083 = vmatpush.bf16.msra.mxu0 %v3723_v53 }
 0x96b   :  { %2938 = vmatpush.msrb.mxu3 %v6361_v19 }
 0x96d   :  { %2939 = vmatpush.msrb.mxu3 %v6380_v43 }
 0x96f   :  { %2940 = vmatpush.msrb.mxu3 %v6404_v7  ;;  %v3722_v7 = vld [vmem:[%s6919_s18 + $0x30] sm:$0xff] }
 0x970   :  { %3084 = vmatpush.bf16.msra.mxu0 %v3722_v7  ;;  %v7138_v7 = vld [vmem:[#allocation30_spill] sm:$0xff] }
 0x971   :  { %2941 = vmatpush.msrb.mxu3 %v6425_v13  ;;  %v7135_v13 = vld [vmem:[#allocation53_spill] sm:$0xff] }
 0x973   :  { %2942 = vmatpush.msrb.mxu3 %v6444_v50 }
 0x975   :  { %2943 = vmatpush.msrb.mxu3 %v6463_v26  ;;  %v2549_v26 = vperm.slane %v2547_v39, 0  ;;  %v2719_v39 = vperm.slane %v2717_v57, 0 }
 0x977   :  { %2944 = vmatpush.msrb.mxu3 %v6484_v22 }
 0x979   :  { %2945 = vmatpush.msrb.mxu3 %v6506_v35  ;;  %v3721_v35 = vld [vmem:[%s6919_s18 + $0x28] sm:$0xff] }
 0x97a   :  { %3085 = vmatpush.bf16.msra.mxu0 %v3721_v35 }
 0x97b   :  { %2946 = vmatpush.msrb.mxu3 %v6522_v54  ;;  %v7136_v54 = vld [vmem:[#allocation28_spill] sm:$0xff] }
 0x97d   :  { %2947 = vmatpush.msrb.mxu3 %v6541_v59  ;;  %v3719_v59 = vld [vmem:[%s6919_s18 + $0x18] sm:$0xff] }
 0x97e   :  { %3086 = vmatpush.bf16.msra.mxu0 %v3720_v51 }
 0x97f   :  { %2948 = vmatpush.msrb.mxu3 %v6560_v63  ;;  %v3718_v63 = vld [vmem:[%s6919_s18 + $0x10] sm:$0xff] }
 0x981   :  { %2949 = vmatpush.msrb.mxu3 %v6578_v42  ;;  %v3717_v42 = vld [vmem:[%s6919_s18 + $0x8] sm:$0xff] }
 0x982   :  { %3087 = vmatpush.bf16.msra.mxu0 %v3719_v59 }
 0x983   :  { %2950 = vmatpush.msrb.mxu3 %v6597_v34 }
 0x986   :  { %3088 = vmatpush.bf16.msra.mxu0 %v3718_v63 }
 0x98a   :  { %3089 = vmatpush.bf16.msra.mxu0 %v3717_v42 }
 0x98e   :  { %3090 = vmatpush.bf16.msra.mxu0 %v3716_v48 }
 0x9e1   :  { %v2592_v19 = vpop.f32.mrf.mxu0 }
 0x9e2   :  { %v2593_v43 = vadd.f32 %v2592_v19, %v2550_v6  ;;  %v2612_v30 = vpop.f32.mrf.mxu1  ;;  %v2720_v6 = vperm.slane %v2717_v57, 1 }
 0x9e3   :  { %v2613_v38 = vadd.f32 %v2612_v30, %v2551_v31 }
 0x9e4   :  { %v2635_v50 = vadd.f32 %v2593_v43, %v7135_v13  ;;  %v6753_v43 = vld [vmem:[%s6920_s19] ss:$0 sm:$0xff] }
 0x9e6   :  { %v3617_v22 = vmul.f32 -1.442695, %v2635_v50 }
 0x9e7   :  { %v2572_v10 = vpop.f32.mrf.mxu3 }
 0x9e8   :  { %3870 = vpow2.f32 %v3617_v22  ;;  %v2573_v47 = vadd.f32 %v2572_v10, %v2549_v26 }
 0x9ea   :  { %v2615_v40 = vadd.f32 %v2573_v47, %v7136_v54 }
 0x9ec   :  { %v3616_v61 = vmul.f32 -1.442695, %v2615_v40 }
 0x9ee   :  { %v3871_v56 = vpop.eup %3870  ;;  %3872 = vpow2.f32 %v3616_v61 }
 0x9ef   :  { %v2639_v46 = vadd.f32 1.0, %v3871_v56 }
 0x9f1   :  { %3874 = vrcp.f32 %v2639_v46  ;;  %v2651_v32 = vand.u32 2147483648, %v2639_v46  ;;  %vm2645_vm5 = vweird.f32 %v2639_v46  ;;  %v2649_v17 = vand.u32 2147483647, %v2639_v46 }
 0x9f3   :  { %v2652_v1 = vor.u32 1.1754944e-38, %v2651_v32  ;;  %vm2650_vm7 = vcmp.eq.f32.partialorder %v2649_v17, 8.507059e+37 }
 0x9f4   :  { %v3873_v44 = vpop.eup %3872 }
 0x9f5   :  { %v2619_v27 = vadd.f32 1.0, %v3873_v44 }
 0x9f7   :  { %3876 = vrcp.f32 %v2619_v27  ;;  %v3875_v15 = vpop.eup %3874  ;;  %v2631_v25 = vand.u32 2147483648, %v2619_v27  ;;  %v2629_v21 = vand.u32 2147483647, %v2619_v27  ;;  %vm2625_vm1 = vweird.f32 %v2619_v27 }
 0x9f8   :  { %v2641_v62 = vmul.f32 %v3875_v15, %v2639_v46  ;;  %vm2646_vm4 = vweird.f32 %v3875_v15 }
 0x9f9   :  { %v2632_v11 = vor.u32 1.1754944e-38, %v2631_v25  ;;  %vm2630_vm3 = vcmp.eq.f32.partialorder %v2629_v21, 8.507059e+37  ;;  %vm2647_vm6 = vmor %vm2645_vm5, %vm2646_vm4 }
 0x9fa   :  { %v2642_v24 = vsub.f32 1.0, %v2641_v62  ;;  %v2721_v62 = vperm.slane %v2717_v57, 2 }
 0x9fc   :  { %v2643_v45 = vmul.f32 %v3875_v15, %v2642_v24 }
 0x9fd   :  { %v3877_v55 = vpop.eup %3876 }
 0x9fe   :  { %v2621_v34 = vmul.f32 %v3877_v55, %v2619_v27  ;;  %vm2626_vm0 = vweird.f32 %v3877_v55  ;;  %v2644_v5 = vadd.f32 %v3875_v15, %v2643_v45 }
 0x9ff   :  { %vm2627_vm2 = vmor %vm2625_vm1, %vm2626_vm0 }
 0xa00   :  { %v2622_v49 = vsub.f32 1.0, %v2621_v34  ;;  %v2648_v29 = vsel %vm2647_vm6, %v3875_v15, %v2644_v5 }
 0xa01   :  { %v2653_v0 = vsel %vm2650_vm7, %v2652_v1, %v2648_v29 }
 0xa02   :  { %v2623_v20 = vmul.f32 %v3877_v55, %v2622_v49  ;;  %v2658_v2 = vsub.f32 1.0, %v2653_v0  ;;  %v2660_v18 = vmul.f32 %v2653_v0, %v6678_v8 }
 0xa04   :  { %v2624_v28 = vadd.f32 %v3877_v55, %v2623_v20 }
 0xa06   :  { %v2628_v23 = vsel %vm2627_vm2, %v3877_v55, %v2624_v28 }
 0xa07   :  { %v2633_v3 = vsel %vm2630_vm3, %v2632_v11, %v2628_v23 }
 0xa08   :  { %v2655_v60 = vmul.f32 %v2633_v3, %v2613_v38  ;;  %v7140_v3 = vld [vmem:[#allocation56_spill] sm:$0xff] }
 0xa0a   :  { %v2656_v37 = vadd.f32 %v2655_v60, %v7137_v4 }
 0xa0c   :  { %3878 = vtanh.f32 %v2656_v37 }
 0xa12   :  { %v3879_v58 = vpop.eup %3878 }
 0xa13   :  { %v2659_v33 = vmul.f32 %v3879_v58, %v2658_v2  ;;  %v2887_v58 = vld [vmem:[%s6918_s17] sm:$0x7] }
 0xa15   :  { %v6738_v36 = vadd.f32 %v2660_v18, %v2659_v33  ;;  %v2889_v33 = vperm.slane %v2887_v58, 0 }
 0xa17   :  { %2741 = vmatmul.f32.vlgmr.msrb.gmra.mxu2 %v6738_v36  ;;  %2761 = vmatmul.f32.vlgmr.msra.gmra.mxu3 %v6738_v36 }
 0xa18   :  { %2781 = vmatmul.f32.vlgmr.msrb.gmra.mxu0 %v6738_v36 }
 0xa20   :  { %3091 = vmatmul.bf16.vlgmr.msra.gmra.mxu0 %v3011_v12 }
 0xa30   :  { %3096 = vmatmul.bf16.gmra.mxu0 %v3012_v9 }
 0xa95   :  { %v2782_v41 = vpop.f32.mrf.mxu0 }
 0xa96   :  { %v2783_v21 = vadd.f32 %v2782_v41, %v2721_v62  ;;  %v7141_v41 = vld [vmem:[#allocation33_spill] sm:$0xff] }
 0xa97   :  { %v6804_v62 = vld [vmem:[%s6995_s30 + $0x30] sm:$0xff] }
 0xa9a   :  { %v2742_v53 = vpop.f32.mrf.mxu2  ;;  %v2762_v19 = vpop.f32.mrf.mxu3 }
 0xa9b   :  { %v2743_v14 = vadd.f32 %v2742_v53, %v2719_v39  ;;  %v2763_v52 = vadd.f32 %v2762_v19, %v2720_v6  ;;  %v2890_v6 = vperm.slane %v2887_v58, 1 }
 0xa9d   :  { %v2785_v13 = vadd.f32 %v2743_v14, %v7138_v7  ;;  %v2805_v8 = vadd.f32 %v2763_v52, %v7139_v16  ;;  %v3092_v50 = vpop.f32.mrf.mxu0  ;;  %v7142_v14 = vld [vmem:[#allocation57_spill] sm:$0xff] }
 0xa9e   :  { %v6758_v26 = vadd.f32 %v6753_v43, %v3092_v50 }
 0xa9f   :  { %v3618_v22 = vmul.f32 -1.442695, %v2785_v13  ;;  %v3619_v10 = vmul.f32 -1.442695, %v2805_v8 }
 0xaa0   :  { %3118 = vmax.xlane.f32.xlu2 %v6758_v26 }
 0xaa1   :  { %3880 = vpow2.f32 %v3618_v22 }
 0xaa2   :  { %3882 = vpow2.f32 %v3619_v10 }
 0xaa5   :  { %v3094_v35 = vpop.f32.mrf.mxu0 }
 0xaa6   :  { %v6762_v47 = vadd.f32 %v6753_v43, %v3094_v35 }
 0xaa7   :  { %v3881_v51 = vpop.eup %3880 }
 0xaa8   :  { %v3883_v54 = vpop.eup %3882  ;;  %v2789_v40 = vadd.f32 1.0, %v3881_v51  ;;  %3120 = vmax.xlane.f32.xlu0 %v6762_v47 }
 0xaa9   :  { %v2809_v61 = vadd.f32 1.0, %v3883_v54 }
 0xaaa   :  { %3884 = vrcp.f32 %v2789_v40  ;;  %v2801_v15 = vand.u32 2147483648, %v2789_v40  ;;  %v2799_v34 = vand.u32 2147483647, %v2789_v40  ;;  %vm2795_vm9 = vweird.f32 %v2789_v40 }
 0xaab   :  { %3886 = vrcp.f32 %v2809_v61  ;;  %v2821_v38 = vand.u32 2147483648, %v2809_v61  ;;  %vm2815_vm13 = vweird.f32 %v2809_v61  ;;  %v2819_v23 = vand.u32 2147483647, %v2809_v61 }
 0xaac   :  { %v2802_v20 = vor.u32 1.1754944e-38, %v2801_v15  ;;  %vm2800_vm11 = vcmp.eq.f32.partialorder %v2799_v34, 8.507059e+37 }
 0xaad   :  { %v3097_v59 = vpop.f32.mrf.mxu0  ;;  %v2822_v60 = vor.u32 1.1754944e-38, %v2821_v38  ;;  %vm2820_vm15 = vcmp.eq.f32.partialorder %v2819_v23, 8.507059e+37 }
 0xaae   :  { %v6766_v56 = vadd.f32 %v6753_v43, %v3097_v59  ;;  %v2891_v59 = vperm.slane %v2887_v58, 2 }
 0xab0   :  { %v3885_v46 = vpop.eup %3884  ;;  %3122 = vmax.xlane.f32.xlu1 %v6766_v56 }
 0xab1   :  { %v3887_v63 = vpop.eup %3886  ;;  %v2791_v44 = vmul.f32 %v3885_v46, %v2789_v40  ;;  %vm2796_vm8 = vweird.f32 %v3885_v46 }
 0xab2   :  { %v2811_v27 = vmul.f32 %v3887_v63, %v2809_v61  ;;  %vm2797_vm10 = vmor %vm2795_vm9, %vm2796_vm8  ;;  %vm2816_vm12 = vweird.f32 %v3887_v63  ;;  %v6798_v61 = vld [vmem:[%s6995_s30 + $0x20] sm:$0xff] }
 0xab3   :  { %v2792_v42 = vsub.f32 1.0, %v2791_v44  ;;  %vm2817_vm14 = vmor %vm2815_vm13, %vm2816_vm12 }
 0xab4   :  { %v2812_v48 = vsub.f32 1.0, %v2811_v27 }
 0xab5   :  { %v2793_v55 = vmul.f32 %v3885_v46, %v2792_v42  ;;  %v3099_v24 = vpop.f32.mrf.mxu0 }
 0xab6   :  { %v2813_v49 = vmul.f32 %v3887_v63, %v2812_v48  ;;  %v6770_v25 = vadd.f32 %v6753_v43, %v3099_v24 }
 0xab7   :  { %v2794_v31 = vadd.f32 %v3885_v46, %v2793_v55 }
 0xab8   :  { %3124 = vmax.xlane.f32.xlu2 %v6770_v25  ;;  %v2814_v28 = vadd.f32 %v3887_v63, %v2813_v49 }
 0xab9   :  { %v2798_v45 = vsel %vm2797_vm10, %v3885_v46, %v2794_v31 }
 0xaba   :  { %v2803_v30 = vsel %vm2800_vm11, %v2802_v20, %v2798_v45  ;;  %v2818_v32 = vsel %vm2817_vm14, %v3887_v63, %v2814_v28 }
 0xabb   :  { %v2825_v11 = vmul.f32 %v2803_v30, %v2783_v21  ;;  %v2823_v17 = vsel %vm2820_vm15, %v2822_v60, %v2818_v32  ;;  %v7143_v30 = vld [vmem:[#allocation58_spill] sm:$0xff]  ;;  %v3192_v60 = vpop.permute.xlu2 %3191 }
 0xabc   :  { %v2828_v4 = vsub.f32 1.0, %v2823_v17  ;;  %v2830_v1 = vmul.f32 %v2823_v17, %v6738_v36 }
 0xabd   :  { %v2826_v5 = vadd.f32 %v2825_v11, %v7140_v3 }
 0xabf   :  { %3888 = vtanh.f32 %v2826_v5 }
 0xac5   :  { %v3889_v37 = vpop.eup %3888 }
 0xac6   :  { %v2829_v29 = vmul.f32 %v3889_v37, %v2828_v4 }
 0xac8   :  { %v6775_v0 = vadd.f32 %v2830_v1, %v2829_v29  ;;  %v6809_v1 = vpop.permute.xlu1 %3197 }
 0xaca   :  { %2911 = vmatmul.f32.vlgmr.msrb.gmra.mxu1 %v6775_v0  ;;  %2931 = vmatmul.f32.vlgmr.msra.gmra.mxu2 %v6775_v0  ;;  %v3013_v2 = vpack.c.bf16 %v6775_v0, %v6738_v36 }
 0xacb   :  { %2951 = vmatmul.f32.vlgmr.msrb.gmra.mxu3 %v6775_v0 }
 0xacc   :  { %3101 = vmatmul.bf16.gmra.mxu0 %v3013_v2 }
 0xb13   :  { %v6811_v2 = vpop.xlane.xlu2 %3118 }
 0xb14   :  { %v3132_v58 = vsub.f32 %v6758_v26, %v6811_v2 }
 0xb47   :  { %v2912_v18 = vpop.f32.mrf.mxu1 }
 0xb48   :  { %v2913_v12 = vadd.f32 %v2912_v18, %v2889_v33  ;;  %v6815_v33 = vpop.xlane.xlu1 %3122  ;;  %v3139_v18 = vmul.f32 1.442695, %v3132_v58 }
 0xb49   :  { %v3102_v9 = vpop.f32.mrf.mxu0 }
 0xb4a   :  { %v2955_v57 = vadd.f32 %v2913_v12, %v7141_v41  ;;  %v6787_v39 = vadd.f32 %v6753_v43, %v3102_v9  ;;  %v3134_v12 = vsub.f32 %v6766_v56, %v6815_v33  ;;  %v6819_v9 = vpop.xlane.xlu2 %3124 }
 0xb4c   :  { %v3620_v53 = vmul.f32 -1.442695, %v2955_v57  ;;  %3126 = vmax.xlane.f32.xlu2 %v6787_v39  ;;  %v3143_v41 = vmul.f32 1.442695, %v3134_v12 }
 0xb4d   :  { %v2932_v36 = vpop.f32.mrf.mxu2 }
 0xb4e   :  { %3890 = vpow2.f32 %v3620_v53  ;;  %v2933_v19 = vadd.f32 %v2932_v36, %v2890_v6  ;;  %v2952_v27 = vpop.f32.mrf.mxu3 }
 0xb4f   :  { %v2953_v55 = vadd.f32 %v2952_v27, %v2891_v59 }
 0xb50   :  { %v2975_v52 = vadd.f32 %v2933_v19, %v7142_v14  ;;  %v3195_v19 = vpop.permute.xlu0 %3194 }
 0xb51   :  { %v3104_v7 = vpop.f32.mrf.mxu0 }
 0xb52   :  { %v3621_v13 = vmul.f32 -1.442695, %v2975_v52  ;;  %v6792_v16 = vadd.f32 %v6753_v43, %v3104_v7 }
 0xb54   :  { %v3891_v8 = vpop.eup %3890  ;;  %3892 = vpow2.f32 %v3621_v13  ;;  %3128 = vmax.xlane.f32.xlu0 %v6792_v16 }
 0xb55   :  { %v2959_v50 = vadd.f32 1.0, %v3891_v8 }
 0xb57   :  { %3894 = vrcp.f32 %v2959_v50  ;;  %v2971_v40 = vand.u32 2147483648, %v2959_v50  ;;  %v2969_v63 = vand.u32 2147483647, %v2959_v50  ;;  %vm2965_vm1 = vweird.f32 %v2959_v50 }
 0xb58   :  { %v3201_v14 = vpop.permute.xlu0 %3200 }
 0xb59   :  { %v2972_v48 = vor.u32 1.1754944e-38, %v2971_v40  ;;  %vm2970_vm3 = vcmp.eq.f32.partialorder %v2969_v63, 8.507059e+37 }
 0xb5a   :  { %v3893_v22 = vpop.eup %3892 }
 0xb5b   :  { %v2979_v10 = vadd.f32 1.0, %v3893_v22 }
 0xb5d   :  { %v3895_v35 = vpop.eup %3894  ;;  %3896 = vrcp.f32 %v2979_v10  ;;  %v2991_v21 = vand.u32 2147483648, %v2979_v10  ;;  %v2989_v45 = vand.u32 2147483647, %v2979_v10  ;;  %vm2985_vm5 = vweird.f32 %v2979_v10 }
 0xb5e   :  { %v2961_v51 = vmul.f32 %v3895_v35, %v2959_v50  ;;  %vm2966_vm0 = vweird.f32 %v3895_v35  ;;  %v3188_v50 = vlaneseq }
 0xb5f   :  { %vm2967_vm2 = vmor %vm2965_vm1, %vm2966_vm0  ;;  %v2992_v23 = vor.u32 1.1754944e-38, %v2991_v21  ;;  %vm2990_vm7 = vcmp.eq.f32.partialorder %v2989_v45, 8.507059e+37  ;;  %vm3274_vm1 = vcmask 7168  }
 0xb60   :  { %v2962_v54 = vsub.f32 1.0, %v2961_v51  ;;  %v6823_v52 = vpop.xlane.xlu0 %3120 }
 0xb61   :  { %v3133_v27 = vsub.f32 %v6762_v47, %v6823_v52 }
 0xb62   :  { %v2963_v46 = vmul.f32 %v3895_v35, %v2962_v54 }
 0xb63   :  { %v3897_v44 = vpop.eup %3896 }
 0xb64   :  { %v2981_v42 = vmul.f32 %v3897_v44, %v2979_v10  ;;  %v2964_v15 = vadd.f32 %v3895_v35, %v2963_v46  ;;  %3203 = vperm.xlu2 %3744, %v6798_v61   ;;  %vm2986_vm4 = vweird.f32 %v3897_v44 }
 0xb65   :  { %vm2987_vm6 = vmor %vm2985_vm5, %vm2986_vm4  ;;  %vm3243_vm4 = vcmp.ne.s32.totalorder %v6798_v61, 0 }
 0xb66   :  { %v2968_v34 = vsel %vm2967_vm2, %v3895_v35, %v2964_v15  ;;  %v2982_v24 = vsub.f32 1.0, %v2981_v42  ;;  %v3189_v35 = vand.u32 127, %v3188_v50  ;;  %v3141_v42 = vmul.f32 1.442695, %v3133_v27 }
 0xb67   :  { %v2973_v49 = vsel %vm2970_vm3, %v2972_v48, %v2968_v34 }
 0xb68   :  { %v2995_v31 = vmul.f32 %v2973_v49, %v2953_v55  ;;  %3209 = vperm.xlu0 %3742, %v6804_v62   ;;  %v2983_v20 = vmul.f32 %v3897_v44, %v2982_v24  ;;  %vm3212_vm8 = vcmp.eq.s32.totalorder %v3189_v35, %v3195_v19  ;;  %vm3211_vm10 = vcmp.eq.s32.totalorder %v3189_v35, %v3192_v60 }
 0xb69   :  { %v3219_v51 = vsel %vm3212_vm8, %v6762_v47, 0.0  ;;  %v3218_v34 = vsel %vm3211_vm10, %v6758_v26, 0.0  ;;  %vm3214_vm11 = vcmp.eq.s32.totalorder %v3189_v35, %v3201_v14  ;;  %vm3213_vm13 = vcmp.eq.s32.totalorder %v3189_v35, %v6809_v1 }
 0xb6a   :  { %v2996_v28 = vadd.f32 %v2995_v31, %v7143_v30  ;;  %v2984_v11 = vadd.f32 %v3897_v44, %v2983_v20  ;;  %v3221_v24 = vsel %vm3214_vm11, %v6770_v25, 0.0  ;;  %v3220_v26 = vsel %vm3213_vm13, %v6766_v56, 0.0  ;;  %v3979_v30 = vld [vmem:[%s6995_s30 + $0x8] sm:$0xff] }
 0xb6b   :  { %vm3240_vm15 = vcmp.ne.s32.totalorder %v3979_v30, 0  ;;  %vm3338_vm11 = vcmask 0  }
 0xb6c   :  { %3898 = vtanh.f32 %v2996_v28  ;;  %v2988_v38 = vsel %vm2987_vm6, %v3897_v44, %v2984_v11  ;;  %v6837_v44 = vld [vmem:[%s6995_s30 + $0x28] sm:$0xff]  ;;  %v3980_v28 = vld [vmem:[%s6995_s30] sm:$0xff]  ;;  %v7144_v11 = vmov 0.0   ;;  %vm3245_vm6 = vcmp.ne.s32.totalorder %v6804_v62, 0 }
 0xb6d   :  { %v2993_v3 = vsel %vm2990_vm7, %v2992_v23, %v2988_v38  ;;  %3900 = vpow2.f32 %v3139_v18  ;;  %vm3239_vm0 = vcmp.ne.s32.totalorder %v3980_v28, 0  ;;  %v3655_v38 = vsel %vm3240_vm15, 1.0, %v7144_v11 }
 0xb6e   :  { %v2998_v5 = vsub.f32 1.0, %v2993_v3  ;;  %v3000_v4 = vmul.f32 %v2993_v3, %v6775_v0  ;;  %v3135_v0 = vsub.f32 %v6770_v25, %v6819_v9  ;;  %3902 = vpow2.f32 %v3143_v41 }
 0xb6f   :  { %v3298_v56 = vsel %vm3274_vm1, %v3655_v38, 0.0  ;;  %v3654_v23 = vsel %vm3239_vm0, 1.0, %v7144_v11  ;;  %vm3244_vm5 = vcmp.ne.s32.totalorder %v6837_v44, 0  ;;  %v3660_v27 = vsel %vm3245_vm6, 1.0, %v7144_v11 }
 0xb70   :  { %v3145_v57 = vmul.f32 1.442695, %v3135_v0  ;;  %v3659_v61 = vsel %vm3244_vm5, 1.0, %v7144_v11 }
 0xb72   :  { %v3899_v32 = vpop.eup %3898  ;;  %3904 = vpow2.f32 %v3145_v57 }
 0xb73   :  { %v2999_v17 = vmul.f32 %v3899_v32, %v2998_v5  ;;  %v3901_v6 = vpop.eup %3900 }
 0xb74   :  { %v3903_v53 = vpop.eup %3902 }
 0xb75   :  { %v3001_v37 = vadd.f32 %v3000_v4, %v2999_v17 }
 0xb77   :  { %v3014_v29 = vpack.c.bf16 %v3001_v37, %v3001_v37 }
 0xb78   :  { %v3905_v36 = vpop.eup %3904 }
 0xb79   :  { %3106 = vmatmul.bf16.gmra.mxu0 %v3014_v29 }
 0xb8d   :  { %3153 = vadd.xlane.f32.xlu2 %v3901_v6 }
 0xb92   :  { %3157 = vadd.xlane.f32.xlu0 %v3903_v53 }
 0xb95   :  { %3159 = vadd.xlane.f32.xlu2 %v3905_v36 }
 0xbbf   :  { %v6829_v10 = vpop.xlane.xlu2 %3126 }
 0xbc0   :  { %v3136_v15 = vsub.f32 %v6787_v39, %v6829_v10 }
 0xbc2   :  { %v3147_v48 = vmul.f32 1.442695, %v3136_v15  ;;  %v3308_v15 = vsel %vm3274_vm1, %v3660_v27, 0.0 }
 0xbc7   :  { %v6825_v7 = vpop.xlane.xlu0 %3128  ;;  %v3204_v54 = vpop.permute.xlu2 %3203 }
 0xbc8   :  { %v3137_v13 = vsub.f32 %v6792_v16, %v6825_v7  ;;  %vm3215_vm9 = vcmp.eq.s32.totalorder %v3189_v35, %v3204_v54 }
 0xbc9   :  { %v3222_v40 = vsel %vm3215_vm9, %v6787_v39, 0.0 }
 0xbca   :  { %v3149_v8 = vmul.f32 1.442695, %v3137_v13 }
 0xbcc   :  { %3906 = vpow2.f32 %v3149_v8  ;;  %v3981_v8 = vld [vmem:[%s6995_s30 + $0x18] sm:$0xff] }
 0xbcd   :  { %3908 = vpow2.f32 %v3141_v42  ;;  %vm3242_vm2 = vcmp.ne.s32.totalorder %v3981_v8, 0 }
 0xbce   :  { %3910 = vpow2.f32 %v3147_v48 }
 0xbd2   :  { %v3907_v22 = vpop.eup %3906 }
 0xbd3   :  { %3163 = vadd.xlane.f32.xlu0 %v3907_v22  ;;  %v3909_v55 = vpop.eup %3908 }
 0xbda   :  { %v3210_v47 = vpop.permute.xlu0 %3209 }
 0xbdb   :  { %3227 = vadd.xlane.f32.xlu0 %v3219_v51  ;;  %vm3217_vm12 = vcmp.eq.s32.totalorder %v3189_v35, %v3210_v47  ;;  %v3658_v51 = vsel %vm3243_vm4, 1.0, %v7144_v11 }
 0xbe3   :  { %3233 = vadd.xlane.f32.xlu0 %v3222_v40  ;;  %v3304_v40 = vsel %vm3274_vm1, %v3658_v51, 0.0 }
 0xbf6   :  { %v3107_v59 = vpop.f32.mrf.mxu0 }
 0xbf7   :  { %v3108_v46 = vadd.f32 %v6753_v43, %v3107_v59  ;;  %v3911_v43 = vpop.eup %3910 }
 0xbf9   :  { %3130 = vmax.xlane.f32.xlu1 %v3108_v46  ;;  %v3224_v49 = vsel %vm3217_vm12, %v3108_v46, 0.0 }
 0xbfe   :  { %v3109_v63 = vpop.f32.mrf.mxu0 }
 0xbff   :  { %v3306_v63 = vsel %vm3274_vm1, %v3659_v61, 0.0 }
 0xc00   :  { %v3154_v32 = vpop.xlane.xlu2 %3153 }
 0xc05   :  { %v3158_v5 = vpop.xlane.xlu0 %3157 }
 0xc12   :  { %3206 = vperm.xlu1 %3743, %v6837_v44  }
 0xc3c   :  { %3155 = vadd.xlane.f32.xlu1 %v3909_v55  ;;  %v3160_v55 = vpop.xlane.xlu2 %3159 }
 0xc44   :  { %3161 = vadd.xlane.f32.xlu1 %v3911_v43 }
 0xc46   :  { %v3164_v17 = vpop.xlane.xlu0 %3163 }
 0xc4c   :  { %3225 = vadd.xlane.f32.xlu1 %v3218_v34 }
 0xc4e   :  { %v3228_v12 = vpop.xlane.xlu0 %3227 }
 0xc54   :  { %3231 = vadd.xlane.f32.xlu1 %v3221_v24 }
 0xc56   :  { %v3234_v28 = vpop.xlane.xlu0 %3233 }
 0xc5c   :  { %3237 = vadd.xlane.f32.xlu1 %v3224_v49 }
 0xc6c   :  { %v6846_v31 = vpop.xlane.xlu1 %3130 }
 0xc6d   :  { %v3138_v39 = vsub.f32 %v3108_v46, %v6846_v31 }
 0xc6f   :  { %v3151_v20 = vmul.f32 1.442695, %v3138_v39 }
 0xc71   :  { %3912 = vpow2.f32 %v3151_v20 }
 0xc77   :  { %v3913_v21 = vpop.eup %3912 }
 0xc78   :  { %3165 = vadd.xlane.f32.xlu2 %v3913_v21 }
 0xc80   :  { %3229 = vadd.xlane.f32.xlu2 %v3220_v26 }
 0xc84   :  { %v3207_v45 = vpop.permute.xlu1 %3206 }
 0xc85   :  { %vm3216_vm14 = vcmp.eq.s32.totalorder %v3189_v35, %v3207_v45 }
 0xc86   :  { %v3223_v25 = vsel %vm3216_vm14, %v6792_v16, 0.0  ;;  %v3297_v16 = vsel %vm3274_vm1, %v3654_v23, 0.0 }
 0xc87   :  { %v3299_v3 = vadd.f32 %v3298_v56, %v3297_v16 }
 0xc88   :  { %3235 = vadd.xlane.f32.xlu2 %v3223_v25 }
 0xcaf   :  { %v3156_v60 = vpop.xlane.xlu1 %3155 }
 0xcb0   :  { %3914 = vlog2.f32 %v3156_v60 }
 0xcb1   :  { %3916 = vlog2.f32 %v3154_v32 }
 0xcb2   :  { %3918 = vlog2.f32 %v3160_v55 }
 0xcb6   :  { %v3915_v4 = vpop.eup %3914 }
 0xcb7   :  { %v3917_v37 = vpop.eup %3916  ;;  %v3170_v29 = vmul.f32 0.6931472, %v3915_v4  ;;  %v3162_v1 = vpop.xlane.xlu1 %3161 }
 0xcb8   :  { %v3168_v18 = vmul.f32 0.6931472, %v3917_v37  ;;  %3920 = vlog2.f32 %v3162_v1  ;;  %v3919_v44 = vpop.eup %3918 }
 0xcb9   :  { %v3182_v58 = vadd.f32 %v3170_v29, %v6823_v52  ;;  %v3982_v52 = vld [vmem:[%s6995_s30 + $0x10] sm:$0xff]  ;;  %3922 = vlog2.f32 %v3158_v5  ;;  %v3174_v24 = vmul.f32 0.6931472, %v3919_v44 }
 0xcba   :  { %v3181_v41 = vadd.f32 %v3168_v18, %v6811_v2  ;;  %vm3241_vm3 = vcmp.ne.s32.totalorder %v3982_v52, 0  ;;  %v3657_v2 = vsel %vm3242_vm2, 1.0, %v7144_v11 }
 0xcbb   :  { %v3261_v0 = vsub.f32 %v3182_v58, %v3228_v12  ;;  %v3656_v50 = vsel %vm3241_vm3, 1.0, %v7144_v11  ;;  %v3302_v22 = vsel %vm3274_vm1, %v3657_v2, 0.0  ;;  %v3184_v21 = vadd.f32 %v3174_v24, %v6819_v9 }
 0xcbc   :  { %v3300_v35 = vsel %vm3274_vm1, %v3656_v50, 0.0 }
 0xcbd   :  { %v3268_v6 = vmul.f32 %v3655_v38, %v3261_v0  ;;  %v3301_v54 = vadd.f32 %v3300_v35, %v3299_v3 }
 0xcbe   :  { %v3921_v43 = vpop.eup %3920 }
 0xcbf   :  { %v3226_v57 = vpop.xlane.xlu1 %3225  ;;  %v3276_v19 = vsel %vm3274_vm1, %v3268_v6, 0.0  ;;  %v3303_v59 = vadd.f32 %v3302_v22, %v3301_v54  ;;  %v3923_v34 = vpop.eup %3922  ;;  %v3176_v47 = vmul.f32 0.6931472, %v3921_v43 }
 0xcc0   :  { %v3260_v53 = vsub.f32 %v3181_v41, %v3226_v57  ;;  %v3172_v49 = vmul.f32 0.6931472, %v3923_v34 }
 0xcc1   :  { %v3305_v46 = vadd.f32 %v3304_v40, %v3303_v59  ;;  %v3185_v20 = vadd.f32 %v3176_v47, %v6829_v10 }
 0xcc2   :  { %v3267_v36 = vmul.f32 %v3654_v23, %v3260_v53  ;;  %v3183_v25 = vadd.f32 %v3172_v49, %v6815_v33 }
 0xcc3   :  { %v3307_v42 = vadd.f32 %v3306_v63, %v3305_v46  ;;  %v3264_v56 = vsub.f32 %v3185_v20, %v3234_v28 }
 0xcc4   :  { %v3275_v14 = vsel %vm3274_vm1, %v3267_v36, 0.0 }
 0xcc5   :  { %v3277_v13 = vadd.f32 %v3276_v19, %v3275_v14  ;;  %v3309_v48 = vadd.f32 %v3308_v15, %v3307_v42  ;;  %v3271_v60 = vmul.f32 %v3658_v51, %v3264_v56 }
 0xcc7   :  { %3310 = vadd.xlane.f32.xlu2 %v3309_v48  ;;  %v3232_v39 = vpop.xlane.xlu1 %3231  ;;  %v3282_v18 = vsel %vm3274_vm1, %v3271_v60, 0.0 }
 0xcc8   :  { %v3263_v45 = vsub.f32 %v3184_v21, %v3232_v39 }
 0xcca   :  { %v3270_v3 = vmul.f32 %v3657_v2, %v3263_v45 }
 0xccc   :  { %v3280_v4 = vsel %vm3274_vm1, %v3270_v3, 0.0 }
 0xceb   :  { %v3166_v62 = vpop.xlane.xlu2 %3165 }
 0xcec   :  { %3924 = vlog2.f32 %v3166_v62 }
 0xced   :  { %3926 = vlog2.f32 %v3164_v17  ;;  %v3238_v17 = vpop.xlane.xlu1 %3237 }
 0xcf2   :  { %v3925_v26 = vpop.eup %3924 }
 0xcf3   :  { %v3927_v30 = vpop.eup %3926  ;;  %v3180_v11 = vmul.f32 0.6931472, %v3925_v26  ;;  %v3230_v38 = vpop.xlane.xlu2 %3229 }
 0xcf4   :  { %v3262_v23 = vsub.f32 %v3183_v25, %v3230_v38  ;;  %v3178_v16 = vmul.f32 0.6931472, %v3927_v30 }
 0xcf5   :  { %v3187_v5 = vadd.f32 %v3180_v11, %v6846_v31 }
 0xcf6   :  { %v3269_v32 = vmul.f32 %v3656_v50, %v3262_v23  ;;  %v3186_v33 = vadd.f32 %v3178_v16, %v6825_v7 }
 0xcf7   :  { %v3266_v37 = vsub.f32 %v3187_v5, %v3238_v17 }
 0xcf8   :  { %v3278_v10 = vsel %vm3274_vm1, %v3269_v32, 0.0 }
 0xcf9   :  { %v3279_v9 = vadd.f32 %v3278_v10, %v3277_v13  ;;  %v3273_v41 = vmul.f32 %v3660_v27, %v3266_v37 }
 0xcfb   :  { %v3236_v29 = vpop.xlane.xlu2 %3235  ;;  %v3281_v1 = vadd.f32 %v3280_v4, %v3279_v9  ;;  %v3286_v6 = vsel %vm3274_vm1, %v3273_v41, 0.0 }
 0xcfc   :  { %v3265_v58 = vsub.f32 %v3186_v33, %v3236_v29 }
 0xcfd   :  { %v3283_v12 = vadd.f32 %v3282_v18, %v3281_v1 }
 0xcfe   :  { %v3272_v0 = vmul.f32 %v3659_v61, %v3265_v58 }
 0xd00   :  { %v3284_v31 = vsel %vm3274_vm1, %v3272_v0, 0.0 }
 0xd01   :  { %v3285_v57 = vadd.f32 %v3284_v31, %v3283_v12 }
 0xd03   :  { %v3287_v53 = vadd.f32 %v3286_v6, %v3285_v57 }
 0xd05   :  { %3288 = vadd.xlane.f32.xlu0 %v3287_v53 }
 0xd3a   :  { %v3311_v36 = vpop.xlane.xlu2 %3310 }
 0xd3b   :  { %v3312_v19 = vrot.slane %v3311_v36, 4 }
 0xd3d   :  { %v3313_v14 = vadd.f32 %v3312_v19, %v3311_v36 }
 0xd3f   :  { %v3314_v13 = vrot.slane %v3313_v14, 2 }
 0xd41   :  { %v3315_v2 = vadd.f32 %v3314_v13, %v3313_v14 }
 0xd43   :  { %v3316_v35 = vrot.slane %v3315_v2, 1 }
 0xd45   :  { %v3317_v40 = vadd.f32 %v3316_v35, %v3315_v2 }
 0xd78   :  { %v3289_v7 = vpop.xlane.xlu0 %3288 }
 0xd79   :  { %v3290_v8 = vrot.slane %v3289_v7, 4 }
 0xd7b   :  { %v3291_v52 = vadd.f32 %v3290_v8, %v3289_v7 }
 0xd7d   :  { %v3292_v50 = vrot.slane %v3291_v52, 2 }
 0xd7f   :  { %v3293_v22 = vadd.f32 %v3292_v50, %v3291_v52 }
 0xd81   :  { %v3294_v51 = vrot.slane %v3293_v22, 1 }
 0xd83   :  { %v3295_v54 = vadd.f32 %v3294_v51, %v3293_v22 }
 0xd85   :  { %3732 = vpush %v3295_v54 }
 0xd86   :  { %3734 = vpush %v3317_v40 }
 0xdb6   :  { %s6895_s30 = spop %3732 }
 0xdb7   :  { %s3735_s6 = spop %3734 }
 0xdb8   :  { %s3319_s15 = smax.f32 %s4011_s8, %s3735_s6 }
 0xdb9   :  { %v3320_v59 = vstv %s3319_s15 }
 0xdba   :  { %3928 = vrcp.f32 %v3320_v59  ;;  %v3332_v27 = vand.u32 2147483648, %v3320_v59  ;;  %v3330_v15 = vand.u32 2147483647, %v3320_v59  ;;  %vm3326_vm8 = vweird.f32 %v3320_v59 }
 0xdbc   :  { %v3333_v55 = vor.u32 1.1754944e-38, %v3332_v27  ;;  %vm3331_vm10 = vcmp.eq.f32.partialorder %v3330_v15, 8.507059e+37 }
 0xdc0   :  { %v3929_v61 = vpop.eup %3928 }
 0xdc1   :  { %v3322_v46 = vmul.f32 %v3929_v61, %v3320_v59  ;;  %vm3327_vm7 = vweird.f32 %v3929_v61 }
 0xdc2   :  { %vm3328_vm9 = vmor %vm3326_vm8, %vm3327_vm7 }
 0xdc3   :  { %v3323_v63 = vsub.f32 1.0, %v3322_v46 }
 0xdc5   :  { %v3324_v42 = vmul.f32 %v3929_v61, %v3323_v63 }
 0xdc7   :  { %v3325_v48 = vadd.f32 %v3929_v61, %v3324_v42 }
 0xdc9   :  { %v3329_v44 = vsel %vm3328_vm9, %v3929_v61, %v3325_v48 }
 0xdca   :  { %v3334_v43 = vsel %vm3331_vm10, %v3333_v55, %v3329_v44 }
 0xdcb   :  { %3736 = vpush %v3334_v43 }
 0xdfc   :  { %s3737_s4 = spop %3736 }
 0xdfd   :  { %s3336_s18 = smul.f32 %s3737_s4, %s6895_s30 }
 0xdff   :  { %v3337_v34 = vstv %s3336_s18 }
 0xe00   :  { %3339 = vst.msk [vmem:[#allocation5] sm:$0x1] %vm3338_vm11, %v3337_v34 }
 0xe01   :  { %3350 = dma.vmem_to_hbm [thread:$0]  %s3346_s25, 16, %s3348_s21, [#allocation6]  }
 0xe02   :  { %4007 = dma.done.wait [#allocation6], 16  }
 0xe03   :  { %4008 = vsyncadd [#allocation6], 4294967280 }
 0xe04   :  { %3355 = vsyncpa [#allocation6], 1 }

</bundles_post_ra>
